<compile_context>
chip_gen: v5e
topology: v5e:2x2
jax: 0.10.0
libtpu: 0.0.40
codegen_flags: <defaults>
</compile_context>

<pallas_src>
import jax
import jax.numpy as jnp
from jax.experimental import pallas as pl
from jax.experimental.pallas import tpu as pltpu


# ---------------------------------------------------------------------------
# in-kernel building blocks (pure-value helpers called from the fused kernel)
# ---------------------------------------------------------------------------
def _conv3x3_silu(x_flat, w_ref, b_ref, mask_ref, W):
    """'same' 3x3 conv + bias + SiLU on a flattened (Cin, H*W) activation.

    x_flat  : (Cin, H*W) f32, spatial row-major on the lane dim.
    w_ref   : (Cout, 9*Cin) bf16, columns ordered (kh, kw, ci).
    b_ref   : (Cout, 1) f32.
    mask_ref: (2, H*W) f32; row 0 zeroes output col 0 (kw==0 taps),
              row 1 zeroes output col W-1 (kw==2 taps).
    """
    Cin, HW = x_flat.shape
    pad = jnp.zeros((Cin, W + 1), dtype=x_flat.dtype)
    # H-padded, flattened buffer with 1 element of slack each side so every
    # 3x3 tap is a plain static lane slice:
    #   buf[o + kh*W + kw] == x[h + kh - 1, w + kw - 1]   (o = h*W + w)
    buf = jnp.concatenate([pad, x_flat, pad], axis=1)       # (Cin, HW + 2W + 2)

    masks = mask_ref[...]
    m_first = masks[0:1, :]                                 # (1, HW)
    m_last = masks[1:2, :]                                  # (1, HW)

    taps = []
    for kh in range(3):
        for kw in range(3):
            s = kh * W + kw
            t = buf[:, s:s + HW]                            # (Cin, HW)
            if kw == 0:                                     # fix row wrap-around
                t = t * m_first
            elif kw == 2:
                t = t * m_last
            taps.append(t)
    patches = jnp.concatenate(taps, axis=0).astype(jnp.bfloat16)  # (9*Cin, HW)

    acc = jnp.dot(w_ref[...], patches,
                  preferred_element_type=jnp.float32)       # (Cout, HW) f32
    acc = acc + b_ref[...]
    # SiLU = x * sigmoid(x); reciprocal routed to the (otherwise idle) EUP.
    return acc * pl.reciprocal(1.0 + jnp.exp(-acc), approx=True)


def _maxpool2x2(y, sel_ref):
    """2x2/stride-2 max-pool of a flattened (C, H*W) map.

    Each of the 4 one-hot selector matrices picks one window position and
    compacts it to the pooled row-major layout via an MXU matmul; the pool is
    the element-wise max of the four results."""
    yb = y.astype(jnp.bfloat16)
    out = jnp.dot(yb, sel_ref[0], preferred_element_type=jnp.float32)
    for i in range(1, 4):
        out = jnp.maximum(
            out, jnp.dot(yb, sel_ref[i], preferred_element_type=jnp.float32))
    return out                                              # (C, H*W/4) f32


# ---------------------------------------------------------------------------
# fused whole-network kernel (one image per grid step)
# ---------------------------------------------------------------------------
def _cnn_kernel(x_ref, w1_ref, b1_ref, mk1_ref,
                w2_ref, b2_ref, mk2_ref,
                w3_ref, b3_ref, mk3_ref,
                w4_ref, b4_ref, sel1_ref, sel2_ref, o_ref):
    x0 = x_ref[0]                                           # (1, 784) f32
    y1 = _conv3x3_silu(x0, w1_ref, b1_ref, mk1_ref, 28)     # (8, 784)
    a1 = _maxpool2x2(y1, sel1_ref)                          # (8, 196)
    y2 = _conv3x3_silu(a1, w2_ref, b2_ref, mk2_ref, 14)     # (32, 196)
    a2 = _maxpool2x2(y2, sel2_ref)                          # (32, 49)
    y3 = _conv3x3_silu(a2, w3_ref, b3_ref, mk3_ref, 7)      # (64, 49)
    feat = jnp.max(y3, axis=1, keepdims=True)               # MaxPool2d(7,7) -> (64, 1)
    head = jnp.dot(w4_ref[...], feat.astype(jnp.bfloat16),
                   preferred_element_type=jnp.float32) + b4_ref[...]  # (10, 1)
    o_ref[0] = head.astype(o_ref.dtype)


# ---------------------------------------------------------------------------
# wrapper: constant prep (layout plumbing only) + the single pallas_call
# ---------------------------------------------------------------------------
def _pool_selectors(H, W, p=2):
    Ho, Wo = H // p, W // p
    jj, kk = jnp.meshgrid(jnp.arange(Ho), jnp.arange(Wo), indexing="ij")
    rows = jnp.arange(H * W)[:, None]
    mats = []
    for a in range(p):
        for b in range(p):
            src = ((p * jj + a) * W + (p * kk + b)).reshape(-1)        # (Ho*Wo,)
            mats.append((rows == src[None, :]).astype(jnp.bfloat16))   # (HW, Ho*Wo)
    return jnp.stack(mats)                                  # (4, HW, Ho*Wo)


def _edge_masks(H, W):
    col = jnp.arange(H * W) % W
    return jnp.stack([(col != 0).astype(jnp.float32),
                      (col != W - 1).astype(jnp.float32)])   # (2, H*W)


def _prep_conv_w(w):
    # PyTorch (Cout, Cin, 3, 3) -> (Cout, 9*Cin) bf16, minor order (kh, kw, ci)
    cout, cin = w.shape[0], w.shape[1]
    return jnp.transpose(w, (0, 2, 3, 1)).reshape(cout, 9 * cin).astype(jnp.bfloat16)


def cnn_forward(x_nchw, params):
    (w1, b1), (w2, b2), (w3, b3), (w4, b4) = params
    N = x_nchw.shape[0]
    x_flat = x_nchw.astype(jnp.float32).reshape(N, 1, 28 * 28)

    w1m, w2m, w3m = _prep_conv_w(w1), _prep_conv_w(w2), _prep_conv_w(w3)
    w4m = w4.reshape(10, 64).astype(jnp.bfloat16)
    b1c = b1.reshape(8, 1).astype(jnp.float32)
    b2c = b2.reshape(32, 1).astype(jnp.float32)
    b3c = b3.reshape(64, 1).astype(jnp.float32)
    b4c = b4.reshape(10, 1).astype(jnp.float32)
    mk1, mk2, mk3 = _edge_masks(28, 28), _edge_masks(14, 14), _edge_masks(7, 7)
    sel1, sel2 = _pool_selectors(28, 28), _pool_selectors(14, 14)

    def full(shape):
        return pl.BlockSpec(shape, lambda n: (0,) * len(shape))

    out = pl.pallas_call(
        _cnn_kernel,
        out_shape=jax.ShapeDtypeStruct((N, 10, 1), jnp.float32),
        grid_spec=pltpu.PrefetchScalarGridSpec(
            num_scalar_prefetch=0,
            grid=(N,),
            in_specs=[
                pl.BlockSpec((1, 1, 784), lambda n: (n, 0, 0)),
                full((8, 9)), full((8, 1)), full((2, 784)),
                full((32, 72)), full((32, 1)), full((2, 196)),
                full((64, 288)), full((64, 1)), full((2, 49)),
                full((10, 64)), full((10, 1)),
                full((4, 784, 196)), full((4, 196, 49)),
            ],
            out_specs=pl.BlockSpec((1, 10, 1), lambda n: (n, 0, 0)),
        ),
        compiler_params=pltpu.CompilerParams(
            dimension_semantics=("parallel",)),
    )(x_flat, w1m, b1c, mk1, w2m, b2c, mk2, w3m, b3c, mk3, w4m, b4c, sel1, sel2)
    # nn.Flatten() of the (N, 10, 1, 1) head output -> (N, 10)
    return out.reshape(N, 10)


# ---------------------------------------------------------------------------
# plain-JAX reference (for a loose correctness check) + deterministic params
# ---------------------------------------------------------------------------
def _reference_forward(x, params):
    (w1, b1), (w2, b2), (w3, b3), (w4, b4) = params

    def conv(h, w, b, pad):
        y = jax.lax.conv_general_dilated(
            h, w, window_strides=(1, 1), padding=[(pad, pad), (pad, pad)],
            dimension_numbers=("NCHW", "OIHW", "NCHW"))
        return y + b.reshape(1, -1, 1, 1)

    def pool(h, p):
        return jax.lax.reduce_window(h, -jnp.inf, jax.lax.max,
                                     (1, 1, p, p), (1, 1, p, p), "VALID")

    silu = lambda v: v * jax.nn.sigmoid(v)
    h = pool(silu(conv(x, w1, b1, 1)), 2)
    h = pool(silu(conv(h, w2, b2, 1)), 2)
    h = pool(silu(conv(h, w3, b3, 1)), 7)
    h = conv(h, w4, b4, 0)
    return h.reshape(x.shape[0], 10)


def _init_conv(key, cin, cout, k):
    kw_, kb_ = jax.random.split(key)
    fan_in = cin * k * k
    bound = 1.0 / (fan_in ** 0.5)
    w = jax.random.uniform(kw_, (cout, cin, k, k), jnp.float32, -bound, bound)
    b = jax.random.uniform(kb_, (cout,), jnp.float32, -bound, bound)
    return w, b


if __name__ == "__main__":
    key = jax.random.PRNGKey(0)
    k_x, k1, k2, k3, k4 = jax.random.split(key, 5)
    # 28x28 input is implied by the architecture (28 -> 14 -> 7 -> 1 after pools)
    x = jax.random.normal(k_x, (2, 1, 28, 28), jnp.float32)
    params = (_init_conv(k1, 1, 8, 3), _init_conv(k2, 8, 32, 3),
              _init_conv(k3, 32, 64, 3), _init_conv(k4, 64, 10, 1))

    fwd = jax.jit(cnn_forward)
    out = jax.block_until_ready(fwd(x, params))

    assert out.shape == (2, 10), out.shape
    assert out.dtype == jnp.float32
    assert bool(jnp.all(jnp.isfinite(out)))

    # loose tolerance: conv matmuls use bf16 MXU operands (f32 accumulation)
    ref = _reference_forward(x, params)
    max_err = float(jnp.max(jnp.abs(out - ref)))
    assert max_err < 7.5e-2, max_err

    print("KERNEL_OK")
</pallas_src>

<mosaic_0001>
module attributes {stable_mosaic.version = 11 : i64} {
  func.func @_cnn_kernel(%arg0: i32, %arg1: memref<1x1x784xf32, #tpu.memory_space<vmem>>, %arg2: memref<8x9xbf16, #tpu.memory_space<vmem>>, %arg3: memref<8x1xf32, #tpu.memory_space<vmem>>, %arg4: memref<2x784xf32, #tpu.memory_space<vmem>>, %arg5: memref<32x72xbf16, #tpu.memory_space<vmem>>, %arg6: memref<32x1xf32, #tpu.memory_space<vmem>>, %arg7: memref<2x196xf32, #tpu.memory_space<vmem>>, %arg8: memref<64x288xbf16, #tpu.memory_space<vmem>>, %arg9: memref<64x1xf32, #tpu.memory_space<vmem>>, %arg10: memref<2x49xf32, #tpu.memory_space<vmem>>, %arg11: memref<10x64xbf16, #tpu.memory_space<vmem>>, %arg12: memref<10x1xf32, #tpu.memory_space<vmem>>, %arg13: memref<4x784x196xbf16, #tpu.memory_space<vmem>>, %arg14: memref<4x196x49xbf16, #tpu.memory_space<vmem>>, %arg15: memref<1x10x1xf32, #tpu.memory_space<vmem>>) attributes {dimension_semantics = [#tpu.dimension_semantics<parallel>], iteration_bounds = array<i64: 2>, scalar_prefetch = 0 : i64, scratch_operands = 0 : i64, tpu.core_type = #tpu.core_type<tc>, window_params = [{transform_indices = @transform_0, window_bounds = array<i64: 1, 1, 784>}, {pipeline_mode = #tpu.pipeline_mode<synchronous>, transform_indices = @transform_1, window_bounds = array<i64: 8, 9>}, {pipeline_mode = #tpu.pipeline_mode<synchronous>, transform_indices = @transform_2, window_bounds = array<i64: 8, 1>}, {pipeline_mode = #tpu.pipeline_mode<synchronous>, transform_indices = @transform_3, window_bounds = array<i64: 2, 784>}, {pipeline_mode = #tpu.pipeline_mode<synchronous>, transform_indices = @transform_4, window_bounds = array<i64: 32, 72>}, {pipeline_mode = #tpu.pipeline_mode<synchronous>, transform_indices = @transform_5, window_bounds = array<i64: 32, 1>}, {pipeline_mode = #tpu.pipeline_mode<synchronous>, transform_indices = @transform_6, window_bounds = array<i64: 2, 196>}, {pipeline_mode = #tpu.pipeline_mode<synchronous>, transform_indices = @transform_7, window_bounds = array<i64: 64, 288>}, {pipeline_mode = #tpu.pipeline_mode<synchronous>, transform_indices = @transform_8, window_bounds = array<i64: 64, 1>}, {pipeline_mode = #tpu.pipeline_mode<synchronous>, transform_indices = @transform_9, window_bounds = array<i64: 2, 49>}, {pipeline_mode = #tpu.pipeline_mode<synchronous>, transform_indices = @transform_10, window_bounds = array<i64: 10, 64>}, {pipeline_mode = #tpu.pipeline_mode<synchronous>, transform_indices = @transform_11, window_bounds = array<i64: 10, 1>}, {pipeline_mode = #tpu.pipeline_mode<synchronous>, transform_indices = @transform_12, window_bounds = array<i64: 4, 784, 196>}, {pipeline_mode = #tpu.pipeline_mode<synchronous>, transform_indices = @transform_13, window_bounds = array<i64: 4, 196, 49>}, {transform_indices = @transform_14, window_bounds = array<i64: 1, 10, 1>}]} {
    %c0 = arith.constant 0 : index
    %c0_0 = arith.constant 0 : index
    %c0_1 = arith.constant 0 : index
    %0 = vector.load %arg1[%c0, %c0_0, %c0_1] : memref<1x1x784xf32, #tpu.memory_space<vmem>>, vector<1x1x784xf32>
    %1 = vector.shape_cast %0 : vector<1x1x784xf32> to vector<1x784xf32>
    %cst = arith.constant 0.000000e+00 : f32
    %2 = vector.broadcast %cst : f32 to vector<1x29xf32>
    %3 = tpu.concatenate %2, %1, %2 in 1 : vector<1x29xf32>, vector<1x784xf32>, vector<1x29xf32> -> vector<1x842xf32>
    %c0_2 = arith.constant 0 : index
    %c0_3 = arith.constant 0 : index
    %4 = vector.load %arg4[%c0_2, %c0_3] : memref<2x784xf32, #tpu.memory_space<vmem>>, vector<2x784xf32>
    %5 = vector.extract_strided_slice %4 {offsets = [0, 0], sizes = [1, 784], strides = [1, 1]} : vector<2x784xf32> to vector<1x784xf32>
    %6 = vector.extract_strided_slice %4 {offsets = [1, 0], sizes = [1, 784], strides = [1, 1]} : vector<2x784xf32> to vector<1x784xf32>
    %7 = vector.extract_strided_slice %3 {offsets = [0, 0], sizes = [1, 784], strides = [1, 1]} : vector<1x842xf32> to vector<1x784xf32>
    %8 = arith.mulf %7, %5 : vector<1x784xf32>
    %9 = vector.extract_strided_slice %3 {offsets = [0, 1], sizes = [1, 784], strides = [1, 1]} : vector<1x842xf32> to vector<1x784xf32>
    %10 = vector.extract_strided_slice %3 {offsets = [0, 2], sizes = [1, 784], strides = [1, 1]} : vector<1x842xf32> to vector<1x784xf32>
    %11 = arith.mulf %10, %6 : vector<1x784xf32>
    %12 = vector.extract_strided_slice %3 {offsets = [0, 28], sizes = [1, 784], strides = [1, 1]} : vector<1x842xf32> to vector<1x784xf32>
    %13 = arith.mulf %12, %5 : vector<1x784xf32>
    %14 = vector.extract_strided_slice %3 {offsets = [0, 29], sizes = [1, 784], strides = [1, 1]} : vector<1x842xf32> to vector<1x784xf32>
    %15 = vector.extract_strided_slice %3 {offsets = [0, 30], sizes = [1, 784], strides = [1, 1]} : vector<1x842xf32> to vector<1x784xf32>
    %16 = arith.mulf %15, %6 : vector<1x784xf32>
    %17 = vector.extract_strided_slice %3 {offsets = [0, 56], sizes = [1, 784], strides = [1, 1]} : vector<1x842xf32> to vector<1x784xf32>
    %18 = arith.mulf %17, %5 : vector<1x784xf32>
    %19 = vector.extract_strided_slice %3 {offsets = [0, 57], sizes = [1, 784], strides = [1, 1]} : vector<1x842xf32> to vector<1x784xf32>
    %20 = vector.extract_strided_slice %3 {offsets = [0, 58], sizes = [1, 784], strides = [1, 1]} : vector<1x842xf32> to vector<1x784xf32>
    %21 = arith.mulf %20, %6 : vector<1x784xf32>
    %22 = tpu.concatenate %8, %9, %11, %13, %14, %16, %18, %19, %21 in 0 : vector<1x784xf32>, vector<1x784xf32>, vector<1x784xf32>, vector<1x784xf32>, vector<1x784xf32>, vector<1x784xf32>, vector<1x784xf32>, vector<1x784xf32>, vector<1x784xf32> -> vector<9x784xf32>
    %23 = arith.truncf %22 : vector<9x784xf32> to vector<9x784xbf16>
    %c0_4 = arith.constant 0 : index
    %c0_5 = arith.constant 0 : index
    %24 = vector.load %arg2[%c0_4, %c0_5] : memref<8x9xbf16, #tpu.memory_space<vmem>>, vector<8x9xbf16>
    %cst_6 = arith.constant dense<0.000000e+00> : vector<8x784xf32>
    %25 = tpu.matmul %24, %23, %cst_6 {dimension_numbers = #tpu.dot_dimension_numbers<[1], [0], [0], [1], [0, 0, 1, 1], [], []>} : vector<8x9xbf16>, vector<9x784xbf16>, vector<8x784xf32> -> vector<8x784xf32>
    %c0_7 = arith.constant 0 : index
    %c0_8 = arith.constant 0 : index
    %26 = vector.load %arg3[%c0_7, %c0_8] : memref<8x1xf32, #tpu.memory_space<vmem>>, vector<8x1xf32>
    %27 = vector.broadcast %26 : vector<8x1xf32> to vector<8x784xf32>
    %28 = arith.addf %25, %27 : vector<8x784xf32>
    %cst_9 = arith.constant 0.000000e+00 : f32
    %29 = vector.broadcast %cst_9 : f32 to vector<8x784xf32>
    %30 = arith.subf %29, %28 : vector<8x784xf32>
    %31 = math.exp %30 : vector<8x784xf32>
    %cst_10 = arith.constant 1.000000e+00 : f32
    %32 = vector.broadcast %cst_10 : f32 to vector<8x784xf32>
    %33 = arith.addf %32, %31 : vector<8x784xf32>
    %34 = tpu.reciprocal %33 {approx = true} : vector<8x784xf32> -> vector<8x784xf32>
    %35 = arith.mulf %28, %34 : vector<8x784xf32>
    %36 = arith.truncf %35 : vector<8x784xf32> to vector<8x784xbf16>
    %c0_11 = arith.constant 0 : index
    %c0_12 = arith.constant 0 : index
    %c0_13 = arith.constant 0 : index
    %37 = vector.load %arg13[%c0_11, %c0_12, %c0_13] : memref<4x784x196xbf16, #tpu.memory_space<vmem>>, vector<1x784x196xbf16>
    %38 = vector.shape_cast %37 : vector<1x784x196xbf16> to vector<784x196xbf16>
    %cst_14 = arith.constant dense<0.000000e+00> : vector<8x196xf32>
    %39 = tpu.matmul %36, %38, %cst_14 {dimension_numbers = #tpu.dot_dimension_numbers<[1], [0], [0], [1], [0, 0, 1, 1], [], []>} : vector<8x784xbf16>, vector<784x196xbf16>, vector<8x196xf32> -> vector<8x196xf32>
    %c1 = arith.constant 1 : index
    %c0_15 = arith.constant 0 : index
    %c0_16 = arith.constant 0 : index
    %40 = vector.load %arg13[%c1, %c0_15, %c0_16] : memref<4x784x196xbf16, #tpu.memory_space<vmem>>, vector<1x784x196xbf16>
    %41 = vector.shape_cast %40 : vector<1x784x196xbf16> to vector<784x196xbf16>
    %cst_17 = arith.constant dense<0.000000e+00> : vector<8x196xf32>
    %42 = tpu.matmul %36, %41, %cst_17 {dimension_numbers = #tpu.dot_dimension_numbers<[1], [0], [0], [1], [0, 0, 1, 1], [], []>} : vector<8x784xbf16>, vector<784x196xbf16>, vector<8x196xf32> -> vector<8x196xf32>
    %43 = arith.maximumf %39, %42 : vector<8x196xf32>
    %c2 = arith.constant 2 : index
    %c0_18 = arith.constant 0 : index
    %c0_19 = arith.constant 0 : index
    %44 = vector.load %arg13[%c2, %c0_18, %c0_19] : memref<4x784x196xbf16, #tpu.memory_space<vmem>>, vector<1x784x196xbf16>
    %45 = vector.shape_cast %44 : vector<1x784x196xbf16> to vector<784x196xbf16>
    %cst_20 = arith.constant dense<0.000000e+00> : vector<8x196xf32>
    %46 = tpu.matmul %36, %45, %cst_20 {dimension_numbers = #tpu.dot_dimension_numbers<[1], [0], [0], [1], [0, 0, 1, 1], [], []>} : vector<8x784xbf16>, vector<784x196xbf16>, vector<8x196xf32> -> vector<8x196xf32>
    %47 = arith.maximumf %43, %46 : vector<8x196xf32>
    %c3 = arith.constant 3 : index
    %c0_21 = arith.constant 0 : index
    %c0_22 = arith.constant 0 : index
    %48 = vector.load %arg13[%c3, %c0_21, %c0_22] : memref<4x784x196xbf16, #tpu.memory_space<vmem>>, vector<1x784x196xbf16>
    %49 = vector.shape_cast %48 : vector<1x784x196xbf16> to vector<784x196xbf16>
    %cst_23 = arith.constant dense<0.000000e+00> : vector<8x196xf32>
    %50 = tpu.matmul %36, %49, %cst_23 {dimension_numbers = #tpu.dot_dimension_numbers<[1], [0], [0], [1], [0, 0, 1, 1], [], []>} : vector<8x784xbf16>, vector<784x196xbf16>, vector<8x196xf32> -> vector<8x196xf32>
    %51 = arith.maximumf %47, %50 : vector<8x196xf32>
    %cst_24 = arith.constant 0.000000e+00 : f32
    %52 = vector.broadcast %cst_24 : f32 to vector<8x15xf32>
    %53 = tpu.concatenate %52, %51, %52 in 1 : vector<8x15xf32>, vector<8x196xf32>, vector<8x15xf32> -> vector<8x226xf32>
    %c0_25 = arith.constant 0 : index
    %c0_26 = arith.constant 0 : index
    %54 = vector.load %arg7[%c0_25, %c0_26] : memref<2x196xf32, #tpu.memory_space<vmem>>, vector<2x196xf32>
    %55 = vector.extract_strided_slice %54 {offsets = [0, 0], sizes = [1, 196], strides = [1, 1]} : vector<2x196xf32> to vector<1x196xf32>
    %56 = vector.extract_strided_slice %54 {offsets = [1, 0], sizes = [1, 196], strides = [1, 1]} : vector<2x196xf32> to vector<1x196xf32>
    %57 = vector.extract_strided_slice %53 {offsets = [0, 0], sizes = [8, 196], strides = [1, 1]} : vector<8x226xf32> to vector<8x196xf32>
    %58 = vector.broadcast %55 : vector<1x196xf32> to vector<8x196xf32>
    %59 = arith.mulf %57, %58 : vector<8x196xf32>
    %60 = vector.extract_strided_slice %53 {offsets = [0, 1], sizes = [8, 196], strides = [1, 1]} : vector<8x226xf32> to vector<8x196xf32>
    %61 = vector.extract_strided_slice %53 {offsets = [0, 2], sizes = [8, 196], strides = [1, 1]} : vector<8x226xf32> to vector<8x196xf32>
    %62 = vector.broadcast %56 : vector<1x196xf32> to vector<8x196xf32>
    %63 = arith.mulf %61, %62 : vector<8x196xf32>
    %64 = vector.extract_strided_slice %53 {offsets = [0, 14], sizes = [8, 196], strides = [1, 1]} : vector<8x226xf32> to vector<8x196xf32>
    %65 = vector.broadcast %55 : vector<1x196xf32> to vector<8x196xf32>
    %66 = arith.mulf %64, %65 : vector<8x196xf32>
    %67 = vector.extract_strided_slice %53 {offsets = [0, 15], sizes = [8, 196], strides = [1, 1]} : vector<8x226xf32> to vector<8x196xf32>
    %68 = vector.extract_strided_slice %53 {offsets = [0, 16], sizes = [8, 196], strides = [1, 1]} : vector<8x226xf32> to vector<8x196xf32>
    %69 = vector.broadcast %56 : vector<1x196xf32> to vector<8x196xf32>
    %70 = arith.mulf %68, %69 : vector<8x196xf32>
    %71 = vector.extract_strided_slice %53 {offsets = [0, 28], sizes = [8, 196], strides = [1, 1]} : vector<8x226xf32> to vector<8x196xf32>
    %72 = vector.broadcast %55 : vector<1x196xf32> to vector<8x196xf32>
    %73 = arith.mulf %71, %72 : vector<8x196xf32>
    %74 = vector.extract_strided_slice %53 {offsets = [0, 29], sizes = [8, 196], strides = [1, 1]} : vector<8x226xf32> to vector<8x196xf32>
    %75 = vector.extract_strided_slice %53 {offsets = [0, 30], sizes = [8, 196], strides = [1, 1]} : vector<8x226xf32> to vector<8x196xf32>
    %76 = vector.broadcast %56 : vector<1x196xf32> to vector<8x196xf32>
    %77 = arith.mulf %75, %76 : vector<8x196xf32>
    %78 = tpu.concatenate %59, %60, %63, %66, %67, %70, %73, %74, %77 in 0 : vector<8x196xf32>, vector<8x196xf32>, vector<8x196xf32>, vector<8x196xf32>, vector<8x196xf32>, vector<8x196xf32>, vector<8x196xf32>, vector<8x196xf32>, vector<8x196xf32> -> vector<72x196xf32>
    %79 = arith.truncf %78 : vector<72x196xf32> to vector<72x196xbf16>
    %c0_27 = arith.constant 0 : index
    %c0_28 = arith.constant 0 : index
    %80 = vector.load %arg5[%c0_27, %c0_28] : memref<32x72xbf16, #tpu.memory_space<vmem>>, vector<32x72xbf16>
    %cst_29 = arith.constant dense<0.000000e+00> : vector<32x196xf32>
    %81 = tpu.matmul %80, %79, %cst_29 {dimension_numbers = #tpu.dot_dimension_numbers<[1], [0], [0], [1], [0, 0, 1, 1], [], []>} : vector<32x72xbf16>, vector<72x196xbf16>, vector<32x196xf32> -> vector<32x196xf32>
    %c0_30 = arith.constant 0 : index
    %c0_31 = arith.constant 0 : index
    %82 = vector.load %arg6[%c0_30, %c0_31] : memref<32x1xf32, #tpu.memory_space<vmem>>, vector<32x1xf32>
    %83 = vector.broadcast %82 : vector<32x1xf32> to vector<32x196xf32>
    %84 = arith.addf %81, %83 : vector<32x196xf32>
    %cst_32 = arith.constant 0.000000e+00 : f32
    %85 = vector.broadcast %cst_32 : f32 to vector<32x196xf32>
    %86 = arith.subf %85, %84 : vector<32x196xf32>
    %87 = math.exp %86 : vector<32x196xf32>
    %cst_33 = arith.constant 1.000000e+00 : f32
    %88 = vector.broadcast %cst_33 : f32 to vector<32x196xf32>
    %89 = arith.addf %88, %87 : vector<32x196xf32>
    %90 = tpu.reciprocal %89 {approx = true} : vector<32x196xf32> -> vector<32x196xf32>
    %91 = arith.mulf %84, %90 : vector<32x196xf32>
    %92 = arith.truncf %91 : vector<32x196xf32> to vector<32x196xbf16>
    %c0_34 = arith.constant 0 : index
    %c0_35 = arith.constant 0 : index
    %c0_36 = arith.constant 0 : index
    %93 = vector.load %arg14[%c0_34, %c0_35, %c0_36] : memref<4x196x49xbf16, #tpu.memory_space<vmem>>, vector<1x196x49xbf16>
    %94 = vector.shape_cast %93 : vector<1x196x49xbf16> to vector<196x49xbf16>
    %cst_37 = arith.constant dense<0.000000e+00> : vector<32x49xf32>
    %95 = tpu.matmul %92, %94, %cst_37 {dimension_numbers = #tpu.dot_dimension_numbers<[1], [0], [0], [1], [0, 0, 1, 1], [], []>} : vector<32x196xbf16>, vector<196x49xbf16>, vector<32x49xf32> -> vector<32x49xf32>
    %c1_38 = arith.constant 1 : index
    %c0_39 = arith.constant 0 : index
    %c0_40 = arith.constant 0 : index
    %96 = vector.load %arg14[%c1_38, %c0_39, %c0_40] : memref<4x196x49xbf16, #tpu.memory_space<vmem>>, vector<1x196x49xbf16>
    %97 = vector.shape_cast %96 : vector<1x196x49xbf16> to vector<196x49xbf16>
    %cst_41 = arith.constant dense<0.000000e+00> : vector<32x49xf32>
    %98 = tpu.matmul %92, %97, %cst_41 {dimension_numbers = #tpu.dot_dimension_numbers<[1], [0], [0], [1], [0, 0, 1, 1], [], []>} : vector<32x196xbf16>, vector<196x49xbf16>, vector<32x49xf32> -> vector<32x49xf32>
    %99 = arith.maximumf %95, %98 : vector<32x49xf32>
    %c2_42 = arith.constant 2 : index
    %c0_43 = arith.constant 0 : index
    %c0_44 = arith.constant 0 : index
    %100 = vector.load %arg14[%c2_42, %c0_43, %c0_44] : memref<4x196x49xbf16, #tpu.memory_space<vmem>>, vector<1x196x49xbf16>
    %101 = vector.shape_cast %100 : vector<1x196x49xbf16> to vector<196x49xbf16>
    %cst_45 = arith.constant dense<0.000000e+00> : vector<32x49xf32>
    %102 = tpu.matmul %92, %101, %cst_45 {dimension_numbers = #tpu.dot_dimension_numbers<[1], [0], [0], [1], [0, 0, 1, 1], [], []>} : vector<32x196xbf16>, vector<196x49xbf16>, vector<32x49xf32> -> vector<32x49xf32>
    %103 = arith.maximumf %99, %102 : vector<32x49xf32>
    %c3_46 = arith.constant 3 : index
    %c0_47 = arith.constant 0 : index
    %c0_48 = arith.constant 0 : index
    %104 = vector.load %arg14[%c3_46, %c0_47, %c0_48] : memref<4x196x49xbf16, #tpu.memory_space<vmem>>, vector<1x196x49xbf16>
    %105 = vector.shape_cast %104 : vector<1x196x49xbf16> to vector<196x49xbf16>
    %cst_49 = arith.constant dense<0.000000e+00> : vector<32x49xf32>
    %106 = tpu.matmul %92, %105, %cst_49 {dimension_numbers = #tpu.dot_dimension_numbers<[1], [0], [0], [1], [0, 0, 1, 1], [], []>} : vector<32x196xbf16>, vector<196x49xbf16>, vector<32x49xf32> -> vector<32x49xf32>
    %107 = arith.maximumf %103, %106 : vector<32x49xf32>
    %cst_50 = arith.constant 0.000000e+00 : f32
    %108 = vector.broadcast %cst_50 : f32 to vector<32x8xf32>
    %109 = tpu.concatenate %108, %107, %108 in 1 : vector<32x8xf32>, vector<32x49xf32>, vector<32x8xf32> -> vector<32x65xf32>
    %c0_51 = arith.constant 0 : index
    %c0_52 = arith.constant 0 : index
    %110 = vector.load %arg10[%c0_51, %c0_52] : memref<2x49xf32, #tpu.memory_space<vmem>>, vector<2x49xf32>
    %111 = vector.extract_strided_slice %110 {offsets = [0, 0], sizes = [1, 49], strides = [1, 1]} : vector<2x49xf32> to vector<1x49xf32>
    %112 = vector.extract_strided_slice %110 {offsets = [1, 0], sizes = [1, 49], strides = [1, 1]} : vector<2x49xf32> to vector<1x49xf32>
    %113 = vector.extract_strided_slice %109 {offsets = [0, 0], sizes = [32, 49], strides = [1, 1]} : vector<32x65xf32> to vector<32x49xf32>
    %114 = vector.broadcast %111 : vector<1x49xf32> to vector<32x49xf32>
    %115 = arith.mulf %113, %114 : vector<32x49xf32>
    %116 = vector.extract_strided_slice %109 {offsets = [0, 1], sizes = [32, 49], strides = [1, 1]} : vector<32x65xf32> to vector<32x49xf32>
    %117 = vector.extract_strided_slice %109 {offsets = [0, 2], sizes = [32, 49], strides = [1, 1]} : vector<32x65xf32> to vector<32x49xf32>
    %118 = vector.broadcast %112 : vector<1x49xf32> to vector<32x49xf32>
    %119 = arith.mulf %117, %118 : vector<32x49xf32>
    %120 = vector.extract_strided_slice %109 {offsets = [0, 7], sizes = [32, 49], strides = [1, 1]} : vector<32x65xf32> to vector<32x49xf32>
    %121 = vector.broadcast %111 : vector<1x49xf32> to vector<32x49xf32>
    %122 = arith.mulf %120, %121 : vector<32x49xf32>
    %123 = vector.extract_strided_slice %109 {offsets = [0, 8], sizes = [32, 49], strides = [1, 1]} : vector<32x65xf32> to vector<32x49xf32>
    %124 = vector.extract_strided_slice %109 {offsets = [0, 9], sizes = [32, 49], strides = [1, 1]} : vector<32x65xf32> to vector<32x49xf32>
    %125 = vector.broadcast %112 : vector<1x49xf32> to vector<32x49xf32>
    %126 = arith.mulf %124, %125 : vector<32x49xf32>
    %127 = vector.extract_strided_slice %109 {offsets = [0, 14], sizes = [32, 49], strides = [1, 1]} : vector<32x65xf32> to vector<32x49xf32>
    %128 = vector.broadcast %111 : vector<1x49xf32> to vector<32x49xf32>
    %129 = arith.mulf %127, %128 : vector<32x49xf32>
    %130 = vector.extract_strided_slice %109 {offsets = [0, 15], sizes = [32, 49], strides = [1, 1]} : vector<32x65xf32> to vector<32x49xf32>
    %131 = vector.extract_strided_slice %109 {offsets = [0, 16], sizes = [32, 49], strides = [1, 1]} : vector<32x65xf32> to vector<32x49xf32>
    %132 = vector.broadcast %112 : vector<1x49xf32> to vector<32x49xf32>
    %133 = arith.mulf %131, %132 : vector<32x49xf32>
    %134 = tpu.concatenate %115, %116, %119, %122, %123, %126, %129, %130, %133 in 0 : vector<32x49xf32>, vector<32x49xf32>, vector<32x49xf32>, vector<32x49xf32>, vector<32x49xf32>, vector<32x49xf32>, vector<32x49xf32>, vector<32x49xf32>, vector<32x49xf32> -> vector<288x49xf32>
    %135 = arith.truncf %134 : vector<288x49xf32> to vector<288x49xbf16>
    %c0_53 = arith.constant 0 : index
    %c0_54 = arith.constant 0 : index
    %136 = vector.load %arg8[%c0_53, %c0_54] : memref<64x288xbf16, #tpu.memory_space<vmem>>, vector<64x288xbf16>
    %cst_55 = arith.constant dense<0.000000e+00> : vector<64x49xf32>
    %137 = tpu.matmul %136, %135, %cst_55 {dimension_numbers = #tpu.dot_dimension_numbers<[1], [0], [0], [1], [0, 0, 1, 1], [], []>} : vector<64x288xbf16>, vector<288x49xbf16>, vector<64x49xf32> -> vector<64x49xf32>
    %c0_56 = arith.constant 0 : index
    %c0_57 = arith.constant 0 : index
    %138 = vector.load %arg9[%c0_56, %c0_57] : memref<64x1xf32, #tpu.memory_space<vmem>>, vector<64x1xf32>
    %139 = vector.broadcast %138 : vector<64x1xf32> to vector<64x49xf32>
    %140 = arith.addf %137, %139 : vector<64x49xf32>
    %cst_58 = arith.constant 0.000000e+00 : f32
    %141 = vector.broadcast %cst_58 : f32 to vector<64x49xf32>
    %142 = arith.subf %141, %140 : vector<64x49xf32>
    %143 = math.exp %142 : vector<64x49xf32>
    %cst_59 = arith.constant 1.000000e+00 : f32
    %144 = vector.broadcast %cst_59 : f32 to vector<64x49xf32>
    %145 = arith.addf %144, %143 : vector<64x49xf32>
    %146 = tpu.reciprocal %145 {approx = true} : vector<64x49xf32> -> vector<64x49xf32>
    %147 = arith.mulf %140, %146 : vector<64x49xf32>
    %cst_60 = arith.constant dense<0xFF800000> : vector<64xf32>
    %148 = vector.multi_reduction <maximumf>, %147, %cst_60 [1] : vector<64x49xf32> to vector<64xf32>
    %149 = vector.shape_cast %148 : vector<64xf32> to vector<64x1xf32>
    %c0_61 = arith.constant 0 : index
    %c0_62 = arith.constant 0 : index
    %150 = vector.load %arg11[%c0_61, %c0_62] : memref<10x64xbf16, #tpu.memory_space<vmem>>, vector<10x64xbf16>
    %151 = arith.truncf %149 : vector<64x1xf32> to vector<64x1xbf16>
    %cst_63 = arith.constant dense<0.000000e+00> : vector<10x1xf32>
    %152 = tpu.matmul %150, %151, %cst_63 {dimension_numbers = #tpu.dot_dimension_numbers<[1], [0], [0], [1], [0, 0, 1, 1], [], []>} : vector<10x64xbf16>, vector<64x1xbf16>, vector<10x1xf32> -> vector<10x1xf32>
    %c0_64 = arith.constant 0 : index
    %c0_65 = arith.constant 0 : index
    %153 = vector.load %arg12[%c0_64, %c0_65] : memref<10x1xf32, #tpu.memory_space<vmem>>, vector<10x1xf32>
    %154 = arith.addf %152, %153 : vector<10x1xf32>
    %c0_66 = arith.constant 0 : index
    %c0_67 = arith.constant 0 : index
    %c0_68 = arith.constant 0 : index
    %155 = vector.load %arg15[%c0_66, %c0_67, %c0_68] : memref<1x10x1xf32, #tpu.memory_space<vmem>>, vector<1x10x1xf32>
    %156 = vector.shape_cast %155 : vector<1x10x1xf32> to vector<10x1xf32>
    %157 = vector.shape_cast %154 : vector<10x1xf32> to vector<1x10x1xf32>
    tpu.vector_store %arg15[%c0_66, %c0_67, %c0_68], %157 {strides = array<i32>} : memref<1x10x1xf32, #tpu.memory_space<vmem>>, vector<1x10x1xf32>,
    return
  }
  func.func @transform_0(%arg0: i32) -> (i32, i32, i32) {
    %c0_i32 = arith.constant 0 : i32
    %c0_i32_0 = arith.constant 0 : i32
    %c0_i32_1 = arith.constant 0 : i32
    return %arg0, %c0_i32, %c0_i32_0 : i32, i32, i32
  }
  func.func @transform_1(%arg0: i32) -> (i32, i32) {
    %c0_i32 = arith.constant 0 : i32
    %c0_i32_0 = arith.constant 0 : i32
    %c0_i32_1 = arith.constant 0 : i32
    return %c0_i32, %c0_i32_0 : i32, i32
  }
  func.func @transform_2(%arg0: i32) -> (i32, i32) {
    %c0_i32 = arith.constant 0 : i32
    %c0_i32_0 = arith.constant 0 : i32
    %c0_i32_1 = arith.constant 0 : i32
    return %c0_i32, %c0_i32_0 : i32, i32
  }
  func.func @transform_3(%arg0: i32) -> (i32, i32) {
    %c0_i32 = arith.constant 0 : i32
    %c0_i32_0 = arith.constant 0 : i32
    %c0_i32_1 = arith.constant 0 : i32
    return %c0_i32, %c0_i32_0 : i32, i32
  }
  func.func @transform_4(%arg0: i32) -> (i32, i32) {
    %c0_i32 = arith.constant 0 : i32
    %c0_i32_0 = arith.constant 0 : i32
    %c0_i32_1 = arith.constant 0 : i32
    return %c0_i32, %c0_i32_0 : i32, i32
  }
  func.func @transform_5(%arg0: i32) -> (i32, i32) {
    %c0_i32 = arith.constant 0 : i32
    %c0_i32_0 = arith.constant 0 : i32
    %c0_i32_1 = arith.constant 0 : i32
    return %c0_i32, %c0_i32_0 : i32, i32
  }
  func.func @transform_6(%arg0: i32) -> (i32, i32) {
    %c0_i32 = arith.constant 0 : i32
    %c0_i32_0 = arith.constant 0 : i32
    %c0_i32_1 = arith.constant 0 : i32
    return %c0_i32, %c0_i32_0 : i32, i32
  }
  func.func @transform_7(%arg0: i32) -> (i32, i32) {
    %c0_i32 = arith.constant 0 : i32
    %c0_i32_0 = arith.constant 0 : i32
    %c0_i32_1 = arith.constant 0 : i32
    return %c0_i32, %c0_i32_0 : i32, i32
  }
  func.func @transform_8(%arg0: i32) -> (i32, i32) {
    %c0_i32 = arith.constant 0 : i32
    %c0_i32_0 = arith.constant 0 : i32
    %c0_i32_1 = arith.constant 0 : i32
    return %c0_i32, %c0_i32_0 : i32, i32
  }
  func.func @transform_9(%arg0: i32) -> (i32, i32) {
    %c0_i32 = arith.constant 0 : i32
    %c0_i32_0 = arith.constant 0 : i32
    %c0_i32_1 = arith.constant 0 : i32
    return %c0_i32, %c0_i32_0 : i32, i32
  }
  func.func @transform_10(%arg0: i32) -> (i32, i32) {
    %c0_i32 = arith.constant 0 : i32
    %c0_i32_0 = arith.constant 0 : i32
    %c0_i32_1 = arith.constant 0 : i32
    return %c0_i32, %c0_i32_0 : i32, i32
  }
  func.func @transform_11(%arg0: i32) -> (i32, i32) {
    %c0_i32 = arith.constant 0 : i32
    %c0_i32_0 = arith.constant 0 : i32
    %c0_i32_1 = arith.constant 0 : i32
    return %c0_i32, %c0_i32_0 : i32, i32
  }
  func.func @transform_12(%arg0: i32) -> (i32, i32, i32) {
    %c0_i32 = arith.constant 0 : i32
    %c0_i32_0 = arith.constant 0 : i32
    %c0_i32_1 = arith.constant 0 : i32
    %c0_i32_2 = arith.constant 0 : i32
    return %c0_i32, %c0_i32_0, %c0_i32_1 : i32, i32, i32
  }
  func.func @transform_13(%arg0: i32) -> (i32, i32, i32) {
    %c0_i32 = arith.constant 0 : i32
    %c0_i32_0 = arith.constant 0 : i32
    %c0_i32_1 = arith.constant 0 : i32
    %c0_i32_2 = arith.constant 0 : i32
    return %c0_i32, %c0_i32_0, %c0_i32_1 : i32, i32, i32
  }
  func.func @transform_14(%arg0: i32) -> (i32, i32, i32) {
    %c0_i32 = arith.constant 0 : i32
    %c0_i32_0 = arith.constant 0 : i32
    %c0_i32_1 = arith.constant 0 : i32
    return %arg0, %c0_i32, %c0_i32_0 : i32, i32, i32
  }
}

</mosaic_0001>

<bundles_post_ra>
// kernel: cnn_forward.1
= control target key start
LH: loop header
LB: loop body
LE: loop exit
PB: predicated region body
PF: predicated region fallthrough
CT: control target
= control target key end

     0   :  { %s9003_s29 = smov 0   ;;  %s12607_s0 = inlined_call_operand.vmem [shape: f32[2,1,784], index: 0, kind: input, shape index: {}]   ;;  %s12608_s1 = inlined_call_operand.vmem [shape: bf16[8,9], index: 1, kind: input, shape index: {}]   ;;  %s12609_s2 = inlined_call_operand.vmem [shape: f32[8,1], index: 2, kind: input, shape index: {}]   ;;  %s12610_s3 = inlined_call_operand.vmem [shape: f32[2,784], index: 3, kind: input, shape index: {}]   ;;  %s12611_s4 = inlined_call_operand.vmem [shape: bf16[32,72], index: 4, kind: input, shape index: {}]   ;;  %s12612_s5 = inlined_call_operand.vmem [shape: f32[32,1], index: 5, kind: input, shape index: {}]   ;;  %s12613_s6 = inlined_call_operand.vmem [shape: f32[2,196], index: 6, kind: input, shape index: {}]   ;;  %s12614_s7 = inlined_call_operand.vmem [shape: bf16[64,288], index: 7, kind: input, shape index: {}]   ;;  %s12615_s8 = inlined_call_operand.vmem [shape: f32[64,1], index: 8, kind: input, shape index: {}]   ;;  %s12616_s9 = inlined_call_operand.vmem [shape: f32[2,49], index: 9, kind: input, shape index: {}]   ;;  %s12617_s10 = inlined_call_operand.vmem [shape: bf16[10,64], index: 10, kind: input, shape index: {}]   ;;  %s12618_s11 = inlined_call_operand.vmem [shape: f32[10,1], index: 11, kind: input, shape index: {}]   ;;  %s12619_s12 = inlined_call_operand.vmem [shape: bf16[4,784,196], index: 12, kind: input, shape index: {}]   ;;  %s12620_s13 = inlined_call_operand.vmem [shape: bf16[4,196,49], index: 13, kind: input, shape index: {}]   ;;  %s12621_s14 = inlined_call_operand.vmem [shape: f32[2,10,1], index: 14, kind: output, shape index: {}]  }
   0x1 LB: > { %s5834_s30 = sadd.s32 4294967295, %s8898_s29   ;;  %p5838_p0 = scmp.ge.s32.totalorder %s8898_s29, 1  ;;  %s8898_s29 = sphi %s9003_s29, %s24_s29  }
   0x2   : > { %p411_p1 = scmp.lt.s32.totalorder %s8898_s29, 3 }
   0x4   : > { %p412_p2 = pnand %p5838_p0, %p411_p1 }
   0x5   : > { %p456_p3 = scmp.lt.s32.totalorder (!%p412_p2), %s5834_s30, 1  ;;  %s12632_s17 = smov (!%p412_p2), 2  }
   0x6   : > { %415 = sbr.rel (%p412_p2) target bundleno = 2369 (0x941), region = 76  ;;  %s8901_s18 = smov (!%p412_p2), 28  }
   0x7   : > { %s8902_s23 = smov (!%p412_p2), 29   ;;  %s8903_s24 = smov (!%p412_p2), 30  }
   0x8   : > { %s8904_s25 = smov (!%p412_p2), 56   ;;  %s8905_s26 = smov (!%p412_p2), 58  }
   0x9   : > { %s12631_s15 = smov (!%p412_p2), 99   ;;  %s12625_s16 = smov (!%p412_p2), 127  }
   0xa   : > { %s12627_s20 = smov (!%p412_p2), 126   ;;  %s8910_s21 = smov (!%p412_p2), 70  }
   0xb   : > { %v506_v0 = vld [vmem:[%s12610_s3] sm:$0xff]  ;;  %s12655_s30 = smov (!%p456_p3, %s5834_s30), 1  ;;  %v507_v14 = vld [vmem:[%s12610_s3 + $0x8] sm:$0x3f]  ;;  %vm489_vm0 = vcmask 236544   ;;  %vm12622_vm1 = vcmask 15360  }
   0xc   : > { %v531_v1 = vperm.slane %v506_v0, 1  ;;  %v9014_v2 = vperm.slane %v506_v0, 0  ;;  %s8520_s19 = smul.u32 7, %s12655_s30  ;;  %v532_v3 = vperm.slane %v506_v0, 3  ;;  %v9025_v5 = vperm.slane %v506_v0, 2  ;;  %s8918_s27 = smov 16  }
   0xd   : > { %v533_v9 = vperm.slane %v506_v0, 5  ;;  %v9042_v11 = vperm.slane %v506_v0, 4  ;;  %v9044_v12 = vperm.slane %v506_v0, 6  ;;  %v534_v13 = vperm.slane %v506_v0, 7  ;;  %s12652_s28 = smov 114  }
   0xe   : > { %538 = vrot.lane.b32.xlu1 %v531_v1, %s12632_s17  ;;  %573 = vrot.lane.b32.xlu2 %v9014_v2, %s8901_s18  ;;  %s459_s22 = scalar_lea.vmem %s12607_s0, %s8520_s19  ;;  %v535_v16 = vperm.slane %v507_v14, 1  ;;  %v9065_v18 = vperm.slane %v507_v14, 0  ;;  %v9067_v19 = vperm.slane %v507_v14, 2  ;;  %v536_v20 = vperm.slane %v507_v14, 3  ;;  %s8908_s19 = smov 71  }
   0xf   : > { %v466_v4 = vld [vmem:[%s459_s22] sm:$0x7f]  ;;  %v9081_v21 = vperm.slane %v507_v14, 4  ;;  %v537_v22 = vperm.slane %v507_v14, 5  ;;  %vm12624_vm2 = vcmask 244736   ;;  %vm692_vm3 = vcmask 474112  }
  0x10   : > { %v468_v6 = vperm.slane %v466_v4, 0  ;;  %v469_v7 = vperm.slane %v466_v4, 1  ;;  %v471_v8 = vperm.slane %v466_v4, 3  ;;  %v470_v10 = vperm.slane %v466_v4, 2  ;;  %s12630_s22 = smov 98  }
  0x11   : > { %v473_v15 = vperm.slane %v466_v4, 5  ;;  %v472_v17 = vperm.slane %v466_v4, 4  ;;  %v474_v24 = vperm.slane %v466_v4, 6  ;;  %vm12623_vm4 = vcmask 228352  }
  0x12   : > { %475 = vrot.lane.b32.xlu0 %v468_v6, %s8902_s23  ;;  %vm657_vm5 = vcmask 457728   ;;  %vm504_vm6 = vcmask 367616   ;;  %vm736_vm7 = vcmask 1039360   ;;  %vm778_vm8 = vcmask 1031168  }
  0x13   : > { %vm1023_vm9 = vcmask 1040384   ;;  %vm1031_vm10 = vcmask 1041408   ;;  %vm820_vm11 = vcmask 818176   ;;  %vm1009_vm12 = vcmask 572416  }
  0x14   : > { %vm855_vm13 = vcmask 809984   ;;  %vm1039_vm14 = vcmask 1042432   ;;  %vm939_vm15 = vcmask 588800  }
  0x16   : > { %540 = vrot.lane.b32.xlu1 %v532_v3, %s12632_s17  ;;  %575 = vrot.lane.b32.xlu2 %v9025_v5, %s8901_s18 }
  0x1a   : > { %477 = vrot.lane.b32.xlu0 %v469_v7, %s8902_s23 }
  0x1e   : > { %610 = vrot.lane.b32.xlu1 %v532_v3, %s8903_s24  ;;  %643 = vrot.lane.b32.xlu2 %v9014_v2, %s8904_s25 }
  0x22   : > { %608 = vrot.lane.b32.xlu0 %v531_v1, %s8903_s24 }
  0x26   : > { %678 = vrot.lane.b32.xlu1 %v531_v1, %s8905_s26  ;;  %680 = vrot.lane.b32.xlu2 %v532_v3, %s8905_s26 }
  0x2a   : > { %645 = vrot.lane.b32.xlu0 %v9025_v5, %s8904_s25 }
  0x2e   : > { %481 = vrot.lane.b32.xlu1 %v471_v8, %s8902_s23  ;;  %542 = vrot.lane.b32.xlu2 %v533_v9, %s12632_s17 }
  0x32   : > { %479 = vrot.lane.b32.xlu0 %v470_v10, %s8902_s23 }
  0x36   : > { %577 = vrot.lane.b32.xlu1 %v9042_v11, %s8901_s18  ;;  %579 = vrot.lane.b32.xlu2 %v9044_v12, %s8901_s18 }
  0x3a   : > { %544 = vrot.lane.b32.xlu0 %v534_v13, %s12632_s17 }
  0x3e   : > { %614 = vrot.lane.b32.xlu1 %v534_v13, %s8903_s24  ;;  %647 = vrot.lane.b32.xlu2 %v9042_v11, %s8904_s25 }
  0x42   : > { %612 = vrot.lane.b32.xlu0 %v533_v9, %s8903_s24 }
  0x46   : > { %682 = vrot.lane.b32.xlu1 %v533_v9, %s8905_s26  ;;  %684 = vrot.lane.b32.xlu2 %v534_v13, %s8905_s26 }
  0x4a   : > { %649 = vrot.lane.b32.xlu0 %v9044_v12, %s8904_s25 }
  0x4e   : > { %485 = vrot.lane.b32.xlu1 %v473_v15, %s8902_s23  ;;  %546 = vrot.lane.b32.xlu2 %v535_v16, %s12632_s17 }
  0x52   : > { %483 = vrot.lane.b32.xlu0 %v472_v17, %s8902_s23 }
  0x56   : > { %581 = vrot.lane.b32.xlu1 %v9065_v18, %s8901_s18  ;;  %583 = vrot.lane.b32.xlu2 %v9067_v19, %s8901_s18 }
  0x5a   : > { %548 = vrot.lane.b32.xlu0 %v536_v20, %s12632_s17 }
  0x5e   : > { %618 = vrot.lane.b32.xlu1 %v536_v20, %s8903_s24  ;;  %651 = vrot.lane.b32.xlu2 %v9065_v18, %s8904_s25 }
  0x62   : > { %616 = vrot.lane.b32.xlu0 %v535_v16, %s8903_s24 }
  0x66   : > { %686 = vrot.lane.b32.xlu1 %v535_v16, %s8905_s26  ;;  %688 = vrot.lane.b32.xlu2 %v536_v20, %s8905_s26 }
  0x68   : > { %v9083_v23 = vpop.permute.xlu2 %573 }
  0x6a   : > { %653 = vrot.lane.b32.xlu0 %v9067_v19, %s8904_s25 }
  0x6e   : > { %585 = vrot.lane.b32.xlu1 %v9081_v21, %s8901_s18  ;;  %550 = vrot.lane.b32.xlu2 %v537_v22, %s12632_s17  ;;  %s12636_s17 = smov 114  }
  0x70   : > { %v9092_v25 = vpop.permute.xlu2 %575 }
  0x71   : > { %v588_v17 = vsel %vm12623_vm4, %v9083_v23, %v9092_v25 }
  0x72   : > { %487 = vrot.lane.b32.xlu0 %v474_v24, %s8902_s23  ;;  %s12629_s23 = smov 100  }
  0x76   : > { %620 = vrot.lane.b32.xlu1 %v537_v22, %s8903_s24 }
  0x78   : > { %v9097_v27 = vpop.permute.xlu2 %643 }
  0x7a   : > { %655 = vrot.lane.b32.xlu0 %v9081_v21, %s8904_s25  ;;  %s8913_s25 = smov 72  }
  0x7e   : > { %690 = vrot.lane.b32.xlu1 %v537_v22, %s8905_s26  ;;  %s12640_s26 = smov 14  }
  0x80   : > { %v539_v26 = vpop.permute.xlu1 %538  ;;  %v9101_v30 = vpop.permute.xlu2 %680 }
  0x84   : > { %v476_v28 = vpop.permute.xlu0 %475 }
  0x85   : > { %v9104_v31 = vsel %vm489_vm0, 0.0, %v476_v28 }
  0x86   : > { %v834_v35 = vrot.slane %v9104_v31, 4  ;;  %v715_v37 = vrot.slane %v9104_v31, 7  ;;  %v566_v44 = vmul.f32 %v539_v26, %v9104_v31  ;;  %v953_v52 = vrot.slane %v9104_v31, 1 }
  0x88   : > { %v9099_v29 = vpop.permute.xlu1 %540  ;;  %v9118_v43 = vpop.permute.xlu2 %542  ;;  %v757_v54 = vrot.slane %v566_v44, 6 }
  0x89   : > { %v553_v39 = vsel %vm12622_vm1, %v539_v26, %v9099_v29 }
  0x8c   : > { %v478_v32 = vpop.permute.xlu0 %477 }
  0x8d   : > { %v9109_v34 = vsel %vm489_vm0, %v476_v28, %v478_v32 }
  0x8e   : > { %v835_v36 = vrot.slane %v9109_v34, 4  ;;  %v716_v38 = vrot.slane %v9109_v34, 7  ;;  %v567_v42 = vmul.f32 %v553_v39, %v9109_v34  ;;  %v954_v45 = vrot.slane %v9109_v34, 1 }
  0x8f   : > { %v602_v26 = vmul.f32 %v588_v17, %v9109_v34 }
  0x90   : > { %v9106_v33 = vpop.permute.xlu1 %610  ;;  %v8562_v40 = vpack.i.bf16 %v835_v36, %v834_v35  ;;  %v8557_v41 = vpack.i.bf16 %v716_v38, %v715_v37  ;;  %v758_v48 = vrot.slane %v567_v42, 6  ;;  %v8567_v55 = vpack.i.bf16 %v954_v45, %v953_v52  ;;  %v9135_v60 = vpop.permute.xlu2 %579 }
  0x91   : > { %v554_v35 = vsel %vm12622_vm1, %v9099_v29, %v9118_v43 }
  0x92   : > { %8563 = vrot.lane.b32.xlu1 %v8562_v40, %s12631_s15  ;;  %8558 = vrot.lane.b32.xlu0 %v8557_v41, %s12625_s16  ;;  %v8582_v59 = vpack.i.bf16 %v758_v48, %v757_v54  ;;  %v671_v48 = vmul.f32 %v9097_v27, %v9104_v31 }
  0x94   : > { %v609_v46 = vpop.permute.xlu0 %608 }
  0x95   : > { %v623_v49 = vsel %vm12624_vm2, %v609_v46, %v9106_v33  ;;  %v636_v56 = vmul.f32 %v609_v46, %v9104_v31 }
  0x96   : > { %v637_v57 = vmul.f32 %v623_v49, %v9109_v34 }
  0x97   : > { %v876_v61 = vrot.slane %v636_v56, 3 }
  0x98   : > { %v679_v47 = vpop.permute.xlu1 %678  ;;  %v877_v62 = vrot.slane %v637_v57, 3  ;;  %v9141_v6 = vpop.permute.xlu2 %647 }
  0x99   : > { %v693_v50 = vsel %vm692_vm3, %v679_v47, %v9101_v30  ;;  %v706_v51 = vmul.f32 %v679_v47, %v9104_v31 }
  0x9a   : > { %v707_v53 = vmul.f32 %v693_v50, %v9109_v34  ;;  %8568 = vrot.lane.b32.xlu0 %v8567_v55, %s8908_s19  ;;  %8583 = vrot.lane.b32.xlu1 %v8582_v59, %s12627_s20  ;;  %v8592_v1 = vpack.i.bf16 %v877_v62, %v876_v61  ;;  %v918_v55 = vrot.slane %v671_v48, 2 }
  0x9c   : > { %v8572_v58 = vpack.i.bf16 %v707_v53, %v706_v51  ;;  %v646_v63 = vpop.permute.xlu0 %645 }
  0x9d   : > { %v658_v39 = vsel %vm657_vm5, %v9097_v27, %v646_v63  ;;  %v659_v61 = vsel %vm657_vm5, %v646_v63, %v9141_v6 }
  0x9e   : > { %8573 = vrot.lane.b32.xlu2 %v8572_v58, %s8910_s21  ;;  %v672_v42 = vmul.f32 %v658_v39, %v9109_v34 }
  0xa0   : > { %v9138_v0 = vpop.permute.xlu1 %481  ;;  %v9180_v41 = vpop.permute.xlu2 %684  ;;  %v919_v49 = vrot.slane %v672_v42, 2 }
  0xa2   : > { %8593 = vrot.lane.b32.xlu0 %v8592_v1, %s12630_s22  ;;  %v8597_v58 = vpack.i.bf16 %v919_v49, %v918_v55 }
  0xa4   : > { %v480_v3 = vpop.permute.xlu0 %479 }
  0xa5   : > { %v9144_v7 = vsel %vm489_vm0, %v478_v32, %v480_v3  ;;  %v9148_v8 = vsel %vm489_vm0, %v480_v3, %v9138_v0  ;;  %v601_v32 = vmul.f32 %v9083_v23, %v9104_v31 }
  0xa6   : > { %v717_v15 = vrot.slane %v9144_v7, 7  ;;  %v718_v16 = vrot.slane %v9148_v8, 7  ;;  %v568_v38 = vmul.f32 %v554_v35, %v9144_v7 }
  0xa7   : > { %v799_v29 = vrot.slane %v601_v32, 5  ;;  %v956_v32 = vrot.slane %v9148_v8, 1 }
  0xa8   : > { %v578_v4 = vpop.permute.xlu1 %577  ;;  %v8577_v24 = vpack.i.bf16 %v718_v16, %v717_v15  ;;  %v759_v46 = vrot.slane %v568_v38, 6  ;;  %v547_v27 = vpop.permute.xlu2 %546 }
  0xa9   : > { %v589_v9 = vsel %vm12623_vm4, %v9092_v25, %v578_v4  ;;  %v590_v10 = vsel %vm12623_vm4, %v578_v4, %v9135_v60  ;;  %v800_v25 = vrot.slane %v602_v26, 5  ;;  %v836_v4 = vrot.slane %v9144_v7, 4 }
  0xaa   : > { %v603_v13 = vmul.f32 %v589_v9, %v9144_v7  ;;  %v604_v14 = vmul.f32 %v590_v10, %v9148_v8  ;;  %8578 = vrot.lane.b32.xlu2 %v8577_v24, %s12625_s16  ;;  %v837_v9 = vrot.slane %v9148_v8, 4  ;;  %v673_v10 = vmul.f32 %v659_v61, %v9144_v7 }
  0xab   : > { %v8587_v45 = vpack.i.bf16 %v800_v25, %v799_v29 }
  0xac   : > { %v801_v20 = vrot.slane %v603_v13, 5  ;;  %v802_v22 = vrot.slane %v604_v14, 5  ;;  %v9168_v36 = vpop.permute.xlu0 %544  ;;  %v8612_v16 = vpack.i.bf16 %v837_v9, %v836_v4  ;;  %v920_v17 = vrot.slane %v673_v10, 2 }
  0xad   : > { %v555_v23 = vsel %vm12622_vm1, %v9118_v43, %v9168_v36 }
  0xae   : > { %v8607_v28 = vpack.i.bf16 %v802_v22, %v801_v20  ;;  %v569_v40 = vmul.f32 %v555_v23, %v9148_v8 }
  0xb0   : > { %v9170_v37 = vpop.permute.xlu1 %614  ;;  %8608 = vrot.lane.b32.xlu1 %v8607_v28, %s12629_s23  ;;  %v760_v44 = vrot.slane %v569_v40, 6  ;;  %v9215_v24 = vpop.permute.xlu2 %583  ;;  %v955_v28 = vrot.slane %v9144_v7, 1 }
  0xb2   : > { %8588 = vrot.lane.b32.xlu2 %v8587_v45, %s12629_s23  ;;  %v8602_v47 = vpack.i.bf16 %v760_v44, %v759_v46  ;;  %v8627_v45 = vpack.i.bf16 %v956_v32, %v955_v28 }
  0xb4   : > { %8603 = vrot.lane.b32.xlu0 %v8602_v47, %s12627_s20  ;;  %v613_v43 = vpop.permute.xlu0 %612 }
  0xb5   : > { %v624_v51 = vsel %vm12624_vm2, %v9106_v33, %v613_v43  ;;  %v625_v52 = vsel %vm12624_vm2, %v613_v43, %v9170_v37 }
  0xb6   : > { %v638_v53 = vmul.f32 %v624_v51, %v9144_v7  ;;  %v639_v54 = vmul.f32 %v625_v52, %v9148_v8 }
  0xb8   : > { %v683_v50 = vpop.permute.xlu1 %682  ;;  %v878_v56 = vrot.slane %v638_v53, 3  ;;  %v879_v57 = vrot.slane %v639_v54, 3  ;;  %v652_v54 = vpop.permute.xlu2 %651 }
  0xb9   : > { %v694_v33 = vsel %vm692_vm3, %v9101_v30, %v683_v50  ;;  %v695_v62 = vsel %vm692_vm3, %v683_v50, %v9180_v41 }
  0xba   : > { %8598 = vrot.lane.b32.xlu2 %v8597_v58, %s8913_s25  ;;  %v8617_v59 = vpack.i.bf16 %v879_v57, %v878_v56  ;;  %v708_v30 = vmul.f32 %v694_v33, %v9144_v7  ;;  %v709_v13 = vmul.f32 %v695_v62, %v9148_v8 }
  0xbc   : > { %8618 = vrot.lane.b32.xlu0 %v8617_v59, %s12630_s22  ;;  %v9201_v1 = vpop.permute.xlu0 %649  ;;  %v8632_v20 = vpack.i.bf16 %v709_v13, %v708_v30 }
  0xbd   : > { %v660_v63 = vsel %vm657_vm5, %v9141_v6, %v9201_v1 }
  0xbe   : > { %v674_v14 = vmul.f32 %v660_v63, %v9148_v8 }
  0xc0   : > { %v9203_v3 = vpop.permute.xlu1 %485  ;;  %v921_v15 = vrot.slane %v674_v14, 2  ;;  %v689_v30 = vpop.permute.xlu2 %688 }
  0xc2   : > { %8613 = vrot.lane.b32.xlu2 %v8612_v16, %s12631_s15  ;;  %v8622_v22 = vpack.i.bf16 %v921_v15, %v920_v17  ;;  %v661_v15 = vsel %vm657_vm5, %v9201_v1, %v652_v54 }
  0xc4   : > { %8633 = vrot.lane.b32.xlu0 %v8632_v20, %s8910_s21  ;;  %8623 = vrot.lane.b32.xlu1 %v8622_v22, %s8913_s25  ;;  %v484_v6 = vpop.permute.xlu0 %483 }
  0xc5   : > { %v9223_v35 = vsel %vm489_vm0, %v9138_v0, %v484_v6  ;;  %v9227_v25 = vsel %vm489_vm0, %v484_v6, %v9203_v3 }
  0xc6   : > { %v719_v29 = vrot.slane %v9223_v35, 7  ;;  %v720_v42 = vrot.slane %v9227_v25, 7  ;;  %v838_v52 = vrot.slane %v9223_v35, 4  ;;  %v839_v53 = vrot.slane %v9227_v25, 4 }
  0xc7   : > { %v957_v4 = vrot.slane %v9223_v35, 1  ;;  %v958_v9 = vrot.slane %v9227_v25, 1  ;;  %v675_v20 = vmul.f32 %v661_v15, %v9223_v35 }
  0xc8   : > { %v582_v26 = vpop.permute.xlu1 %581  ;;  %v8637_v46 = vpack.i.bf16 %v720_v42, %v719_v29 }
  0xc9   : > { %v591_v38 = vsel %vm12623_vm4, %v9135_v60, %v582_v26  ;;  %v592_v39 = vsel %vm12623_vm4, %v582_v26, %v9215_v24  ;;  %v556_v60 = vsel %vm12622_vm1, %v9168_v36, %v547_v27  ;;  %v8652_v36 = vpack.i.bf16 %v839_v53, %v838_v52 }
  0xca   : > { %v605_v23 = vmul.f32 %v591_v38, %v9223_v35  ;;  %v606_v40 = vmul.f32 %v592_v39, %v9227_v25  ;;  %8628 = vrot.lane.b32.xlu2 %v8627_v45, %s8908_s19  ;;  %v570_v43 = vmul.f32 %v556_v60, %v9223_v35  ;;  %v8667_v13 = vpack.i.bf16 %v958_v9, %v957_v4 }
  0xcc   : > { %v803_v0 = vrot.slane %v605_v23, 5  ;;  %v804_v44 = vrot.slane %v606_v40, 5  ;;  %8638 = vrot.lane.b32.xlu1 %v8637_v46, %s12625_s16  ;;  %v549_v48 = vpop.permute.xlu0 %548  ;;  %v761_v56 = vrot.slane %v570_v43, 6  ;;  %v551_v23 = vpop.permute.xlu2 %550 }
  0xcd   : > { %v557_v50 = vsel %vm12622_vm1, %v547_v27, %v549_v48  ;;  %v558_v42 = vsel %vm12622_vm1, %v549_v48, %v551_v23  ;;  %vm1063_vm1 = vcmask 1045504  }
  0xce   : > { %v8647_v47 = vpack.i.bf16 %v804_v44, %v803_v0  ;;  %v571_v51 = vmul.f32 %v557_v50, %v9227_v25 }
  0xd0   : > { %v619_v49 = vpop.permute.xlu1 %618  ;;  %8648 = vrot.lane.b32.xlu0 %v8647_v47, %s12629_s23  ;;  %v762_v55 = vrot.slane %v571_v51, 6 }
  0xd2   : > { %v8642_v57 = vpack.i.bf16 %v762_v55, %v761_v56 }
  0xd4   : > { %8653 = vrot.lane.b32.xlu1 %v8652_v36, %s12631_s15  ;;  %8643 = vrot.lane.b32.xlu2 %v8642_v57, %s12627_s20  ;;  %v617_v58 = vpop.permute.xlu0 %616 }
  0xd5   : > { %v626_v27 = vsel %vm12624_vm2, %v9170_v37, %v617_v58  ;;  %v627_v61 = vsel %vm12624_vm2, %v617_v58, %v619_v49 }
  0xd6   : > { %v640_v33 = vmul.f32 %v626_v27, %v9223_v35  ;;  %v641_v62 = vmul.f32 %v627_v61, %v9227_v25 }
  0xd8   : > { %v687_v59 = vpop.permute.xlu1 %686  ;;  %v880_v10 = vrot.slane %v640_v33, 3  ;;  %v881_v63 = vrot.slane %v641_v62, 3 }
  0xd9   : > { %v696_v37 = vsel %vm692_vm3, %v9180_v41, %v687_v59  ;;  %v697_v16 = vsel %vm692_vm3, %v687_v59, %v689_v30  ;;  %v922_v41 = vrot.slane %v675_v20, 2 }
  0xda   : > { %v8657_v14 = vpack.i.bf16 %v881_v63, %v880_v10  ;;  %v710_v26 = vmul.f32 %v696_v37, %v9223_v35  ;;  %v711_v28 = vmul.f32 %v697_v16, %v9227_v25  ;;  %v524_v37 = vmul.f32 %v9014_v2, %v9104_v31 }
  0xdc   : > { %8668 = vrot.lane.b32.xlu1 %v8667_v13, %s8908_s19  ;;  %8658 = vrot.lane.b32.xlu2 %v8657_v14, %s12630_s22  ;;  %v654_v17 = vpop.permute.xlu0 %653  ;;  %v8672_v38 = vpack.i.bf16 %v711_v28, %v710_v26 }
  0xdd   : > { %v662_v22 = vsel %vm657_vm5, %v652_v54, %v654_v17 }
  0xde   : > { %v676_v1 = vmul.f32 %v662_v22, %v9227_v25 }
  0xe0   : > { %v586_v6 = vpop.permute.xlu1 %585  ;;  %v923_v32 = vrot.slane %v676_v1, 2 }
  0xe1   : > { %v593_v0 = vsel %vm12623_vm4, %v9215_v24, %v586_v6  ;;  %vm1071_vm4 = vcmask 1046528  }
  0xe2   : > { %v8662_v39 = vpack.i.bf16 %v923_v32, %v922_v41 }
  0xe4   : > { %8673 = vrot.lane.b32.xlu2 %v8672_v38, %s8910_s21  ;;  %8663 = vrot.lane.b32.xlu0 %v8662_v39, %s8913_s25  ;;  %v488_v40 = vpop.permute.xlu0 %487 }
  0xe5   : > { %v495_v29 = vsel %vm489_vm0, %v9203_v3, %v488_v40  ;;  %vm974_vm0 = vcmask 580608  }
  0xe6   : > { %v9275_v44 = vsel %vm504_vm6, %v495_v29, 0.0  ;;  %vm1055_vm6 = vcmask 1044480  }
  0xe7   : > { %v572_v46 = vmul.f32 %v558_v42, %v9275_v44  ;;  %v607_v47 = vmul.f32 %v593_v0, %v9275_v44  ;;  %v721_v51 = vrot.slane %v9275_v44, 7  ;;  %v840_v55 = vrot.slane %v9275_v44, 4 }
  0xe8   : > { %v621_v45 = vpop.permute.xlu1 %620  ;;  %v959_v57 = vrot.slane %v9275_v44, 1 }
  0xe9   : > { %v763_v60 = vrot.slane %v572_v46, 6  ;;  %v805_v43 = vrot.slane %v607_v47, 5  ;;  %v628_v50 = vsel %vm12624_vm2, %v619_v49, %v621_v45  ;;  %v8914_v47 = vmov 65535  }
  0xea   : > { %v642_v24 = vmul.f32 %v628_v50, %v9275_v44  ;;  %vm1093_vm2 = vcmask 72704  }
  0xeb   : > { %776 = vrot.lane.b32.xlu1 %v763_v60, %s12627_s20  ;;  %s12648_s20 = smov 126  }
  0xec   : > { %734 = vrot.lane.b32.xlu0 %v721_v51, %s12625_s16  ;;  %818 = vrot.lane.b32.xlu2 %v805_v43, %s12629_s23  ;;  %v656_v3 = vpop.permute.xlu0 %655  ;;  %v882_v53 = vrot.slane %v642_v24, 3  ;;  %s12646_s16 = smov 98   ;;  %s12634_s23 = smov 112  }
  0xed   : > { %v663_v48 = vsel %vm657_vm5, %v654_v17, %v656_v3  ;;  %vm1047_vm5 = vcmask 1043456  }
  0xee   : > { %v677_v52 = vmul.f32 %v663_v48, %v9275_v44  ;;  %v1097_v60 = vsel %vm1047_vm5, 4294967295, %v8914_v47 }
  0xef   : > { %v9363_v48 = vsel %vm1055_vm6, %v1097_v60, 0 }
  0xf0   : > { %v924_v54 = vrot.slane %v677_v52, 2  ;;  %v691_v49 = vpop.permute.xlu1 %690 }
  0xf1   : > { %v698_v56 = vsel %vm692_vm3, %v689_v30, %v691_v49  ;;  %vm897_vm3 = vcmask 801792  }
  0xf2   : > { %v712_v36 = vmul.f32 %v698_v56, %v9275_v44 }
  0xf3   : > { %895 = vrot.lane.b32.xlu1 %v882_v53, %s12630_s22  ;;  %s12638_s22 = smov 113  }
  0xf4   : > { %853 = vrot.lane.b32.xlu0 %v840_v55, %s12631_s15  ;;  %937 = vrot.lane.b32.xlu2 %v924_v54, %s8913_s25  ;;  %v9369_v54 = vld [vmem:[%s12608_s1] sm:$0xf]  ;;  %s12641_s25 = smov 2   ;;  %s12647_s15 = smov 100  }
  0xf8   : > { %v9295_v58 = vpop.permute.xlu2 %8573 }
  0xf9   : > { %v8576_v31 = vunpack.i.h.bf16 %v9295_v58  ;;  %v8575_v29 = vunpack.i.l.bf16 %v9295_v58 }
  0xfb   : > { %1007 = vrot.lane.b32.xlu1 %v712_v36, %s8910_s21  ;;  %v1010_v3 = vsel %vm1009_vm12, %v8575_v29, %v8576_v31  ;;  %s12649_s21 = smov 127  }
  0xfc   : > { %972 = vrot.lane.b32.xlu0 %v959_v57, %s8908_s19  ;;  %s8927_s19 = smov 120  }
 0x104   : > { %v9298_v59 = vpop.permute.xlu1 %8563  ;;  %v9300_v27 = vpop.permute.xlu2 %8578 }
 0x105   : > { %v9302_v61 = vpop.permute.xlu0 %8558  ;;  %v8566_v6 = vunpack.i.h.bf16 %v9298_v59  ;;  %v8565_v2 = vunpack.i.l.bf16 %v9298_v59  ;;  %v8580_v49 = vunpack.i.l.bf16 %v9300_v27  ;;  %v8581_v36 = vunpack.i.h.bf16 %v9300_v27 }
 0x106   : > { %v8561_v33 = vunpack.i.h.bf16 %v9302_v61  ;;  %v8560_v62 = vunpack.i.l.bf16 %v9302_v61  ;;  %v526_v61 = vmul.f32 %v9042_v11, %v9144_v7 }
 0x107   : > { %v856_v42 = vsel %vm855_vm13, %v8565_v2, %v8566_v6 }
 0x108   : > { %v737_v13 = vsel %vm736_vm7, %v8560_v62, %v8561_v33 }
 0x109   : > { %v1024_v17 = vsel %vm1023_vm9, %v524_v37, %v737_v13  ;;  %v525_v37 = vmul.f32 %v9025_v5, %v9109_v34 }
 0x10c   : > { %v9306_v4 = vpop.permute.xlu1 %8583  ;;  %v9308_v9 = vpop.permute.xlu2 %8588 }
 0x10d   : > { %v8586_v10 = vunpack.i.h.bf16 %v9306_v4  ;;  %v8585_v63 = vunpack.i.l.bf16 %v9306_v4  ;;  %v9312_v30 = vpop.permute.xlu0 %8568  ;;  %v8591_v14 = vunpack.i.h.bf16 %v9308_v9  ;;  %v8590_v15 = vunpack.i.l.bf16 %v9308_v9 }
 0x10e   : > { %v8571_v38 = vunpack.i.h.bf16 %v9312_v30  ;;  %v8570_v39 = vunpack.i.l.bf16 %v9312_v30 }
 0x10f   : > { %v779_v16 = vsel %vm778_vm8, %v8585_v63, %v8586_v10  ;;  %v821_v22 = vsel %vm820_vm11, %v8590_v15, %v8591_v14  ;;  %v738_v63 = vsel %vm736_vm7, %v8561_v33, %v8580_v49  ;;  %v739_v15 = vsel %vm736_vm7, %v8580_v49, %v8581_v36 }
 0x110   : > { %v1032_v20 = vsel %vm1031_vm10, %v1024_v17, %v779_v16  ;;  %v975_v50 = vsel %vm974_vm0, %v8570_v39, %v8571_v38  ;;  %v1026_v5 = vsel %vm1023_vm9, %v526_v61, %v739_v15 }
 0x111   : > { %v1040_v28 = vsel %vm1039_vm14, %v1032_v20, %v821_v22  ;;  %v1025_v20 = vsel %vm1023_vm9, %v525_v37, %v738_v63 }
 0x112   : > { %v1048_v46 = vsel %vm1047_vm5, %v1040_v28, %v856_v42 }
 0x114   : > { %v9332_v26 = vpop.permute.xlu2 %8598 }
 0x115   : > { %v8601_v1 = vunpack.i.h.bf16 %v9332_v26  ;;  %v8600_v32 = vunpack.i.l.bf16 %v9332_v26  ;;  %v9337_v41 = vpop.permute.xlu0 %8593 }
 0x116   : > { %v8596_v23 = vunpack.i.h.bf16 %v9337_v41  ;;  %v8595_v40 = vunpack.i.l.bf16 %v9337_v41  ;;  %v8915_v41 = vmov 0  }
 0x117   : > { %v940_v0 = vsel %vm939_vm15, %v8600_v32, %v8601_v1  ;;  %8677 = vset.pattern.permute.xlu2 %v8915_v41  ;;  %8718 = vset.pattern.permute.xlu0 %v8915_v41 }
 0x118   : > { %v898_v45 = vsel %vm897_vm3, %v8595_v40, %v8596_v23  ;;  %8719 = vset.pattern.permute.xlu1 %v8915_v41 }
 0x119   : > { %v1056_v43 = vsel %vm1055_vm6, %v1048_v46, %v898_v45 }
 0x11a   : > { %v1064_v51 = vsel %vm1063_vm1, %v1056_v43, %v940_v0 }
 0x11b   : > { %v1072_v24 = vsel %vm1071_vm4, %v1064_v51, %v975_v50 }
 0x11c   : > { %v1079_v52 = vpack.c.bf16 %v1010_v3, %v1072_v24  ;;  %v9376_v56 = vpop.permute.xlu2 %8613 }
 0x11d   : > { %v8616_v7 = vunpack.i.h.bf16 %v9376_v56  ;;  %v8615_v28 = vunpack.i.l.bf16 %v9376_v56 }
 0x11e   : > { %v1100_v53 = vand.u32 %v9363_v48, %v1079_v52 }
 0x11f   : > { %v857_v47 = vsel %vm855_vm13, %v8566_v6, %v8615_v28  ;;  %v858_v60 = vsel %vm855_vm13, %v8615_v28, %v8616_v7 }
 0x120   : > { %1127 = vmatpush.bf16.msra.mxu0 %v1100_v53 }
 0x122   : > { %v9384_v13 = vpop.permute.xlu1 %8608 }
 0x123   : > { %5841 = vmatmul.msk.bf16.vlgmr.msra.gmra.mxu0 %vm1093_vm2, %v9369_v54  ;;  %v8611_v22 = vunpack.i.h.bf16 %v9384_v13  ;;  %v8610_v2 = vunpack.i.l.bf16 %v9384_v13 }
 0x124   : > { %v9411_v32 = vpop.permute.xlu2 %8628 }
 0x125   : > { %v822_v39 = vsel %vm820_vm11, %v8591_v14, %v8610_v2  ;;  %v823_v40 = vsel %vm820_vm11, %v8610_v2, %v8611_v22  ;;  %v8631_v0 = vunpack.i.h.bf16 %v9411_v32  ;;  %v8630_v45 = vunpack.i.l.bf16 %v9411_v32 }
 0x126   : > { %v9373_v55 = vpop.permute.xlu0 %8603 }
 0x127   : > { %v8605_v57 = vunpack.i.l.bf16 %v9373_v55  ;;  %v8606_v62 = vunpack.i.h.bf16 %v9373_v55  ;;  %v976_v63 = vsel %vm974_vm0, %v8571_v38, %v8630_v45 }
 0x129   : > { %v780_v16 = vsel %vm778_vm8, %v8586_v10, %v8605_v57  ;;  %v781_v33 = vsel %vm778_vm8, %v8605_v57, %v8606_v62  ;;  %v977_v57 = vsel %vm974_vm0, %v8630_v45, %v8631_v0  ;;  %v528_v45 = vmul.f32 %v9065_v18, %v9223_v35 }
 0x12a   : > { %v1033_v34 = vsel %vm1031_vm10, %v1025_v20, %v780_v16  ;;  %v1034_v4 = vsel %vm1031_vm10, %v1026_v5, %v781_v33 }
 0x12b   : > { %v1041_v29 = vsel %vm1039_vm14, %v1033_v34, %v822_v39  ;;  %v1042_v42 = vsel %vm1039_vm14, %v1034_v4, %v823_v40 }
 0x12c   : > { %v1049_v59 = vsel %vm1047_vm5, %v1041_v29, %v857_v47 }
 0x12e   : > { %v9394_v17 = vpop.permute.xlu0 %8618  ;;  %v9474_v58 = vpop.permute.xlu2 %8643 }
 0x12f   : > { %v8621_v10 = vunpack.i.h.bf16 %v9394_v17  ;;  %v8620_v11 = vunpack.i.l.bf16 %v9394_v17  ;;  %v8646_v40 = vunpack.i.h.bf16 %v9474_v58  ;;  %v8645_v29 = vunpack.i.l.bf16 %v9474_v58 }
 0x131   : > { %v899_v46 = vsel %vm897_vm3, %v8596_v23, %v8620_v11  ;;  %v900_v9 = vsel %vm897_vm3, %v8620_v11, %v8621_v10  ;;  %v1050_v23 = vsel %vm1047_vm5, %v1042_v42, %v858_v60  ;;  %v527_v42 = vmul.f32 %v9044_v12, %v9148_v8 }
 0x132   : > { %v1058_v6 = vsel %vm1055_vm6, %v1050_v23, %v900_v9  ;;  %v1057_v49 = vsel %vm1055_vm6, %v1049_v59, %v899_v46  ;;  %v783_v12 = vsel %vm778_vm8, %v8645_v29, %v8646_v40 }
 0x136   : > { %v9427_v14 = vpop.permute.xlu1 %8623  ;;  %v9437_v51 = vpop.permute.xlu0 %8633 }
 0x137   : > { %v8626_v43 = vunpack.i.h.bf16 %v9427_v14  ;;  %v8625_v50 = vunpack.i.l.bf16 %v9427_v14  ;;  %v8636_v3 = vunpack.i.h.bf16 %v9437_v51  ;;  %v8635_v24 = vunpack.i.l.bf16 %v9437_v51  ;;  %v9484_v11 = vpop.permute.xlu2 %8658  ;;  %v5906_v14 = vld [vmem:[%s12619_s12 + $0x70] sm:$0xf] }
 0x138   : > { %v8661_v13 = vunpack.i.h.bf16 %v9484_v11 }
 0x139   : > { %v941_v52 = vsel %vm939_vm15, %v8601_v1, %v8625_v50  ;;  %v942_v53 = vsel %vm939_vm15, %v8625_v50, %v8626_v43  ;;  %v1087_v1 = vld [vmem:[%s12609_s2] sm:$0xff]  ;;  %v1011_v37 = vsel %vm1009_vm12, %v8576_v31, %v8635_v24  ;;  %v1012_v30 = vsel %vm1009_vm12, %v8635_v24, %v8636_v3 }
 0x13a   : > { %v1065_v15 = vsel %vm1063_vm1, %v1057_v49, %v941_v52  ;;  %v1066_v26 = vsel %vm1063_vm1, %v1058_v6, %v942_v53  ;;  %1090 = vperm.xlu2 %8677, %v1087_v1   ;;  %v782_v50 = vsel %vm778_vm8, %v8606_v62, %v8645_v29 }
 0x13b   : > { %v1073_v16 = vsel %vm1071_vm4, %v1065_v15, %v976_v63  ;;  %v1074_v38 = vsel %vm1071_vm4, %v1066_v26, %v977_v57 }
 0x13c   : > { %v1080_v61 = vpack.c.bf16 %v1011_v37, %v1073_v16  ;;  %v1081_v33 = vpack.c.bf16 %v1012_v30, %v1074_v38 }
 0x13e   : > { %v1103_v20 = vand.u32 %v9363_v48, %v1080_v61  ;;  %v1106_v2 = vand.u32 %v9363_v48, %v1081_v33  ;;  %v9472_v5 = vpop.permute.xlu1 %8638 }
 0x13f   : > { %v8641_v31 = vunpack.i.h.bf16 %v9472_v5  ;;  %v8640_v34 = vunpack.i.l.bf16 %v9472_v5  ;;  %v9530_v59 = vpop.permute.xlu2 %8673 }
 0x140   : > { %1140 = vmatpush.bf16.msra.mxu1 %v1103_v20  ;;  %1153 = vmatpush.bf16.msrb.mxu0 %v1106_v2  ;;  %v8676_v63 = vunpack.i.h.bf16 %v9530_v59  ;;  %v8675_v15 = vunpack.i.l.bf16 %v9530_v59 }
 0x141   : > { %v740_v41 = vsel %vm736_vm7, %v8581_v36, %v8640_v34  ;;  %v741_v39 = vsel %vm736_vm7, %v8640_v34, %v8641_v31 }
 0x142   : > { %v9486_v28 = vpop.permute.xlu0 %8648  ;;  %v1027_v36 = vsel %vm1023_vm9, %v527_v42, %v740_v41  ;;  %v1028_v9 = vsel %vm1023_vm9, %v528_v45, %v741_v39  ;;  %v1014_v34 = vsel %vm1009_vm12, %v8675_v15, %v8676_v63 }
 0x143   : > { %5842 = vmatmul.msk.bf16.vlgmr.msra.gmra.mxu1 %vm1093_vm2, %v9369_v54  ;;  %5843 = vmatmul.msk.bf16.vlgmr.msrb.gmra.mxu0 %vm1093_vm2, %v9369_v54  ;;  %v8651_v46 = vunpack.i.h.bf16 %v9486_v28  ;;  %v8650_v27 = vunpack.i.l.bf16 %v9486_v28  ;;  %v1036_v18 = vsel %vm1031_vm10, %v1028_v9, %v783_v12  ;;  %v1035_v23 = vsel %vm1031_vm10, %v1027_v36, %v782_v50 }
 0x144   : > { %v530_v9 = vmul.f32 %v9081_v21, %v9275_v44 }
 0x145   : > { %v824_v8 = vsel %vm820_vm11, %v8611_v22, %v8650_v27  ;;  %v825_v35 = vsel %vm820_vm11, %v8650_v27, %v8651_v46  ;;  %v8660_v22 = vunpack.i.l.bf16 %v9484_v11  ;;  %v1013_v11 = vsel %vm1009_vm12, %v8636_v3, %v8675_v15 }
 0x146   : > { %v9482_v4 = vpop.permute.xlu1 %8653  ;;  %v1043_v6 = vsel %vm1039_vm14, %v1035_v23, %v824_v8  ;;  %v1044_v52 = vsel %vm1039_vm14, %v1036_v18, %v825_v35  ;;  %v529_v3 = vmul.f32 %v9067_v19, %v9227_v25 }
 0x147   : > { %v8656_v47 = vunpack.i.h.bf16 %v9482_v4  ;;  %v8655_v60 = vunpack.i.l.bf16 %v9482_v4  ;;  %v901_v37 = vsel %vm897_vm3, %v8621_v10, %v8660_v22  ;;  %v902_v16 = vsel %vm897_vm3, %v8660_v22, %v8661_v13  ;;  %v819_v12 = vpop.permute.xlu2 %818 }
 0x149   : > { %v859_v55 = vsel %vm855_vm13, %v8616_v7, %v8655_v60  ;;  %v860_v62 = vsel %vm855_vm13, %v8655_v60, %v8656_v47 }
 0x14a   : > { %v1051_v56 = vsel %vm1047_vm5, %v1043_v6, %v859_v55  ;;  %v1052_v7 = vsel %vm1047_vm5, %v1044_v52, %v860_v62 }
 0x14b   : > { %v1060_v61 = vsel %vm1055_vm6, %v1052_v7, %v902_v16  ;;  %v1059_v33 = vsel %vm1055_vm6, %v1051_v56, %v901_v37  ;;  %v8074_v37 = vld [vmem:[%s12619_s12 + $0x44] sm:$0xf0]  ;;  %v5970_v16 = vld [vmem:[%s12619_s12 + $0xf0] sm:$0xf] }
 0x14e   : > { %v9526_v24 = vpop.permute.xlu1 %8668 }
 0x14f   : > { %v8671_v53 = vunpack.i.h.bf16 %v9526_v24  ;;  %v8670_v49 = vunpack.i.l.bf16 %v9526_v24  ;;  %v938_v62 = vpop.permute.xlu2 %937 }
 0x151   : > { %v979_v20 = vsel %vm974_vm0, %v8670_v49, %v8671_v53  ;;  %v978_v17 = vsel %vm974_vm0, %v8631_v0, %v8670_v49 }
 0x156   : > { %v8664_v57 = vpop.permute.xlu0 %8663 }
 0x157   : > { %v8666_v26 = vunpack.i.h.bf16 %v8664_v57  ;;  %v8665_v1 = vunpack.i.l.bf16 %v8664_v57 }
 0x159   : > { %v943_v30 = vsel %vm939_vm15, %v8626_v43, %v8665_v1  ;;  %v944_v38 = vsel %vm939_vm15, %v8665_v1, %v8666_v26  ;;  %v8080_v43 = vld [vmem:[%s12619_s12 + $0x74] sm:$0xf0]  ;;  %v945_v24 = vsel %vm939_vm15, %v8666_v26, %v938_v62 }
 0x15a   : > { %v1068_v2 = vsel %vm1063_vm1, %v1060_v61, %v944_v38  ;;  %v1067_v10 = vsel %vm1063_vm1, %v1059_v33, %v943_v30  ;;  %v5907_v42 = vor.u32 %v8080_v43, %v5906_v14  ;;  %v8076_v26 = vld [vmem:[%s12619_s12 + $0x54] sm:$0xf0]  ;;  %v5874_v61 = vld [vmem:[%s12619_s12 + $0x30] sm:$0xf] }
 0x15b   : > { %v1075_v32 = vsel %vm1071_vm4, %v1067_v10, %v978_v17  ;;  %v1076_v0 = vsel %vm1071_vm4, %v1068_v2, %v979_v20  ;;  %v8096_v38 = vld [vmem:[%s12619_s12 + $0xf4] sm:$0xf0]  ;;  %v5962_v2 = vld [vmem:[%s12619_s12 + $0xe0] sm:$0xf]  ;;  %v8094_v17 = vld [vmem:[%s12619_s12 + $0xe4] sm:$0xf0] }
 0x15c   : > { %v1082_v41 = vpack.c.bf16 %v1013_v11, %v1075_v32  ;;  %v1083_v39 = vpack.c.bf16 %v1014_v34, %v1076_v0  ;;  %v8072_v33 = vld [vmem:[%s12619_s12 + $0x34] sm:$0xf0]  ;;  %v5971_v20 = vor.u32 %v8096_v38, %v5970_v16  ;;  %v6034_v10 = vld [vmem:[%s12619_s12 + $0x170] sm:$0xf]  ;;  %v5963_v34 = vor.u32 %v8094_v17, %v5962_v2  ;;  %v8102_v2 = vld [vmem:[%s12619_s12 + $0x124] sm:$0xf0] }
 0x15d   : > { %v777_v29 = vpop.permute.xlu1 %776  ;;  %v8112_v14 = vld [vmem:[%s12619_s12 + $0x174] sm:$0xf0]  ;;  %v5875_v43 = vor.u32 %v8072_v33, %v5874_v61  ;;  %v5922_v38 = vld [vmem:[%s12619_s12 + $0x90] sm:$0xf]  ;;  %v5994_v33 = vld [vmem:[%s12619_s12 + $0x120] sm:$0xf] }
 0x15e   : > { %v735_v45 = vpop.permute.xlu0 %734  ;;  %v1109_v27 = vand.u32 %v9363_v48, %v1082_v41  ;;  %v1112_v36 = vand.u32 %v9363_v48, %v1083_v39  ;;  %v784_v21 = vsel %vm778_vm8, %v8646_v40, %v777_v29  ;;  %v6035_v11 = vor.u32 %v8112_v14, %v6034_v10  ;;  %v5866_v39 = vld [vmem:[%s12619_s12 + $0x20] sm:$0xf]  ;;  %v8084_v61 = vld [vmem:[%s12619_s12 + $0x94] sm:$0xf0]  ;;  %v8142_v10 = vld [vmem:[%s12619_s12 + $0x264] sm:$0xf0] }
 0x15f   : > { %v742_v51 = vsel %vm736_vm7, %v8641_v31, %v735_v45  ;;  %v1030_v60 = vsel %vm1023_vm9, %v530_v9, %v735_v45  ;;  %v826_v31 = vsel %vm820_vm11, %v8651_v46, %v819_v12  ;;  %v6026_v9 = vld [vmem:[%s12619_s12 + $0x160] sm:$0xf]  ;;  %v5995_v14 = vor.u32 %v8102_v2, %v5994_v33 }
 0x160   : > { %1166 = vmatpush.bf16.msra.mxu3 %v1109_v27  ;;  %1179 = vmatpush.bf16.msra.mxu0 %v1112_v36  ;;  %v1029_v50 = vsel %vm1023_vm9, %v529_v3, %v742_v51  ;;  %v1038_v19 = vsel %vm1031_vm10, %v1030_v60, %v777_v29  ;;  %v8070_v29 = vld [vmem:[%s12619_s12 + $0x24] sm:$0xf0]  ;;  %v8092_v36 = vld [vmem:[%s12619_s12 + $0xd4] sm:$0xf0]  ;;  %v6154_v17 = vld [vmem:[%s12619_s12 + $0x260] sm:$0xf] }
 0x161   : > { %v1037_v25 = vsel %vm1031_vm10, %v1029_v50, %v784_v21  ;;  %v1046_v18 = vsel %vm1039_vm14, %v1038_v19, %v819_v12  ;;  %v5867_v27 = vor.u32 %v8070_v29, %v5866_v39  ;;  %v8110_v3 = vld [vmem:[%s12619_s12 + $0x164] sm:$0xf0]  ;;  %v5858_v12 = vld [vmem:[%s12619_s12 + $0x10] sm:$0xf]  ;;  %v8068_v21 = vld [vmem:[%s12619_s12 + $0x14] sm:$0xf0] }
 0x162   : > { %v1045_v58 = vsel %vm1039_vm14, %v1037_v25, %v826_v31  ;;  %v6027_v50 = vor.u32 %v8110_v3, %v6026_v9  ;;  %v5946_v19 = vld [vmem:[%s12619_s12 + $0xc0] sm:$0xf]  ;;  %v5859_v25 = vor.u32 %v8068_v21, %v5858_v12  ;;  %v8108_v31 = vld [vmem:[%s12619_s12 + $0x154] sm:$0xf0]  ;;  %v6066_v21 = vld [vmem:[%s12619_s12 + $0x1b0] sm:$0xf] }
 0x163   : > { %5844 = vmatmul.msk.bf16.vlgmr.msra.gmra.mxu3 %vm1093_vm2, %v9369_v54  ;;  %5845 = vmatmul.msk.bf16.vlgmr.msra.gmra.mxu0 %vm1093_vm2, %v9369_v54  ;;  %v5914_v29 = vld [vmem:[%s12619_s12 + $0x80] sm:$0xf]  ;;  %v8100_v9 = vld [vmem:[%s12619_s12 + $0x114] sm:$0xf0]  ;;  %vm12642_vm9 = vcmask 244736   ;;  %vm12644_vm14 = vcmask 15360  }
 0x164   : > { %1852 = vmatpush.bf16.msrb.mxu3 %v5907_v42  ;;  %1865 = vmatpush.bf16.msrb.mxu0 %v5971_v20  ;;  %v5954_v42 = vld [vmem:[%s12619_s12 + $0xd0] sm:$0xf]  ;;  %v5923_v20 = vor.u32 %v8084_v61, %v5922_v38  ;;  %v8140_v3 = vld [vmem:[%s12619_s12 + $0x254] sm:$0xf0] }
 0x165   : > { %v896_v44 = vpop.permute.xlu1 %895  ;;  %v5955_v51 = vor.u32 %v8092_v36, %v5954_v42  ;;  %v8082_v42 = vld [vmem:[%s12619_s12 + $0x84] sm:$0xf0]  ;;  %v8160_v12 = vld [vmem:[%s12619_s12 + $0x2f4] sm:$0xf0] }
 0x166   : > { %v854_v5 = vpop.permute.xlu0 %853  ;;  %v903_v23 = vsel %vm897_vm3, %v8661_v13, %v896_v44  ;;  %v5915_v36 = vor.u32 %v8082_v42, %v5914_v29  ;;  %v8152_v29 = vld [vmem:[%s12619_s12 + $0x2b4] sm:$0xf0] }
 0x167   : > { %v861_v8 = vsel %vm855_vm13, %v8656_v47, %v854_v5  ;;  %v1054_v40 = vsel %vm1047_vm5, %v1046_v18, %v854_v5  ;;  %v6018_v5 = vld [vmem:[%s12619_s12 + $0x150] sm:$0xf] }
 0x168   : > { %v1053_v35 = vsel %vm1047_vm5, %v1045_v58, %v861_v8  ;;  %v1062_v55 = vsel %vm1055_vm6, %v1054_v40, %v896_v44  ;;  %1866 = vmatpush.bf16.msrb.mxu0 %v5963_v34  ;;  %v8090_v44 = vld [vmem:[%s12619_s12 + $0xc4] sm:$0xf0]  ;;  %v6019_v58 = vor.u32 %v8108_v31, %v6018_v5  ;;  %v6098_v40 = vld [vmem:[%s12619_s12 + $0x1f0] sm:$0xf]  ;;  %v6074_v34 = vld [vmem:[%s12619_s12 + $0x1c0] sm:$0xf] }
 0x169   : > { %v1061_v28 = vsel %vm1055_vm6, %v1053_v35, %v903_v23  ;;  %v1070_v4 = vsel %vm1063_vm1, %v1062_v55, %v938_v62  ;;  %v5947_v8 = vor.u32 %v8090_v44, %v5946_v19  ;;  %v8128_v35 = vld [vmem:[%s12619_s12 + $0x1f4] sm:$0xf0]  ;;  %v5850_v55 = vld [vmem:[%s12619_s12] sm:$0xf]  ;;  %v5938_v62 = vld [vmem:[%s12619_s12 + $0xb0] sm:$0xf] }
 0x16a   : > { %v1069_v59 = vsel %vm1063_vm1, %v1061_v28, %v945_v24  ;;  %v6099_v23 = vor.u32 %v8128_v35, %v6098_v40  ;;  %v8066_v28 = vld [vmem:[%s12619_s12 + $0x4] sm:$0xf0]  ;;  %v8088_v24 = vld [vmem:[%s12619_s12 + $0xb4] sm:$0xf0]  ;;  %v5978_v31 = vld [vmem:[%s12619_s12 + $0x100] sm:$0xf] }
 0x16b   : > { %v8120_v44 = vld [vmem:[%s12619_s12 + $0x1b4] sm:$0xf0]  ;;  %v8138_v40 = vld [vmem:[%s12619_s12 + $0x244] sm:$0xf0]  ;;  %v6218_v35 = vld [vmem:[%s12619_s12 + $0x2e0] sm:$0xf] }
 0x16c   : > { %1867 = vmatpush.bf16.msrb.mxu0 %v5955_v51  ;;  %v6146_v51 = vld [vmem:[%s12619_s12 + $0x250] sm:$0xf]  ;;  %v6067_v5 = vor.u32 %v8120_v44, %v6066_v21  ;;  %v6036_v21 = vld [vmem:[%s12619_s12 + $0x178] sm:$0xf0]  ;;  %vm1848_vm1 = vcmask 130048   ;;  %vm4464_vm6 = vcmask 924672  }
 0x16d   : > { %v1008_v46 = vpop.permute.xlu1 %1007 }
 0x16e   : > { %v973_v22 = vpop.permute.xlu0 %972  ;;  %v1015_v52 = vsel %vm1009_vm12, %v8676_v63, %v1008_v46  ;;  %v8078_v63 = vld [vmem:[%s12619_s12 + $0x64] sm:$0xf0]  ;;  %vm12643_vm12 = vcmask 228352  }
 0x16f   : > { %v980_v47 = vsel %vm974_vm0, %v8671_v53, %v973_v22  ;;  %v1078_v6 = vsel %vm1071_vm4, %v1070_v4, %v973_v22  ;;  %v5898_v53 = vld [vmem:[%s12619_s12 + $0x60] sm:$0xf]  ;;  %v8106_v22 = vld [vmem:[%s12619_s12 + $0x144] sm:$0xf0]  ;;  %vm4399_vm0 = vcmask 113664  }
 0x170   : > { %v1077_v13 = vsel %vm1071_vm4, %v1069_v59, %v980_v47  ;;  %v1085_v56 = vpack.c.bf16 %v1008_v46, %v1078_v6  ;;  %v5899_v15 = vor.u32 %v8078_v63, %v5898_v53  ;;  %1868 = vmatpush.bf16.msrb.mxu0 %v5947_v8  ;;  %v5851_v46 = vor.u32 %v8066_v28, %v5850_v55  ;;  %v6010_v4 = vld [vmem:[%s12619_s12 + $0x140] sm:$0xf]  ;;  %v6002_v63 = vld [vmem:[%s12619_s12 + $0x130] sm:$0xf] }
 0x171   : > { %v1084_v7 = vpack.c.bf16 %v1015_v52, %v1077_v13  ;;  %v5939_v47 = vor.u32 %v8088_v24, %v5938_v62  ;;  %v6011_v59 = vor.u32 %v8106_v22, %v6010_v4  ;;  %v6090_v6 = vld [vmem:[%s12619_s12 + $0x1e0] sm:$0xf]  ;;  %v8126_v52 = vld [vmem:[%s12619_s12 + $0x1e4] sm:$0xf0]  ;;  %v6130_v24 = vld [vmem:[%s12619_s12 + $0x230] sm:$0xf] }
 0x172   : > { %v1118_v49 = vand.u32 %v9363_v48, %v1085_v56  ;;  %1853 = vmatpush.bf16.msrb.mxu3 %v5899_v15  ;;  %v6091_v56 = vor.u32 %v8126_v52, %v6090_v6  ;;  %v8104_v15 = vld [vmem:[%s12619_s12 + $0x134] sm:$0xf0]  ;;  %v6138_v8 = vld [vmem:[%s12619_s12 + $0x240] sm:$0xf]  ;;  %v6050_v6 = vld [vmem:[%s12619_s12 + $0x190] sm:$0xf] }
 0x173   : > { %v1115_v57 = vand.u32 %v9363_v48, %v1084_v7  ;;  %v5890_v48 = vld [vmem:[%s12619_s12 + $0x50] sm:$0xf]  ;;  %v6139_v55 = vor.u32 %v8138_v40, %v6138_v8  ;;  %v6058_v62 = vld [vmem:[%s12619_s12 + $0x1a0] sm:$0xf]  ;;  %v8136_v22 = vld [vmem:[%s12619_s12 + $0x234] sm:$0xf0] }
 0x174   : > { %1205 = vmatpush.bf16.msra.mxu2 %v1118_v49  ;;  %v5891_v1 = vor.u32 %v8076_v26, %v5890_v48  ;;  %1869 = vmatpush.bf16.msrb.mxu0 %v5939_v47  ;;  %v5930_v49 = vld [vmem:[%s12619_s12 + $0xa0] sm:$0xf]  ;;  %v6162_v48 = vld [vmem:[%s12619_s12 + $0x270] sm:$0xf]  ;;  %v6003_v26 = vor.u32 %v8104_v15, %v6002_v63  ;;  %v8116_v52 = vld [vmem:[%s12619_s12 + $0x194] sm:$0xf0] }
 0x175   : > { %1192 = vmatpush.bf16.msrb.mxu1 %v1115_v57  ;;  %v8086_v57 = vld [vmem:[%s12619_s12 + $0xa4] sm:$0xf0]  ;;  %v6210_v47 = vld [vmem:[%s12619_s12 + $0x2d0] sm:$0xf]  ;;  %v6051_v63 = vor.u32 %v8116_v52, %v6050_v6  ;;  %vm4364_vm4 = vcmask 678912  }
 0x176   : > { %1854 = vmatpush.bf16.msrb.mxu3 %v5891_v1  ;;  %v5931_v53 = vor.u32 %v8086_v57, %v5930_v49  ;;  %v8144_v1 = vld [vmem:[%s12619_s12 + $0x274] sm:$0xf0]  ;;  %v8146_v6 = vld [vmem:[%s12619_s12 + $0x284] sm:$0xf0] }
 0x177   : > { %5847 = vmatmul.msk.bf16.vlgmr.msra.gmra.mxu2 %vm1093_vm2, %v9369_v54  ;;  %v6163_v16 = vor.u32 %v8144_v1, %v6162_v48  ;;  %v8134_v1 = vld [vmem:[%s12619_s12 + $0x224] sm:$0xf0] }
 0x178   : > { %5846 = vmatmul.msk.bf16.vlgmr.msrb.gmra.mxu1 %vm1093_vm2, %v9369_v54  ;;  %v5882_v54 = vld [vmem:[%s12619_s12 + $0x40] sm:$0xf]  ;;  %1891 = vmatpush.bf16.msrb.mxu2 %v6099_v23  ;;  %v8158_v23 = vld [vmem:[%s12619_s12 + $0x2e4] sm:$0xf0]  ;;  %vm4359_vm2 = vcmask 121856  }
 0x179   : > { %v5883_v30 = vor.u32 %v8074_v37, %v5882_v54  ;;  %1878 = vmatpush.bf16.msra.mxu1 %v6035_v11  ;;  %v6082_v54 = vld [vmem:[%s12619_s12 + $0x1d0] sm:$0xf]  ;;  %v8124_v37 = vld [vmem:[%s12619_s12 + $0x1d4] sm:$0xf0]  ;;  %1870 = vmatpush.bf16.msrb.mxu0 %v5931_v53  ;;  %v8122_v11 = vld [vmem:[%s12619_s12 + $0x1c4] sm:$0xf0]  ;;  %v6219_v28 = vor.u32 %v8158_v23, %v6218_v35 }
 0x17a   : > { %v6178_v23 = vld [vmem:[%s12619_s12 + $0x290] sm:$0xf] }
 0x17b   : > { %1855 = vmatpush.bf16.msrb.mxu3 %v5883_v30  ;;  %v6083_v30 = vor.u32 %v8124_v37, %v6082_v54  ;;  %v6202_v37 = vld [vmem:[%s12619_s12 + $0x2c0] sm:$0xf] }
 0x17c   : > { %1892 = vmatpush.bf16.msrb.mxu2 %v6091_v56 }
 0x17d   : > { %1879 = vmatpush.bf16.msra.mxu1 %v6027_v50  ;;  %1871 = vmatpush.bf16.msrb.mxu0 %v5923_v20  ;;  %v6147_v50 = vor.u32 %v8140_v3, %v6146_v51  ;;  %v8114_v20 = vld [vmem:[%s12619_s12 + $0x184] sm:$0xf0]  ;;  %v6106_v51 = vld [vmem:[%s12619_s12 + $0x200] sm:$0xf] }
 0x17e   : > { %v8130_v3 = vld [vmem:[%s12619_s12 + $0x204] sm:$0xf0] }
 0x17f   : > { %1856 = vmatpush.bf16.msrb.mxu3 %v5875_v43  ;;  %v6155_v43 = vor.u32 %v8142_v10, %v6154_v17  ;;  %v8079_v17 = vld [vmem:[%s12619_s12 + $0x74] sm:$0xf]  ;;  %v5908_v10 = vld [vmem:[%s12619_s12 + $0x78] sm:$0xf0] }
 0x180   : > { %1893 = vmatpush.bf16.msrb.mxu2 %v6083_v30  ;;  %v6042_v30 = vld [vmem:[%s12619_s12 + $0x180] sm:$0xf] }
 0x181   : > { %1880 = vmatpush.bf16.msra.mxu1 %v6019_v58  ;;  %1872 = vmatpush.bf16.msrb.mxu0 %v5915_v36  ;;  %v6043_v2 = vor.u32 %v8114_v20, %v6042_v30  ;;  %v5900_v36 = vld [vmem:[%s12619_s12 + $0x68] sm:$0xf0] }
 0x183   : > { %1857 = vmatpush.bf16.msrb.mxu3 %v5867_v27 }
 0x185   : > { %1881 = vmatpush.bf16.msra.mxu1 %v6011_v59  ;;  %v8156_v59 = vld [vmem:[%s12619_s12 + $0x2d4] sm:$0xf0] }
 0x186   : > { %v6211_v49 = vor.u32 %v8156_v59, %v6210_v47  ;;  %v6170_v59 = vld [vmem:[%s12619_s12 + $0x280] sm:$0xf] }
 0x187   : > { %1858 = vmatpush.bf16.msrb.mxu3 %v5859_v25  ;;  %v6171_v52 = vor.u32 %v8146_v6, %v6170_v59  ;;  %v8119_v59 = vld [vmem:[%s12619_s12 + $0x1b4] sm:$0xf] }
 0x189   : > { %1882 = vmatpush.bf16.msra.mxu1 %v6003_v26  ;;  %v6122_v26 = vld [vmem:[%s12619_s12 + $0x220] sm:$0xf] }
 0x18a   : > { %v6123_v54 = vor.u32 %v8134_v1, %v6122_v26 }
 0x18b   : > { %1859 = vmatpush.bf16.msrb.mxu3 %v5851_v46  ;;  %v8118_v46 = vld [vmem:[%s12619_s12 + $0x1a4] sm:$0xf0] }
 0x18c   : > { %v6059_v4 = vor.u32 %v8118_v46, %v6058_v62  ;;  %v8109_v62 = vld [vmem:[%s12619_s12 + $0x164] sm:$0xf]  ;;  %v6028_v46 = vld [vmem:[%s12619_s12 + $0x168] sm:$0xf0] }
 0x18d   : > { %1883 = vmatpush.bf16.msra.mxu1 %v5995_v14  ;;  %v5911_v14 = vor.u32 %v8079_v17, %v5908_v10  ;;  %v6092_v17 = vld [vmem:[%s12619_s12 + $0x1e8] sm:$0xf0] }
 0x18f   : > { %1904 = vmatpush.bf16.msra.mxu3 %v6163_v16  ;;  %v8154_v16 = vld [vmem:[%s12619_s12 + $0x2c4] sm:$0xf0] }
 0x190   : > { %v6203_v33 = vor.u32 %v8154_v16, %v6202_v37 }
 0x193   : > { %1905 = vmatpush.bf16.msra.mxu3 %v6155_v43  ;;  %v6114_v43 = vld [vmem:[%s12619_s12 + $0x210] sm:$0xf] }
 0x194   : > { %v9656_v32 = vpop.permute.xlu2 %1090 }
 0x197   : > { %1906 = vmatpush.bf16.msra.mxu3 %v6147_v50  ;;  %v6107_v50 = vor.u32 %v8130_v3, %v6106_v51  ;;  %v6084_v51 = vld [vmem:[%s12619_s12 + $0x1d8] sm:$0xf0]  ;;  %v8067_v3 = vld [vmem:[%s12619_s12 + $0x14] sm:$0xf] }
 0x19b   : > { %1907 = vmatpush.bf16.msra.mxu3 %v6139_v55  ;;  %v8148_v55 = vld [vmem:[%s12619_s12 + $0x294] sm:$0xf0] }
 0x1a0   : > { %v1129_v0 = vpop.f32.mrf.mxu0 }
 0x1a1   : > { %v9659_v41 = vadd.f32 %v1129_v0, %v9656_v32  ;;  %v6075_v0 = vor.u32 %v8122_v11, %v6074_v34  ;;  %v8132_v34 = vld [vmem:[%s12619_s12 + $0x214] sm:$0xf0]  ;;  %v6194_v11 = vld [vmem:[%s12619_s12 + $0x2b0] sm:$0xf] }
 0x1a3   : > { %v1211_v45 = vsub.f32 0.0, %v9659_v41  ;;  %1894 = vmatpush.bf16.msrb.mxu2 %v6075_v0 }
 0x1a5   : > { %v1218_v60 = vmul.f32 1.442695, %v1211_v45  ;;  %v5986_v45 = vld [vmem:[%s12619_s12 + $0x110] sm:$0xf] }
 0x1a7   : > { %8800 = vpow2.f32 %v1218_v60  ;;  %v5987_v60 = vor.u32 %v8100_v9, %v5986_v45  ;;  %1895 = vmatpush.bf16.msrb.mxu2 %v6067_v5  ;;  %v6195_v45 = vor.u32 %v8152_v29, %v6194_v11  ;;  %v8095_v11 = vld [vmem:[%s12619_s12 + $0xf4] sm:$0xf] }
 0x1a8   : > { %v1131_v18 = vpop.f32.mrf.mxu0 }
 0x1a9   : > { %v8098_v18 = vld [vmem:[%s12619_s12 + $0x104] sm:$0xf0]  ;;  %1884 = vmatpush.bf16.msra.mxu1 %v5987_v60  ;;  %v6186_v60 = vld [vmem:[%s12619_s12 + $0x2a0] sm:$0xf] }
 0x1aa   : > { %v5979_v58 = vor.u32 %v8098_v18, %v5978_v31  ;;  %v8075_v31 = vld [vmem:[%s12619_s12 + $0x54] sm:$0xf]  ;;  %v5892_v18 = vld [vmem:[%s12619_s12 + $0x58] sm:$0xf0] }
 0x1ab   : > { %1896 = vmatpush.bf16.msrb.mxu2 %v6059_v4  ;;  %v5895_v40 = vor.u32 %v8075_v31, %v5892_v18  ;;  %v8073_v4 = vld [vmem:[%s12619_s12 + $0x44] sm:$0xf]  ;;  %v5996_v31 = vld [vmem:[%s12619_s12 + $0x128] sm:$0xf0] }
 0x1ac   : > { %v8121_v18 = vld [vmem:[%s12619_s12 + $0x1c4] sm:$0xf] }
 0x1ad   : > { %v8801_v13 = vpop.eup %8800  ;;  %1885 = vmatpush.bf16.msra.mxu1 %v5979_v58 }
 0x1ae   : > { %v1232_v7 = vadd.f32 1.0, %v8801_v13 }
 0x1af   : > { %1897 = vmatpush.bf16.msrb.mxu2 %v6051_v63  ;;  %v6100_v63 = vld [vmem:[%s12619_s12 + $0x1f8] sm:$0xf0] }
 0x1b0   : > { %8802 = vrcp.f32 %v1232_v7  ;;  %v6131_v7 = vor.u32 %v8136_v22, %v6130_v24  ;;  %v6031_v24 = vor.u32 %v8109_v62, %v6028_v46  ;;  %v5884_v22 = vld [vmem:[%s12619_s12 + $0x48] sm:$0xf0]  ;;  %v5956_v62 = vld [vmem:[%s12619_s12 + $0xd8] sm:$0xf0] }
 0x1b1   : > { %v5887_v47 = vor.u32 %v8073_v4, %v5884_v22  ;;  %v8099_v22 = vld [vmem:[%s12619_s12 + $0x114] sm:$0xf] }
 0x1b2   : > { %1908 = vmatpush.bf16.msra.mxu3 %v6131_v7  ;;  %v8127_v7 = vld [vmem:[%s12619_s12 + $0x1f4] sm:$0xf] }
 0x1b3   : > { %1898 = vmatpush.bf16.msrb.mxu2 %v6043_v2  ;;  %v6103_v30 = vor.u32 %v8127_v7, %v6100_v63  ;;  %v8125_v2 = vld [vmem:[%s12619_s12 + $0x1e4] sm:$0xf] }
 0x1b4   : > { %v6095_v29 = vor.u32 %v8125_v2, %v6092_v17  ;;  %v8115_v17 = vld [vmem:[%s12619_s12 + $0x194] sm:$0xf] }
 0x1b6   : > { %v8803_v39 = vpop.eup %8802  ;;  %1909 = vmatpush.bf16.msra.mxu3 %v6123_v54 }
 0x1b7   : > { %v1246_v27 = vmul.f32 %v8803_v39, %v9659_v41  ;;  %v6226_v41 = vld [vmem:[%s12619_s12 + $0x2f0] sm:$0xf]  ;;  %v6115_v39 = vor.u32 %v8132_v34, %v6114_v43  ;;  %1943 = vmatpush.bf16.msra.mxu2 %v5911_v14  ;;  %v8069_v43 = vld [vmem:[%s12619_s12 + $0x24] sm:$0xf]  ;;  %v5868_v34 = vld [vmem:[%s12619_s12 + $0x28] sm:$0xf0] }
 0x1b8   : > { %v6227_v25 = vor.u32 %v8160_v12, %v6226_v41  ;;  %v8150_v41 = vld [vmem:[%s12619_s12 + $0x2a4] sm:$0xf0]  ;;  %v8111_v12 = vld [vmem:[%s12619_s12 + $0x174] sm:$0xf] }
 0x1b9   : > { %v9804_v19 = vpack.c.bf16 %v1246_v27, %v1246_v27  ;;  %v8077_v27 = vld [vmem:[%s12619_s12 + $0x64] sm:$0xf]  ;;  %v6187_v44 = vor.u32 %v8150_v41, %v6186_v60  ;;  %v6039_v5 = vor.u32 %v8111_v12, %v6036_v21  ;;  %v5860_v60 = vld [vmem:[%s12619_s12 + $0x18] sm:$0xf0]  ;;  %v5964_v12 = vld [vmem:[%s12619_s12 + $0xe8] sm:$0xf0] }
 0x1ba   : > { %1917 = vmatpush.bf16.msra.mxu0 %v6227_v25  ;;  %v5903_v9 = vor.u32 %v8077_v27, %v5900_v36  ;;  %1910 = vmatpush.bf16.msra.mxu3 %v6115_v39  ;;  %v5972_v39 = vld [vmem:[%s12619_s12 + $0xf8] sm:$0xf0]  ;;  %v8123_v36 = vld [vmem:[%s12619_s12 + $0x1d4] sm:$0xf]  ;;  %v8093_v41 = vld [vmem:[%s12619_s12 + $0xe4] sm:$0xf] }
 0x1bb   : > { %1860 = vmatmul.bf16.vlgmr.msrb.gmra.mxu3 %v9804_v19  ;;  %v6004_v27 = vld [vmem:[%s12619_s12 + $0x138] sm:$0xf0]  ;;  %v5967_v21 = vor.u32 %v8093_v41, %v5964_v12  ;;  %v8081_v41 = vld [vmem:[%s12619_s12 + $0x84] sm:$0xf]  ;;  %v5916_v12 = vld [vmem:[%s12619_s12 + $0x88] sm:$0xf0] }
 0x1bc   : > { %1944 = vmatpush.bf16.msra.mxu2 %v5903_v9 }
 0x1be   : > { %1918 = vmatpush.bf16.msra.mxu0 %v6219_v28  ;;  %1911 = vmatpush.bf16.msra.mxu3 %v6107_v50  ;;  %v6179_v28 = vor.u32 %v8148_v55, %v6178_v23  ;;  %v5863_v50 = vor.u32 %v8067_v3, %v5860_v60  ;;  %v5852_v23 = vld [vmem:[%s12619_s12 + $0x8] sm:$0xf0] }
 0x1c0   : > { %v1142_v13 = vpop.f32.mrf.mxu1  ;;  %v1155_v56 = vpop.f32.mrf.mxu0  ;;  %1945 = vmatpush.bf16.msra.mxu2 %v5895_v40  ;;  %v6076_v40 = vld [vmem:[%s12619_s12 + $0x1c8] sm:$0xf0] }
 0x1c1   : > { %v9853_v57 = vadd.f32 %v1142_v13, %v9656_v32  ;;  %v9856_v53 = vadd.f32 %v1155_v56, %v9656_v32  ;;  %v8107_v13 = vld [vmem:[%s12619_s12 + $0x154] sm:$0xf]  ;;  %v6020_v56 = vld [vmem:[%s12619_s12 + $0x158] sm:$0xf0]  ;;  %v6079_v4 = vor.u32 %v8121_v18, %v6076_v40  ;;  %v5919_v18 = vor.u32 %v8081_v41, %v5916_v12 }
 0x1c2   : > { %1919 = vmatpush.bf16.msra.mxu0 %v6211_v49  ;;  %1969 = vmatpush.bf16.msrb.mxu3 %v6039_v5  ;;  %v6023_v49 = vor.u32 %v8107_v13, %v6020_v56  ;;  %v8101_v5 = vld [vmem:[%s12619_s12 + $0x124] sm:$0xf]  ;;  %v6068_v13 = vld [vmem:[%s12619_s12 + $0x1b8] sm:$0xf0] }
 0x1c3   : > { %v1212_v15 = vsub.f32 0.0, %v9853_v57  ;;  %v1213_v48 = vsub.f32 0.0, %v9856_v53  ;;  %v8089_v56 = vld [vmem:[%s12619_s12 + $0xc4] sm:$0xf] }
 0x1c4   : > { %1946 = vmatpush.bf16.msra.mxu2 %v5887_v47  ;;  %v5988_v47 = vld [vmem:[%s12619_s12 + $0x118] sm:$0xf0] }
 0x1c5   : > { %v1220_v38 = vmul.f32 1.442695, %v1212_v15  ;;  %v1222_v61 = vmul.f32 1.442695, %v1213_v48  ;;  %v8071_v15 = vld [vmem:[%s12619_s12 + $0x34] sm:$0xf] }
 0x1c6   : > { %1920 = vmatpush.bf16.msra.mxu0 %v6203_v33  ;;  %1970 = vmatpush.bf16.msrb.mxu3 %v6031_v24  ;;  %v5876_v48 = vld [vmem:[%s12619_s12 + $0x38] sm:$0xf0]  ;;  %v8105_v33 = vld [vmem:[%s12619_s12 + $0x144] sm:$0xf] }
 0x1c7   : > { %8804 = vpow2.f32 %v1220_v38  ;;  %v5879_v1 = vor.u32 %v8071_v15, %v5876_v48  ;;  %v6234_v38 = vld [vmem:[%s12619_s12 + $0x300] sm:$0xf] }
 0x1c8   : > { %8806 = vpow2.f32 %v1222_v61  ;;  %v1157_v0 = vpop.f32.mrf.mxu0  ;;  %v1144_v42 = vpop.f32.mrf.mxu1  ;;  %v8162_v61 = vld [vmem:[%s12619_s12 + $0x304] sm:$0xf0] }
 0x1c9   : > { %1947 = vmatpush.bf16.msra.mxu2 %v5879_v1  ;;  %v5871_v0 = vor.u32 %v8069_v43, %v5868_v34  ;;  %v5975_v42 = vor.u32 %v8095_v11, %v5972_v39  ;;  %v8097_v1 = vld [vmem:[%s12619_s12 + $0x104] sm:$0xf]  ;;  %v6052_v43 = vld [vmem:[%s12619_s12 + $0x198] sm:$0xf0]  ;;  %v5932_v11 = vld [vmem:[%s12619_s12 + $0xa8] sm:$0xf0] }
 0x1ca   : > { %1921 = vmatpush.bf16.msra.mxu0 %v6195_v45  ;;  %1971 = vmatpush.bf16.msrb.mxu3 %v6023_v49  ;;  %v8103_v45 = vld [vmem:[%s12619_s12 + $0x134] sm:$0xf]  ;;  %v5948_v49 = vld [vmem:[%s12619_s12 + $0xc8] sm:$0xf0]  ;;  %v8085_v34 = vld [vmem:[%s12619_s12 + $0xa4] sm:$0xf] }
 0x1cb   : > { %v6007_v9 = vor.u32 %v8103_v45, %v6004_v27  ;;  %v5951_v15 = vor.u32 %v8089_v56, %v5948_v49  ;;  %v8113_v45 = vld [vmem:[%s12619_s12 + $0x184] sm:$0xf]  ;;  %v6044_v27 = vld [vmem:[%s12619_s12 + $0x188] sm:$0xf0] }
 0x1cd   : > { %v8805_v25 = vpop.eup %8804  ;;  %1948 = vmatpush.bf16.msra.mxu2 %v5871_v0 }
 0x1ce   : > { %v8807_v8 = vpop.eup %8806  ;;  %v1233_v58 = vadd.f32 1.0, %v8805_v25  ;;  %1922 = vmatpush.bf16.msra.mxu0 %v6187_v44  ;;  %v6087_v44 = vor.u32 %v8123_v36, %v6084_v51  ;;  %v8083_v36 = vld [vmem:[%s12619_s12 + $0x94] sm:$0xf] }
 0x1cf   : > { %v1234_v35 = vadd.f32 1.0, %v8807_v8 }
 0x1d0   : > { %8808 = vrcp.f32 %v1233_v58  ;;  %v5999_v58 = vor.u32 %v8101_v5, %v5996_v31 }
 0x1d1   : > { %8810 = vrcp.f32 %v1234_v35  ;;  %v8065_v35 = vld [vmem:[%s12619_s12 + $0x4] sm:$0xf]  ;;  %1949 = vmatpush.bf16.msra.mxu2 %v5863_v50  ;;  %v6047_v50 = vor.u32 %v8113_v45, %v6044_v27 }
 0x1d2   : > { %1923 = vmatpush.bf16.msra.mxu0 %v6179_v28  ;;  %v5855_v55 = vor.u32 %v8065_v35, %v5852_v23  ;;  %v8091_v28 = vld [vmem:[%s12619_s12 + $0xd4] sm:$0xf] }
 0x1d3   : > { %v5959_v24 = vor.u32 %v8091_v28, %v5956_v62 }
 0x1d5   : > { %1950 = vmatpush.bf16.msra.mxu2 %v5855_v55 }
 0x1d6   : > { %v8809_v26 = vpop.eup %8808  ;;  %1924 = vmatpush.bf16.msra.mxu0 %v6171_v52  ;;  %v5991_v52 = vor.u32 %v8099_v22, %v5988_v47 }
 0x1d7   : > { %v8811_v54 = vpop.eup %8810  ;;  %v1247_v37 = vmul.f32 %v8809_v26, %v9853_v57  ;;  %v6235_v57 = vor.u32 %v8162_v61, %v6234_v38  ;;  %v6071_v26 = vor.u32 %v8119_v59, %v6068_v13  ;;  %v6060_v38 = vld [vmem:[%s12619_s12 + $0x1a8] sm:$0xf0]  ;;  %v8087_v61 = vld [vmem:[%s12619_s12 + $0xb4] sm:$0xf] }
 0x1d8   : > { %v1248_v16 = vmul.f32 %v8811_v54, %v9856_v53  ;;  %v6012_v53 = vld [vmem:[%s12619_s12 + $0x148] sm:$0xf0] }
 0x1d9   : > { %v9979_v20 = vpack.c.bf16 %v1247_v37, %v1247_v37  ;;  %v6015_v14 = vor.u32 %v8105_v33, %v6012_v53  ;;  %1937 = vmatpush.bf16.msrb.mxu1 %v6235_v57  ;;  %v5980_v54 = vld [vmem:[%s12619_s12 + $0x108] sm:$0xf0]  ;;  %v8117_v37 = vld [vmem:[%s12619_s12 + $0x1a4] sm:$0xf]  ;;  %v5940_v33 = vld [vmem:[%s12619_s12 + $0xb8] sm:$0xf0] }
 0x1da   : > { %v9990_v10 = vpack.c.bf16 %v1248_v16, %v1248_v16  ;;  %v5943_v53 = vor.u32 %v8087_v61, %v5940_v33  ;;  %v6063_v2 = vor.u32 %v8117_v37, %v6060_v38  ;;  %v6156_v13 = vld [vmem:[%s12619_s12 + $0x268] sm:$0xf0]  ;;  %v6518_v33 = vld [vmem:[%s12619_s12 + $0x470] sm:$0xf] }
 0x1db   : > { %1873 = vmatmul.bf16.vlgmr.msrb.gmra.mxu0 %v9979_v20  ;;  %1972 = vmatpush.bf16.msrb.mxu3 %v6015_v14 }
 0x1dc   : > { %1886 = vmatmul.bf16.vlgmr.msra.gmra.mxu1 %v9990_v10  ;;  %1982 = vmatpush.bf16.msrb.mxu0 %v6103_v30  ;;  %v5983_v30 = vor.u32 %v8097_v1, %v5980_v54  ;;  %v8210_v1 = vld [vmem:[%s12619_s12 + $0x484] sm:$0xf0] }
 0x1dd   : > { %1956 = vmatpush.bf16.msra.mxu1 %v5975_v42  ;;  %v6055_v42 = vor.u32 %v8115_v17, %v6052_v43  ;;  %v8178_v17 = vld [vmem:[%s12619_s12 + $0x384] sm:$0xf0]  ;;  %v8135_v43 = vld [vmem:[%s12619_s12 + $0x234] sm:$0xf] }
 0x1df   : > { %1973 = vmatpush.bf16.msrb.mxu3 %v6007_v9  ;;  %v5924_v9 = vld [vmem:[%s12619_s12 + $0x98] sm:$0xf0] }
 0x1e0   : > { %v1181_v25 = vpop.f32.mrf.mxu0  ;;  %1983 = vmatpush.bf16.msrb.mxu0 %v6095_v29  ;;  %v5935_v29 = vor.u32 %v8085_v34, %v5932_v11  ;;  %v5927_v51 = vor.u32 %v8083_v36, %v5924_v9  ;;  %v6132_v34 = vld [vmem:[%s12619_s12 + $0x238] sm:$0xf0]  ;;  %v6390_v36 = vld [vmem:[%s12619_s12 + $0x370] sm:$0xf]  ;;  %v8176_v9 = vld [vmem:[%s12619_s12 + $0x374] sm:$0xf0] }
 0x1e1   : > { %v10040_v8 = vadd.f32 %v1181_v25, %v9656_v32  ;;  %1957 = vmatpush.bf16.msra.mxu1 %v5967_v21  ;;  %v8161_v25 = vld [vmem:[%s12619_s12 + $0x304] sm:$0xf]  ;;  %v6135_v27 = vor.u32 %v8135_v43, %v6132_v34  ;;  %v6478_v43 = vld [vmem:[%s12619_s12 + $0x420] sm:$0xf]  ;;  %v8198_v34 = vld [vmem:[%s12619_s12 + $0x424] sm:$0xf0] }
 0x1e3   : > { %v1215_v46 = vsub.f32 0.0, %v10040_v8  ;;  %1974 = vmatpush.bf16.msrb.mxu3 %v5999_v58 }
 0x1e4   : > { %1984 = vmatpush.bf16.msrb.mxu0 %v6087_v44  ;;  %v6236_v44 = vld [vmem:[%s12619_s12 + $0x308] sm:$0xf0] }
 0x1e5   : > { %v1226_v6 = vmul.f32 1.442695, %v1215_v46  ;;  %1958 = vmatpush.bf16.msra.mxu1 %v5959_v24  ;;  %v6239_v35 = vor.u32 %v8161_v25, %v6236_v44  ;;  %v8143_v46 = vld [vmem:[%s12619_s12 + $0x274] sm:$0xf]  ;;  %v6391_v25 = vor.u32 %v8176_v9, %v6390_v36  ;;  %v6502_v44 = vld [vmem:[%s12619_s12 + $0x450] sm:$0xf]  ;;  %v6479_v36 = vor.u32 %v8198_v34, %v6478_v43 }
 0x1e6   : > { %v1168_v7 = vpop.f32.mrf.mxu3  ;;  %v6446_v9 = vld [vmem:[%s12619_s12 + $0x3e0] sm:$0xf] }
 0x1e7   : > { %8812 = vpow2.f32 %v1226_v6  ;;  %v10077_v63 = vadd.f32 %v1168_v7, %v9656_v32  ;;  %1975 = vmatpush.bf16.msrb.mxu3 %v5991_v52  ;;  %v8141_v52 = vld [vmem:[%s12619_s12 + $0x264] sm:$0xf] }
 0x1e8   : > { %1985 = vmatpush.bf16.msrb.mxu0 %v6079_v4  ;;  %v1183_v48 = vpop.f32.mrf.mxu0  ;;  %v6159_v49 = vor.u32 %v8141_v52, %v6156_v13  ;;  %v8172_v52 = vld [vmem:[%s12619_s12 + $0x354] sm:$0xf0]  ;;  %v8129_v13 = vld [vmem:[%s12619_s12 + $0x204] sm:$0xf] }
 0x1e9   : > { %v1214_v16 = vsub.f32 0.0, %v10077_v63  ;;  %1959 = vmatpush.bf16.msra.mxu1 %v5951_v15  ;;  %v8139_v15 = vld [vmem:[%s12619_s12 + $0x254] sm:$0xf]  ;;  %v6148_v48 = vld [vmem:[%s12619_s12 + $0x258] sm:$0xf0] }
 0x1ea   : > { %v6151_v54 = vor.u32 %v8139_v15, %v6148_v48  ;;  %v6462_v15 = vld [vmem:[%s12619_s12 + $0x400] sm:$0xf]  ;;  %v8194_v48 = vld [vmem:[%s12619_s12 + $0x404] sm:$0xf0] }
 0x1eb   : > { %v1224_v57 = vmul.f32 1.442695, %v1214_v16  ;;  %1976 = vmatpush.bf16.msrb.mxu3 %v5983_v30  ;;  %v8137_v16 = vld [vmem:[%s12619_s12 + $0x244] sm:$0xf]  ;;  %v6140_v30 = vld [vmem:[%s12619_s12 + $0x248] sm:$0xf0] }
 0x1ec   : > { %1986 = vmatpush.bf16.msrb.mxu0 %v6071_v26  ;;  %v6526_v26 = vld [vmem:[%s12619_s12 + $0x480] sm:$0xf] }
 0x1ed   : > { %v8813_v14 = vpop.eup %8812  ;;  %8814 = vpow2.f32 %v1224_v57  ;;  %1960 = vmatpush.bf16.msra.mxu1 %v5943_v53  ;;  %v6527_v61 = vor.u32 %v8210_v1, %v6526_v26  ;;  %v8208_v57 = vld [vmem:[%s12619_s12 + $0x474] sm:$0xf0]  ;;  %v6143_v53 = vor.u32 %v8137_v16, %v6140_v30  ;;  %v6486_v1 = vld [vmem:[%s12619_s12 + $0x430] sm:$0xf]  ;;  %v6366_v30 = vld [vmem:[%s12619_s12 + $0x340] sm:$0xf] }
 0x1ee   : > { %v1236_v0 = vadd.f32 1.0, %v8813_v14  ;;  %v1170_v39 = vpop.f32.mrf.mxu3 }
 0x1f0   : > { %8816 = vrcp.f32 %v1236_v0  ;;  %1987 = vmatpush.bf16.msrb.mxu0 %v6063_v2  ;;  %v6398_v2 = vld [vmem:[%s12619_s12 + $0x380] sm:$0xf]  ;;  %v6519_v0 = vor.u32 %v8208_v57, %v6518_v33  ;;  %v8153_v33 = vld [vmem:[%s12619_s12 + $0x2c4] sm:$0xf]  ;;  %v6204_v57 = vld [vmem:[%s12619_s12 + $0x2c8] sm:$0xf0] }
 0x1f1   : > { %1961 = vmatpush.bf16.msra.mxu1 %v5935_v29  ;;  %v6399_v39 = vor.u32 %v8178_v17, %v6398_v2  ;;  %v6510_v29 = vld [vmem:[%s12619_s12 + $0x460] sm:$0xf]  ;;  %v6454_v2 = vld [vmem:[%s12619_s12 + $0x3f0] sm:$0xf]  ;;  %v8192_v17 = vld [vmem:[%s12619_s12 + $0x3f4] sm:$0xf0] }
 0x1f3   : > { %v8815_v3 = vpop.eup %8814 }
 0x1f4   : > { %v1235_v60 = vadd.f32 1.0, %v8815_v3  ;;  %1988 = vmatpush.bf16.msrb.mxu0 %v6055_v42  ;;  %v8206_v42 = vld [vmem:[%s12619_s12 + $0x464] sm:$0xf0]  ;;  %v6124_v3 = vld [vmem:[%s12619_s12 + $0x228] sm:$0xf0] }
 0x1f5   : > { %v1194_v21 = vpop.f32.mrf.mxu1  ;;  %1962 = vmatpush.bf16.msra.mxu1 %v5927_v51  ;;  %v8133_v51 = vld [vmem:[%s12619_s12 + $0x224] sm:$0xf]  ;;  %v6511_v12 = vor.u32 %v8206_v42, %v6510_v29  ;;  %v6455_v29 = vor.u32 %v8192_v17, %v6454_v2  ;;  %v8151_v42 = vld [vmem:[%s12619_s12 + $0x2b4] sm:$0xf]  ;;  %v8226_v2 = vld [vmem:[%s12619_s12 + $0x504] sm:$0xf0] }
 0x1f6   : > { %v8817_v5 = vpop.eup %8816  ;;  %8818 = vrcp.f32 %v1235_v60  ;;  %v1195_v31 = vadd.f32 %v1194_v21, %v9656_v32  ;;  %v8159_v60 = vld [vmem:[%s12619_s12 + $0x2f4] sm:$0xf]  ;;  %v8189_v17 = vld [vmem:[%s12619_s12 + $0x3e4] sm:$0xf] }
 0x1f7   : > { %v1250_v58 = vmul.f32 %v8817_v5, %v10040_v8  ;;  %v6164_v8 = vld [vmem:[%s12619_s12 + $0x278] sm:$0xf0]  ;;  %v8204_v5 = vld [vmem:[%s12619_s12 + $0x454] sm:$0xf0] }
 0x1f8   : > { %v1216_v40 = vsub.f32 0.0, %v1195_v31  ;;  %1989 = vmatpush.bf16.msrb.mxu0 %v6047_v50  ;;  %v6228_v50 = vld [vmem:[%s12619_s12 + $0x2f8] sm:$0xf0] }
 0x1f9   : > { %v10136_v23 = vpack.c.bf16 %v1250_v58, %v1250_v58  ;;  %1963 = vmatpush.bf16.msra.mxu1 %v5919_v18  ;;  %v6231_v18 = vor.u32 %v8159_v60, %v6228_v50  ;;  %v6382_v58 = vld [vmem:[%s12619_s12 + $0x360] sm:$0xf]  ;;  %v6470_v60 = vld [vmem:[%s12619_s12 + $0x410] sm:$0xf]  ;;  %v8196_v50 = vld [vmem:[%s12619_s12 + $0x414] sm:$0xf0] }
 0x1fa   : > { %v1228_v55 = vmul.f32 1.442695, %v1216_v40  ;;  %v1207_v28 = vpop.f32.mrf.mxu2  ;;  %v8174_v40 = vld [vmem:[%s12619_s12 + $0x364] sm:$0xf0] }
 0x1fb   : > { %v10139_v62 = vadd.f32 %v1207_v28, %v9656_v32  ;;  %1912 = vmatmul.bf16.vlgmr.msra.gmra.mxu3 %v10136_v23  ;;  %v6167_v32 = vor.u32 %v8143_v46, %v6164_v8  ;;  %v6116_v28 = vld [vmem:[%s12619_s12 + $0x218] sm:$0xf0]  ;;  %v6220_v46 = vld [vmem:[%s12619_s12 + $0x2e8] sm:$0xf0]  ;;  %v6503_v8 = vor.u32 %v8204_v5, %v6502_v44  ;;  %v8260_v44 = vld [vmem:[%s12619_s12 + $0x614] sm:$0xf0] }
 0x1fc   : > { %v8819_v24 = vpop.eup %8818  ;;  %8820 = vpow2.f32 %v1228_v55  ;;  %2028 = vmatpush.bf16.msra.mxu3 %v6239_v35  ;;  %v8131_v35 = vld [vmem:[%s12619_s12 + $0x214] sm:$0xf] }
 0x1fd   : > { %v1249_v4 = vmul.f32 %v8819_v24, %v10077_v63  ;;  %v1217_v22 = vsub.f32 0.0, %v10139_v62  ;;  %v1196_v47 = vpop.f32.mrf.mxu1  ;;  %v6383_v24 = vor.u32 %v8174_v40, %v6382_v58  ;;  %v6471_v58 = vor.u32 %v8196_v50, %v6470_v60  ;;  %v6438_v40 = vld [vmem:[%s12619_s12 + $0x3d0] sm:$0xf]  ;;  %v6440_v60 = vld [vmem:[%s12619_s12 + $0x3d8] sm:$0xf0] }
 0x1fe   : > { %v6119_v47 = vor.u32 %v8131_v35, %v6116_v28  ;;  %v8188_v35 = vld [vmem:[%s12619_s12 + $0x3d4] sm:$0xf0] }
 0x1ff   : > { %v10150_v59 = vpack.c.bf16 %v1249_v4, %v1249_v4  ;;  %v1230_v6 = vmul.f32 1.442695, %v1217_v22  ;;  %v6494_v4 = vld [vmem:[%s12619_s12 + $0x440] sm:$0xf]  ;;  %v8202_v22 = vld [vmem:[%s12619_s12 + $0x444] sm:$0xf0] }
 0x201   : > { %8822 = vpow2.f32 %v1230_v6  ;;  %1899 = vmatmul.bf16.vlgmr.msrb.gmra.mxu2 %v10150_v59  ;;  %v6374_v6 = vld [vmem:[%s12619_s12 + $0x350] sm:$0xf] }
 0x202   : > { %v8821_v56 = vpop.eup %8820  ;;  %1995 = vmatpush.bf16.msrb.mxu2 %v6167_v32  ;;  %v1209_v7 = vpop.f32.mrf.mxu2  ;;  %v6375_v26 = vor.u32 %v8172_v52, %v6374_v6  ;;  %v6180_v6 = vld [vmem:[%s12619_s12 + $0x298] sm:$0xf0]  ;;  %v6654_v52 = vld [vmem:[%s12619_s12 + $0x580] sm:$0xf] }
 0x203   : > { %v1237_v63 = vadd.f32 1.0, %v8821_v56  ;;  %v6108_v56 = vld [vmem:[%s12619_s12 + $0x208] sm:$0xf0]  ;;  %v8155_v7 = vld [vmem:[%s12619_s12 + $0x2d4] sm:$0xf] }
 0x205   : > { %8824 = vrcp.f32 %v1237_v63  ;;  %v6495_v63 = vor.u32 %v8202_v22, %v6494_v4  ;;  %v6342_v4 = vld [vmem:[%s12619_s12 + $0x310] sm:$0xf]  ;;  %v8164_v22 = vld [vmem:[%s12619_s12 + $0x314] sm:$0xf0] }
 0x206   : > { %1996 = vmatpush.bf16.msrb.mxu2 %v6159_v49  ;;  %v6212_v49 = vld [vmem:[%s12619_s12 + $0x2d8] sm:$0xf0] }
 0x207   : > { %v8823_v37 = vpop.eup %8822  ;;  %v6215_v16 = vor.u32 %v8155_v7, %v6212_v49  ;;  %v6430_v7 = vld [vmem:[%s12619_s12 + $0x3c0] sm:$0xf]  ;;  %v8186_v49 = vld [vmem:[%s12619_s12 + $0x3c4] sm:$0xf0] }
 0x208   : > { %v1238_v38 = vadd.f32 1.0, %v8823_v37  ;;  %v6111_v37 = vor.u32 %v8129_v13, %v6108_v56  ;;  %v8242_v13 = vld [vmem:[%s12619_s12 + $0x584] sm:$0xf0] }
 0x20a   : > { %8826 = vrcp.f32 %v1238_v38  ;;  %1997 = vmatpush.bf16.msrb.mxu2 %v6151_v54  ;;  %v8200_v54 = vld [vmem:[%s12619_s12 + $0x434] sm:$0xf0]  ;;  %v8170_v38 = vld [vmem:[%s12619_s12 + $0x344] sm:$0xf0] }
 0x20b   : > { %v8825_v14 = vpop.eup %8824  ;;  %1977 = vmatmul.bf16.vlgmr.msrb.gmra.mxu3 %v9990_v10 }
 0x20c   : > { %v1251_v11 = vmul.f32 %v8825_v14, %v1195_v31  ;;  %2649 = vmatpush.bf16.msrb.mxu3 %v6527_v61  ;;  %v6127_v31 = vor.u32 %v8133_v51, %v6124_v3  ;;  %v6463_v61 = vor.u32 %v8194_v48, %v6462_v15  ;;  %v6367_v14 = vor.u32 %v8170_v38, %v6366_v30  ;;  %v8190_v51 = vld [vmem:[%s12619_s12 + $0x3e4] sm:$0xf0]  ;;  %v8191_v15 = vld [vmem:[%s12619_s12 + $0x3f4] sm:$0xf]  ;;  %v6456_v48 = vld [vmem:[%s12619_s12 + $0x3f8] sm:$0xf0] }
 0x20d   : > { %v6447_v5 = vor.u32 %v8190_v51, %v6446_v9  ;;  %v6646_v30 = vld [vmem:[%s12619_s12 + $0x570] sm:$0xf]  ;;  %v8240_v38 = vld [vmem:[%s12619_s12 + $0x574] sm:$0xf0] }
 0x20e   : > { %v10202_v45 = vpack.c.bf16 %v1251_v11, %v1251_v11  ;;  %1998 = vmatpush.bf16.msrb.mxu2 %v6143_v53  ;;  %v6487_v53 = vor.u32 %v8200_v54, %v6486_v1  ;;  %v6207_v11 = vor.u32 %v8153_v33, %v6204_v57  ;;  %v6655_v1 = vor.u32 %v8242_v13, %v6654_v52  ;;  %v8145_v54 = vld [vmem:[%s12619_s12 + $0x284] sm:$0xf]  ;;  %v8184_v57 = vld [vmem:[%s12619_s12 + $0x3b4] sm:$0xf0]  ;;  %v6582_v9 = vld [vmem:[%s12619_s12 + $0x4f0] sm:$0xf] }
 0x20f   : > { %v6459_v33 = vor.u32 %v8191_v15, %v6456_v48  ;;  %v6647_v34 = vor.u32 %v8240_v38, %v6646_v30  ;;  %v8224_v51 = vld [vmem:[%s12619_s12 + $0x4f4] sm:$0xf0]  ;;  %v6710_v13 = vld [vmem:[%s12619_s12 + $0x5f0] sm:$0xf]  ;;  %v6702_v30 = vld [vmem:[%s12619_s12 + $0x5e0] sm:$0xf] }
 0x210   : > { %v8827_v41 = vpop.eup %8826  ;;  %2650 = vmatpush.bf16.msrb.mxu3 %v6519_v0  ;;  %1925 = vmatmul.bf16.vlgmr.msra.gmra.mxu0 %v10202_v45  ;;  %v6358_v0 = vld [vmem:[%s12619_s12 + $0x330] sm:$0xf]  ;;  %v8254_v38 = vld [vmem:[%s12619_s12 + $0x5e4] sm:$0xf0] }
 0x211   : > { %v1252_v21 = vmul.f32 %v8827_v41, %v10139_v62  ;;  %2623 = vmatpush.bf16.msra.mxu0 %v6399_v39  ;;  %1951 = vmatmul.bf16.vlgmr.msra.gmra.mxu2 %v9804_v19  ;;  %v8157_v62 = vld [vmem:[%s12619_s12 + $0x2e4] sm:$0xf]  ;;  %v8168_v39 = vld [vmem:[%s12619_s12 + $0x334] sm:$0xf0]  ;;  %v6350_v41 = vld [vmem:[%s12619_s12 + $0x320] sm:$0xf] }
 0x212   : > { %1999 = vmatpush.bf16.msrb.mxu2 %v6135_v27  ;;  %v6223_v32 = vor.u32 %v8157_v62, %v6220_v46  ;;  %v6196_v27 = vld [vmem:[%s12619_s12 + $0x2b8] sm:$0xf0]  ;;  %v6359_v3 = vor.u32 %v8168_v39, %v6358_v0  ;;  %v8193_v46 = vld [vmem:[%s12619_s12 + $0x404] sm:$0xf]  ;;  %v6638_v39 = vld [vmem:[%s12619_s12 + $0x560] sm:$0xf] }
 0x213   : > { %v10240_v55 = vpack.c.bf16 %v1252_v21, %v1252_v21  ;;  %v8166_v21 = vld [vmem:[%s12619_s12 + $0x324] sm:$0xf0]  ;;  %v6614_v48 = vld [vmem:[%s12619_s12 + $0x530] sm:$0xf] }
 0x214   : > { %2651 = vmatpush.bf16.msrb.mxu3 %v6511_v12  ;;  %v6199_v12 = vor.u32 %v8151_v42, %v6196_v27  ;;  %v6351_v28 = vor.u32 %v8166_v21, %v6350_v41  ;;  %v6414_v42 = vld [vmem:[%s12619_s12 + $0x3a0] sm:$0xf]  ;;  %v6630_v21 = vld [vmem:[%s12619_s12 + $0x550] sm:$0xf] }
 0x215   : > { %2624 = vmatpush.bf16.msra.mxu0 %v6391_v25  ;;  %6240 = vmatmul.msk.bf16.vlgmr.msrb.gmra.mxu1 %vm1848_vm1, %v10240_v55  ;;  %v6726_v25 = vld [vmem:[%s12619_s12 + $0x610] sm:$0xf] }
 0x216   : > { %2000 = vmatpush.bf16.msrb.mxu2 %v6127_v31  ;;  %2008 = vmatpush.bf16.msrb.mxu1 %v6231_v18  ;;  %v8149_v31 = vld [vmem:[%s12619_s12 + $0x2a4] sm:$0xf]  ;;  %v6188_v18 = vld [vmem:[%s12619_s12 + $0x2a8] sm:$0xf0]  ;;  %v6727_v62 = vor.u32 %v8260_v44, %v6726_v25  ;;  %v8236_v25 = vld [vmem:[%s12619_s12 + $0x554] sm:$0xf0] }
 0x217   : > { %v6406_v44 = vld [vmem:[%s12619_s12 + $0x390] sm:$0xf] }
 0x218   : > { %2652 = vmatpush.bf16.msrb.mxu3 %v6503_v8  ;;  %v6464_v8 = vld [vmem:[%s12619_s12 + $0x408] sm:$0xf0] }
 0x219   : > { %2625 = vmatpush.bf16.msra.mxu0 %v6383_v24  ;;  %v6191_v24 = vor.u32 %v8149_v31, %v6188_v18  ;;  %v6467_v56 = vor.u32 %v8193_v46, %v6464_v8  ;;  %v8180_v31 = vld [vmem:[%s12619_s12 + $0x394] sm:$0xf0]  ;;  %v6574_v18 = vld [vmem:[%s12619_s12 + $0x4e0] sm:$0xf]  ;;  %v6432_v46 = vld [vmem:[%s12619_s12 + $0x3c8] sm:$0xf0] }
 0x21a   : > { %2001 = vmatpush.bf16.msrb.mxu2 %v6119_v47  ;;  %2009 = vmatpush.bf16.msrb.mxu1 %v6223_v32  ;;  %v8147_v47 = vld [vmem:[%s12619_s12 + $0x294] sm:$0xf]  ;;  %v6439_v32 = vor.u32 %v8188_v35, %v6438_v40  ;;  %v6718_v40 = vld [vmem:[%s12619_s12 + $0x600] sm:$0xf]  ;;  %v8258_v35 = vld [vmem:[%s12619_s12 + $0x604] sm:$0xf0]  ;;  %v6407_v8 = vor.u32 %v8180_v31, %v6406_v44 }
 0x21b   : > { %6241 = vmatmul.msk.bf16.vlgmr.msra.gmra.mxu3 %vm1848_vm1, %v10240_v55  ;;  %v6528_v44 = vld [vmem:[%s12619_s12 + $0x488] sm:$0xf0]  ;;  %v6686_v31 = vld [vmem:[%s12619_s12 + $0x5c0] sm:$0xf] }
 0x21c   : > { %2653 = vmatpush.bf16.msrb.mxu3 %v6495_v63  ;;  %v6343_v63 = vor.u32 %v8164_v22, %v6342_v4  ;;  %v6622_v4 = vld [vmem:[%s12619_s12 + $0x540] sm:$0xf]  ;;  %v8234_v22 = vld [vmem:[%s12619_s12 + $0x544] sm:$0xf0] }
 0x21d   : > { %2626 = vmatpush.bf16.msra.mxu0 %v6375_v26  ;;  %v6183_v26 = vor.u32 %v8147_v47, %v6180_v6  ;;  %v6719_v47 = vor.u32 %v8258_v35, %v6718_v40  ;;  %v8220_v6 = vld [vmem:[%s12619_s12 + $0x4d4] sm:$0xf0]  ;;  %v8255_v35 = vld [vmem:[%s12619_s12 + $0x5f4] sm:$0xf] }
 0x21e   : > { %2002 = vmatpush.bf16.msrb.mxu2 %v6111_v37  ;;  %2010 = vmatpush.bf16.msrb.mxu1 %v6215_v16  ;;  %v6172_v37 = vld [vmem:[%s12619_s12 + $0x288] sm:$0xf0]  ;;  %v6431_v16 = vor.u32 %v8186_v49, %v6430_v7  ;;  %v6623_v7 = vor.u32 %v8234_v22, %v6622_v4  ;;  %v8183_v49 = vld [vmem:[%s12619_s12 + $0x3b4] sm:$0xf]  ;;  %v8212_v4 = vld [vmem:[%s12619_s12 + $0x494] sm:$0xf0] }
 0x21f   : > { %v6175_v43 = vor.u32 %v8145_v54, %v6172_v37  ;;  %v6558_v54 = vld [vmem:[%s12619_s12 + $0x4c0] sm:$0xf]  ;;  %v8218_v37 = vld [vmem:[%s12619_s12 + $0x4c4] sm:$0xf0] }
 0x220   : > { %2654 = vmatpush.bf16.msrb.mxu3 %v6487_v53  ;;  %1990 = vmatmul.bf16.vlgmr.msrb.gmra.mxu0 %v10150_v59  ;;  %v6590_v53 = vld [vmem:[%s12619_s12 + $0x500] sm:$0xf] }
 0x221   : > { %2627 = vmatpush.bf16.msra.mxu0 %v6367_v14  ;;  %2003 = vmatmul.bf16.vlgmr.msrb.gmra.mxu2 %v10136_v23  ;;  %v6448_v14 = vld [vmem:[%s12619_s12 + $0x3e8] sm:$0xf0]  ;;  %v6591_v0 = vor.u32 %v8226_v2, %v6590_v53  ;;  %v6559_v2 = vor.u32 %v8218_v37, %v6558_v54  ;;  %v8205_v54 = vld [vmem:[%s12619_s12 + $0x464] sm:$0xf] }
 0x222   : > { %2636 = vmatpush.bf16.msra.mxu2 %v6463_v61  ;;  %2011 = vmatpush.bf16.msrb.mxu1 %v6207_v11  ;;  %v6422_v61 = vld [vmem:[%s12619_s12 + $0x3b0] sm:$0xf]  ;;  %v6451_v27 = vor.u32 %v8189_v17, %v6448_v14  ;;  %v6606_v17 = vld [vmem:[%s12619_s12 + $0x520] sm:$0xf]  ;;  %v8230_v14 = vld [vmem:[%s12619_s12 + $0x524] sm:$0xf0] }
 0x223   : > { %v6423_v11 = vor.u32 %v8184_v57, %v6422_v61  ;;  %v6416_v57 = vld [vmem:[%s12619_s12 + $0x3a8] sm:$0xf0] }
 0x224   : > { %2655 = vmatpush.bf16.msrb.mxu3 %v6479_v36  ;;  %v8182_v36 = vld [vmem:[%s12619_s12 + $0x3a4] sm:$0xf0]  ;;  %v6512_v37 = vld [vmem:[%s12619_s12 + $0x468] sm:$0xf0] }
 0x225   : > { %2628 = vmatpush.bf16.msra.mxu0 %v6359_v3  ;;  %1964 = vmatmul.bf16.vlgmr.msra.gmra.mxu1 %v9979_v20  ;;  %v8187_v3 = vld [vmem:[%s12619_s12 + $0x3d4] sm:$0xf]  ;;  %v6415_v41 = vor.u32 %v8182_v36, %v6414_v42  ;;  %v6408_v36 = vld [vmem:[%s12619_s12 + $0x398] sm:$0xf0] }
 0x226   : > { %2637 = vmatpush.bf16.msra.mxu2 %v6455_v29  ;;  %2012 = vmatpush.bf16.msrb.mxu1 %v6199_v12  ;;  %v8238_v29 = vld [vmem:[%s12619_s12 + $0x564] sm:$0xf0]  ;;  %v6583_v12 = vor.u32 %v8224_v51, %v6582_v9  ;;  %v8179_v42 = vld [vmem:[%s12619_s12 + $0x394] sm:$0xf]  ;;  %v8257_v9 = vld [vmem:[%s12619_s12 + $0x604] sm:$0xf] }
 0x227   : > { %v6639_v50 = vor.u32 %v8238_v29, %v6638_v39  ;;  %v6694_v39 = vld [vmem:[%s12619_s12 + $0x5d0] sm:$0xf]  ;;  %v8252_v29 = vld [vmem:[%s12619_s12 + $0x5d4] sm:$0xf0]  ;;  %v6720_v51 = vld [vmem:[%s12619_s12 + $0x608] sm:$0xf0] }
 0x228   : > { %2656 = vmatpush.bf16.msrb.mxu3 %v6471_v58  ;;  %v8222_v58 = vld [vmem:[%s12619_s12 + $0x4e4] sm:$0xf0] }
 0x229   : > { %2629 = vmatpush.bf16.msra.mxu0 %v6351_v28  ;;  %v6631_v28 = vor.u32 %v8236_v25, %v6630_v21  ;;  %v8214_v21 = vld [vmem:[%s12619_s12 + $0x4a4] sm:$0xf0]  ;;  %v8209_v25 = vld [vmem:[%s12619_s12 + $0x484] sm:$0xf] }
 0x22a   : > { %2638 = vmatpush.bf16.msra.mxu2 %v6447_v5  ;;  %2013 = vmatpush.bf16.msrb.mxu1 %v6191_v24  ;;  %v6443_v5 = vor.u32 %v8187_v3, %v6440_v60  ;;  %v6575_v24 = vor.u32 %v8222_v58, %v6574_v18  ;;  %v6598_v60 = vld [vmem:[%s12619_s12 + $0x510] sm:$0xf]  ;;  %v8250_v18 = vld [vmem:[%s12619_s12 + $0x5c4] sm:$0xf0]  ;;  %v6723_v58 = vor.u32 %v8257_v9, %v6720_v51  ;;  %v6592_v9 = vld [vmem:[%s12619_s12 + $0x508] sm:$0xf0] }
 0x22b   : > { %2657 = vmatmul.bf16.vlgmr.msrb.gmra.mxu3 %v9990_v10  ;;  %v6687_v22 = vor.u32 %v8250_v18, %v6686_v31  ;;  %v8223_v18 = vld [vmem:[%s12619_s12 + $0x4f4] sm:$0xf] }
 0x22c   : > { %2708 = vmatpush.bf16.msra.mxu3 %v6727_v62  ;;  %v8185_v62 = vld [vmem:[%s12619_s12 + $0x3c4] sm:$0xf] }
 0x22d   : > { %2630 = vmatpush.bf16.msra.mxu0 %v6343_v63  ;;  %v6435_v52 = vor.u32 %v8185_v62, %v6432_v46  ;;  %v6424_v63 = vld [vmem:[%s12619_s12 + $0x3b8] sm:$0xf0]  ;;  %v6531_v46 = vor.u32 %v8209_v25, %v6528_v44  ;;  %v8171_v44 = vld [vmem:[%s12619_s12 + $0x354] sm:$0xf] }
 0x22e   : > { %2639 = vmatpush.bf16.msra.mxu2 %v6439_v32  ;;  %2014 = vmatpush.bf16.msrb.mxu1 %v6183_v26  ;;  %v6566_v32 = vld [vmem:[%s12619_s12 + $0x4d0] sm:$0xf]  ;;  %v8232_v26 = vld [vmem:[%s12619_s12 + $0x534] sm:$0xf0] }
 0x22f   : > { %v6567_v15 = vor.u32 %v8220_v6, %v6566_v32  ;;  %v6615_v61 = vor.u32 %v8232_v26, %v6614_v48  ;;  %v6520_v32 = vld [vmem:[%s12619_s12 + $0x478] sm:$0xf0]  ;;  %v6678_v6 = vld [vmem:[%s12619_s12 + $0x5b0] sm:$0xf]  ;;  %v6704_v48 = vld [vmem:[%s12619_s12 + $0x5e8] sm:$0xf0] }
 0x230   : > { %2727 = vmatpush.bf16.msrb.mxu3 %v6467_v56  ;;  %2631 = vmatmul.bf16.vlgmr.msra.gmra.mxu0 %v9804_v19  ;;  %v8256_v56 = vld [vmem:[%s12619_s12 + $0x5f4] sm:$0xf0] }
 0x231   : > { %2675 = vmatpush.bf16.msrb.mxu0 %v6655_v1  ;;  %v6711_v1 = vor.u32 %v8256_v56, %v6710_v13  ;;  %v8177_v13 = vld [vmem:[%s12619_s12 + $0x384] sm:$0xf]  ;;  %v6400_v56 = vld [vmem:[%s12619_s12 + $0x388] sm:$0xf0] }
 0x232   : > { %2640 = vmatpush.bf16.msra.mxu2 %v6431_v16  ;;  %2015 = vmatpush.bf16.msrb.mxu1 %v6175_v43  ;;  %v6427_v16 = vor.u32 %v8183_v49, %v6424_v63  ;;  %v6703_v43 = vor.u32 %v8254_v38, %v6702_v30  ;;  %v8246_v30 = vld [vmem:[%s12619_s12 + $0x5a4] sm:$0xf0]  ;;  %v8175_v38 = vld [vmem:[%s12619_s12 + $0x374] sm:$0xf] }
 0x234   : > { %2728 = vmatpush.bf16.msrb.mxu3 %v6459_v33  ;;  %v8181_v33 = vld [vmem:[%s12619_s12 + $0x3a4] sm:$0xf] }
 0x235   : > { %2676 = vmatpush.bf16.msrb.mxu0 %v6647_v34  ;;  %2016 = vmatmul.bf16.vlgmr.msrb.gmra.mxu1 %v10202_v45  ;;  %v6550_v34 = vld [vmem:[%s12619_s12 + $0x4b0] sm:$0xf] }
 0x236   : > { %2641 = vmatpush.bf16.msra.mxu2 %v6423_v11  ;;  %2662 = vmatpush.bf16.msra.mxu1 %v6591_v0  ;;  %v8216_v11 = vld [vmem:[%s12619_s12 + $0x4b4] sm:$0xf0]  ;;  %v6419_v0 = vor.u32 %v8181_v33, %v6416_v57  ;;  %v6515_v57 = vor.u32 %v8205_v54, %v6512_v37  ;;  %v8167_v54 = vld [vmem:[%s12619_s12 + $0x334] sm:$0xf]  ;;  %v6360_v37 = vld [vmem:[%s12619_s12 + $0x338] sm:$0xf0] }
 0x237   : > { %v6551_v3 = vor.u32 %v8216_v11, %v6550_v34  ;;  %v8203_v34 = vld [vmem:[%s12619_s12 + $0x454] sm:$0xf]  ;;  %v6504_v11 = vld [vmem:[%s12619_s12 + $0x458] sm:$0xf0] }
 0x238   : > { %2729 = vmatpush.bf16.msrb.mxu3 %v6451_v27  ;;  %v6607_v27 = vor.u32 %v8230_v14, %v6606_v17  ;;  %v6696_v17 = vld [vmem:[%s12619_s12 + $0x5d8] sm:$0xf0]  ;;  %v6507_v51 = vor.u32 %v8203_v34, %v6504_v11  ;;  %v8195_v34 = vld [vmem:[%s12619_s12 + $0x414] sm:$0xf] }
 0x239   : > { %2677 = vmatpush.bf16.msrb.mxu0 %v6639_v50  ;;  %v8228_v50 = vld [vmem:[%s12619_s12 + $0x514] sm:$0xf0]  ;;  %v6472_v11 = vld [vmem:[%s12619_s12 + $0x418] sm:$0xf0] }
 0x23a   : > { %2642 = vmatpush.bf16.msra.mxu2 %v6415_v41  ;;  %2663 = vmatpush.bf16.msra.mxu1 %v6583_v12  ;;  %v6542_v41 = vld [vmem:[%s12619_s12 + $0x4a0] sm:$0xf]  ;;  %v6695_v12 = vor.u32 %v8252_v29, %v6694_v39  ;;  %v6599_v40 = vor.u32 %v8228_v50, %v6598_v60  ;;  %v8244_v39 = vld [vmem:[%s12619_s12 + $0x594] sm:$0xf0]  ;;  %v8173_v29 = vld [vmem:[%s12619_s12 + $0x364] sm:$0xf] }
 0x23b   : > { %6732 = vmatmul.msk.bf16.vlgmr.msra.gmra.mxu3 %vm1848_vm1, %v10240_v55  ;;  %v6543_v62 = vor.u32 %v8214_v21, %v6542_v41  ;;  %v6688_v60 = vld [vmem:[%s12619_s12 + $0x5c8] sm:$0xf0] }
 0x23c   : > { %2730 = vmatpush.bf16.msrb.mxu3 %v6443_v5  ;;  %v6411_v5 = vor.u32 %v8179_v42, %v6408_v36  ;;  %v6384_v42 = vld [vmem:[%s12619_s12 + $0x368] sm:$0xf0]  ;;  %v8225_v36 = vld [vmem:[%s12619_s12 + $0x504] sm:$0xf] }
 0x23d   : > { %2678 = vmatpush.bf16.msrb.mxu0 %v6631_v28  ;;  %v6387_v41 = vor.u32 %v8173_v29, %v6384_v42  ;;  %v6496_v21 = vld [vmem:[%s12619_s12 + $0x448] sm:$0xf0]  ;;  %v6595_v25 = vor.u32 %v8225_v36, %v6592_v9  ;;  %v6728_v36 = vld [vmem:[%s12619_s12 + $0x618] sm:$0xf0] }
 0x23e   : > { %2643 = vmatpush.bf16.msra.mxu2 %v6407_v8  ;;  %2664 = vmatpush.bf16.msra.mxu1 %v6575_v24  ;;  %v10540_v53 = vpop.f32.mrf.mxu3  ;;  %v6712_v8 = vld [vmem:[%s12619_s12 + $0x5f8] sm:$0xf0]  ;;  %v6534_v24 = vld [vmem:[%s12619_s12 + $0x490] sm:$0xf]  ;;  %v6352_v42 = vld [vmem:[%s12619_s12 + $0x328] sm:$0xf0] }
 0x23f   : > { %v6535_v49 = vor.u32 %v8212_v4, %v6534_v24  ;;  %v6488_v24 = vld [vmem:[%s12619_s12 + $0x438] sm:$0xf0] }
 0x240   : > { %2731 = vmatpush.bf16.msrb.mxu3 %v6435_v52  ;;  %v8248_v52 = vld [vmem:[%s12619_s12 + $0x5b4] sm:$0xf0] }
 0x241   : > { %2644 = vmatmul.bf16.vlgmr.msra.gmra.mxu2 %v9979_v20  ;;  %2679 = vmatpush.bf16.msrb.mxu0 %v6623_v7  ;;  %v6715_v7 = vor.u32 %v8255_v35, %v6712_v8  ;;  %v6679_v26 = vor.u32 %v8248_v52, %v6678_v6  ;;  %v8247_v35 = vld [vmem:[%s12619_s12 + $0x5b4] sm:$0xf]  ;;  %v6368_v6 = vld [vmem:[%s12619_s12 + $0x348] sm:$0xf0] }
 0x242   : > { %2688 = vmatpush.bf16.msrb.mxu2 %v6719_v47  ;;  %2665 = vmatpush.bf16.msra.mxu1 %v6567_v15  ;;  %v8207_v47 = vld [vmem:[%s12619_s12 + $0x474] sm:$0xf]  ;;  %v8253_v15 = vld [vmem:[%s12619_s12 + $0x5e4] sm:$0xf] }
 0x243   : > { %v6523_v63 = vor.u32 %v8207_v47, %v6520_v32  ;;  %v6707_v33 = vor.u32 %v8253_v15, %v6704_v48  ;;  %v8199_v8 = vld [vmem:[%s12619_s12 + $0x434] sm:$0xf]  ;;  %v8169_v32 = vld [vmem:[%s12619_s12 + $0x344] sm:$0xf] }
 0x244   : > { %2732 = vmatpush.bf16.msrb.mxu3 %v6427_v16  ;;  %v6670_v16 = vld [vmem:[%s12619_s12 + $0x5a0] sm:$0xf]  ;;  %v6371_v15 = vor.u32 %v8169_v32, %v6368_v6  ;;  %v8197_v48 = vld [vmem:[%s12619_s12 + $0x424] sm:$0xf] }
 0x245   : > { %2680 = vmatpush.bf16.msrb.mxu0 %v6615_v61  ;;  %v6392_v61 = vld [vmem:[%s12619_s12 + $0x378] sm:$0xf0]  ;;  %v6671_v14 = vor.u32 %v8246_v30, %v6670_v16  ;;  %v8219_v30 = vld [vmem:[%s12619_s12 + $0x4d4] sm:$0xf]  ;;  %v6946_v6 = vld [vmem:[%s12619_s12 + $0x700] sm:$0xf] }
 0x246   : > { %2689 = vmatpush.bf16.msrb.mxu2 %v6711_v1  ;;  %2666 = vmatpush.bf16.msra.mxu1 %v6559_v2  ;;  %v1863_v28 = vpop.f32.mrf.mxu3  ;;  %v6403_v1 = vor.u32 %v8177_v13, %v6400_v56  ;;  %v8251_v2 = vld [vmem:[%s12619_s12 + $0x5d4] sm:$0xf]  ;;  %v8221_v13 = vld [vmem:[%s12619_s12 + $0x4e4] sm:$0xf] }
 0x247   : > { %v6680_v28 = vld [vmem:[%s12619_s12 + $0x5b8] sm:$0xf0] }
 0x248   : > { %2733 = vmatpush.bf16.msrb.mxu3 %v6419_v0  ;;  %v6662_v0 = vld [vmem:[%s12619_s12 + $0x590] sm:$0xf]  ;;  %v6683_v52 = vor.u32 %v8247_v35, %v6680_v28  ;;  %v6552_v35 = vld [vmem:[%s12619_s12 + $0x4b8] sm:$0xf0]  ;;  %v8241_v28 = vld [vmem:[%s12619_s12 + $0x584] sm:$0xf] }
 0x249   : > { %2681 = vmatpush.bf16.msrb.mxu0 %v6607_v27  ;;  %v6699_v27 = vor.u32 %v8251_v2, %v6696_v17  ;;  %v6663_v50 = vor.u32 %v8244_v39, %v6662_v0  ;;  %v7082_v2 = vld [vmem:[%s12619_s12 + $0x810] sm:$0xf]  ;;  %v8324_v17 = vld [vmem:[%s12619_s12 + $0x814] sm:$0xf0]  ;;  %v8165_v0 = vld [vmem:[%s12619_s12 + $0x324] sm:$0xf] }
 0x24a   : > { %2690 = vmatpush.bf16.msrb.mxu2 %v6703_v43  ;;  %2667 = vmatpush.bf16.msra.mxu1 %v6551_v3  ;;  %v6395_v43 = vor.u32 %v8175_v38, %v6392_v61  ;;  %v8249_v3 = vld [vmem:[%s12619_s12 + $0x5c4] sm:$0xf]  ;;  %v6568_v38 = vld [vmem:[%s12619_s12 + $0x4d8] sm:$0xf0]  ;;  %v8243_v61 = vld [vmem:[%s12619_s12 + $0x594] sm:$0xf] }
 0x24b   : > { %v6691_v31 = vor.u32 %v8249_v3, %v6688_v60  ;;  %v6571_v29 = vor.u32 %v8219_v30, %v6568_v38  ;;  %v6560_v3 = vld [vmem:[%s12619_s12 + $0x4c8] sm:$0xf0]  ;;  %v7083_v60 = vor.u32 %v8324_v17, %v7082_v2  ;;  %v8211_v30 = vld [vmem:[%s12619_s12 + $0x494] sm:$0xf]  ;;  %v6536_v38 = vld [vmem:[%s12619_s12 + $0x498] sm:$0xf0] }
 0x24c   : > { %2734 = vmatpush.bf16.msrb.mxu3 %v6411_v5  ;;  %v6376_v5 = vld [vmem:[%s12619_s12 + $0x358] sm:$0xf0]  ;;  %v6890_v2 = vld [vmem:[%s12619_s12 + $0x690] sm:$0xf]  ;;  %v8276_v17 = vld [vmem:[%s12619_s12 + $0x694] sm:$0xf0] }
 0x24d   : > { %2682 = vmatpush.bf16.msrb.mxu0 %v6599_v40 }
 0x24e   : > { %2691 = vmatpush.bf16.msrb.mxu2 %v6695_v12  ;;  %2668 = vmatpush.bf16.msra.mxu1 %v6543_v62  ;;  %v8201_v12 = vld [vmem:[%s12619_s12 + $0x444] sm:$0xf] }
 0x24f   : > { %2735 = vmatmul.bf16.vlgmr.msrb.gmra.mxu3 %v9979_v20  ;;  %v6499_v40 = vor.u32 %v8201_v12, %v6496_v21  ;;  %v6355_v12 = vor.u32 %v8165_v0, %v6352_v42  ;;  %v6891_v42 = vor.u32 %v8276_v17, %v6890_v2  ;;  %v6898_v2 = vld [vmem:[%s12619_s12 + $0x6a0] sm:$0xf]  ;;  %v8278_v17 = vld [vmem:[%s12619_s12 + $0x6a4] sm:$0xf0] }
 0x250   : > { %2779 = vmatpush.bf16.msra.mxu3 %v6723_v58  ;;  %2683 = vmatmul.bf16.vlgmr.msrb.gmra.mxu0 %v10136_v23  ;;  %v6584_v58 = vld [vmem:[%s12619_s12 + $0x4f8] sm:$0xf0] }
 0x251   : > { %2740 = vmatpush.bf16.msra.mxu0 %v6531_v46  ;;  %v6379_v46 = vor.u32 %v8171_v44, %v6376_v5  ;;  %v6587_v47 = vor.u32 %v8223_v18, %v6584_v58  ;;  %v6954_v44 = vld [vmem:[%s12619_s12 + $0x710] sm:$0xf]  ;;  %v8292_v5 = vld [vmem:[%s12619_s12 + $0x714] sm:$0xf0]  ;;  %v8163_v18 = vld [vmem:[%s12619_s12 + $0x314] sm:$0xf] }
 0x252   : > { %2692 = vmatpush.bf16.msrb.mxu2 %v6687_v22  ;;  %2669 = vmatpush.bf16.msra.mxu1 %v6535_v49  ;;  %v8245_v49 = vld [vmem:[%s12619_s12 + $0x5a4] sm:$0xf]  ;;  %v6344_v58 = vld [vmem:[%s12619_s12 + $0x318] sm:$0xf0] }
 0x254   : > { %2780 = vmatpush.bf16.msra.mxu3 %v6715_v7  ;;  %v6491_v7 = vor.u32 %v8199_v8, %v6488_v24  ;;  %v6955_v8 = vor.u32 %v8292_v5, %v6954_v44  ;;  %v6347_v24 = vor.u32 %v8163_v18, %v6344_v58  ;;  %v8233_v5 = vld [vmem:[%s12619_s12 + $0x544] sm:$0xf]  ;;  %v6874_v58 = vld [vmem:[%s12619_s12 + $0x670] sm:$0xf] }
 0x255   : > { %2741 = vmatpush.bf16.msra.mxu0 %v6523_v63  ;;  %2670 = vmatmul.bf16.vlgmr.msra.gmra.mxu1 %v10150_v59  ;;  %v6672_v63 = vld [vmem:[%s12619_s12 + $0x5a8] sm:$0xf0] }
 0x256   : > { %2693 = vmatpush.bf16.msrb.mxu2 %v6679_v26  ;;  %2714 = vmatpush.bf16.msrb.mxu1 %v6403_v1  ;;  %v6480_v26 = vld [vmem:[%s12619_s12 + $0x428] sm:$0xf0]  ;;  %v6675_v16 = vor.u32 %v8245_v49, %v6672_v63  ;;  %v6648_v49 = vld [vmem:[%s12619_s12 + $0x578] sm:$0xf0] }
 0x258   : > { %2781 = vmatpush.bf16.msra.mxu3 %v6707_v33  ;;  %v1874_v62 = vpop.f32.mrf.mxu0  ;;  %v6483_v33 = vor.u32 %v8197_v48, %v6480_v26  ;;  %v7058_v48 = vld [vmem:[%s12619_s12 + $0x7e0] sm:$0xf]  ;;  %v8318_v26 = vld [vmem:[%s12619_s12 + $0x7e4] sm:$0xf0] }
 0x259   : > { %2742 = vmatpush.bf16.msra.mxu0 %v6515_v57  ;;  %v1875_v4 = vadd.f32 %v1874_v62, %v10540_v53  ;;  %v1887_v22 = vpop.f32.mrf.mxu1  ;;  %v6576_v53 = vld [vmem:[%s12619_s12 + $0x4e8] sm:$0xf0]  ;;  %v6664_v57 = vld [vmem:[%s12619_s12 + $0x598] sm:$0xf0] }
 0x25a   : > { %2694 = vmatpush.bf16.msrb.mxu2 %v6671_v14  ;;  %2715 = vmatpush.bf16.msrb.mxu1 %v6395_v43  ;;  %v6579_v1 = vor.u32 %v8221_v13, %v6576_v53  ;;  %v6363_v43 = vor.u32 %v8167_v54, %v6360_v37  ;;  %v6667_v9 = vor.u32 %v8243_v61, %v6664_v57  ;;  %v6656_v62 = vld [vmem:[%s12619_s12 + $0x588] sm:$0xf0]  ;;  %v8213_v13 = vld [vmem:[%s12619_s12 + $0x4a4] sm:$0xf]  ;;  %v6938_v37 = vld [vmem:[%s12619_s12 + $0x6f0] sm:$0xf] }
 0x25b   : > { %v10732_v56 = vadd.f32 %v1887_v22, %v1875_v4  ;;  %v7066_v4 = vld [vmem:[%s12619_s12 + $0x7f0] sm:$0xf]  ;;  %v8320_v22 = vld [vmem:[%s12619_s12 + $0x7f4] sm:$0xf0]  ;;  %v6659_v32 = vor.u32 %v8241_v28, %v6656_v62  ;;  %v6544_v53 = vld [vmem:[%s12619_s12 + $0x4a8] sm:$0xf0]  ;;  %v7059_v57 = vor.u32 %v8318_v26, %v7058_v48 }
 0x25c   : > { %2782 = vmatpush.bf16.msra.mxu3 %v6699_v27  ;;  %v8259_v27 = vld [vmem:[%s12619_s12 + $0x614] sm:$0xf]  ;;  %v7067_v63 = vor.u32 %v8320_v22, %v7066_v4  ;;  %v8237_v61 = vld [vmem:[%s12619_s12 + $0x564] sm:$0xf]  ;;  %v7034_v28 = vld [vmem:[%s12619_s12 + $0x7b0] sm:$0xf] }
 0x25d   : > { %2743 = vmatpush.bf16.msra.mxu0 %v6507_v51  ;;  %v8217_v51 = vld [vmem:[%s12619_s12 + $0x4c4] sm:$0xf]  ;;  %v6731_v21 = vor.u32 %v8259_v27, %v6728_v36  ;;  %v8235_v27 = vld [vmem:[%s12619_s12 + $0x554] sm:$0xf]  ;;  %v6632_v36 = vld [vmem:[%s12619_s12 + $0x558] sm:$0xf0] }
 0x25e   : > { %2695 = vmatpush.bf16.msrb.mxu2 %v6663_v50  ;;  %2716 = vmatpush.bf16.msrb.mxu1 %v6387_v41  ;;  %v6475_v50 = vor.u32 %v8195_v34, %v6472_v11  ;;  %v7074_v41 = vld [vmem:[%s12619_s12 + $0x800] sm:$0xf]  ;;  %v8316_v34 = vld [vmem:[%s12619_s12 + $0x7d4] sm:$0xf0]  ;;  %v6539_v11 = vor.u32 %v8211_v30, %v6536_v38  ;;  %v8231_v22 = vld [vmem:[%s12619_s12 + $0x534] sm:$0xf] }
 0x25f   : > { %v8312_v62 = vld [vmem:[%s12619_s12 + $0x7b4] sm:$0xf0]  ;;  %v8275_v48 = vld [vmem:[%s12619_s12 + $0x694] sm:$0xf]  ;;  %v6892_v26 = vld [vmem:[%s12619_s12 + $0x698] sm:$0xf0] }
 0x260   : > { %2783 = vmatpush.bf16.msra.mxu3 %v6691_v31  ;;  %v1876_v14 = vpop.f32.mrf.mxu0  ;;  %v6563_v31 = vor.u32 %v8217_v51, %v6560_v3  ;;  %v6882_v51 = vld [vmem:[%s12619_s12 + $0x680] sm:$0xf]  ;;  %v8274_v3 = vld [vmem:[%s12619_s12 + $0x684] sm:$0xf0]  ;;  %v6858_v38 = vld [vmem:[%s12619_s12 + $0x650] sm:$0xf] }
 0x261   : > { %2696 = vmatmul.bf16.vlgmr.msrb.gmra.mxu2 %v10202_v45  ;;  %2744 = vmatpush.bf16.msra.mxu0 %v6499_v40  ;;  %v1889_v39 = vpop.f32.mrf.mxu1  ;;  %v8215_v40 = vld [vmem:[%s12619_s12 + $0x4b4] sm:$0xf]  ;;  %v6883_v44 = vor.u32 %v8274_v3, %v6882_v51  ;;  %v8308_v51 = vld [vmem:[%s12619_s12 + $0x794] sm:$0xf0] }
 0x262   : > { %2753 = vmatpush.bf16.msra.mxu2 %v6595_v25  ;;  %2717 = vmatpush.bf16.msrb.mxu1 %v6379_v46  ;;  %v8322_v25 = vld [vmem:[%s12619_s12 + $0x804] sm:$0xf0]  ;;  %v6930_v39 = vld [vmem:[%s12619_s12 + $0x6e0] sm:$0xf] }
 0x263   : > { %v7075_v46 = vor.u32 %v8322_v25, %v7074_v41  ;;  %v8314_v41 = vld [vmem:[%s12619_s12 + $0x7c4] sm:$0xf0]  ;;  %v8284_v25 = vld [vmem:[%s12619_s12 + $0x6d4] sm:$0xf0] }
 0x264   : > { %2784 = vmatpush.bf16.msra.mxu3 %v6683_v52  ;;  %v8290_v52 = vld [vmem:[%s12619_s12 + $0x704] sm:$0xf0] }
 0x265   : > { %2745 = vmatpush.bf16.msra.mxu0 %v6491_v7  ;;  %v8239_v7 = vld [vmem:[%s12619_s12 + $0x574] sm:$0xf] }
 0x266   : > { %2754 = vmatpush.bf16.msra.mxu2 %v6587_v47  ;;  %2718 = vmatpush.bf16.msrb.mxu1 %v6371_v15  ;;  %v6555_v47 = vor.u32 %v8215_v40, %v6552_v35  ;;  %v6947_v15 = vor.u32 %v8290_v52, %v6946_v6  ;;  %v6651_v54 = vor.u32 %v8239_v7, %v6648_v49  ;;  %v8272_v40 = vld [vmem:[%s12619_s12 + $0x674] sm:$0xf0]  ;;  %v6866_v6 = vld [vmem:[%s12619_s12 + $0x660] sm:$0xf]  ;;  %v8270_v52 = vld [vmem:[%s12619_s12 + $0x664] sm:$0xf0] }
 0x267   : > { %v6875_v4 = vor.u32 %v8272_v40, %v6874_v58  ;;  %v8310_v7 = vld [vmem:[%s12619_s12 + $0x7a4] sm:$0xf0]  ;;  %v6906_v49 = vld [vmem:[%s12619_s12 + $0x6b0] sm:$0xf] }
 0x268   : > { %2785 = vmatpush.bf16.msra.mxu3 %v6675_v16  ;;  %v8288_v16 = vld [vmem:[%s12619_s12 + $0x6f4] sm:$0xf0]  ;;  %v8354_v58 = vld [vmem:[%s12619_s12 + $0x904] sm:$0xf0]  ;;  %v6842_v40 = vld [vmem:[%s12619_s12 + $0x630] sm:$0xf] }
 0x269   : > { %2746 = vmatpush.bf16.msra.mxu0 %v6483_v33  ;;  %v6640_v33 = vld [vmem:[%s12619_s12 + $0x568] sm:$0xf0]  ;;  %v6939_v14 = vor.u32 %v8288_v16, %v6938_v37  ;;  %v8229_v37 = vld [vmem:[%s12619_s12 + $0x524] sm:$0xf] }
 0x26a   : > { %2755 = vmatpush.bf16.msra.mxu2 %v6579_v1  ;;  %2719 = vmatpush.bf16.msrb.mxu1 %v6363_v43  ;;  %v6547_v1 = vor.u32 %v8213_v13, %v6544_v53  ;;  %v7050_v43 = vld [vmem:[%s12619_s12 + $0x7d0] sm:$0xf]  ;;  %v6643_v0 = vor.u32 %v8237_v61, %v6640_v33  ;;  %v7026_v53 = vld [vmem:[%s12619_s12 + $0x7a0] sm:$0xf]  ;;  %v6608_v16 = vld [vmem:[%s12619_s12 + $0x528] sm:$0xf0] }
 0x26b   : > { %v7027_v30 = vor.u32 %v8310_v7, %v7026_v53  ;;  %v8268_v61 = vld [vmem:[%s12619_s12 + $0x654] sm:$0xf0]  ;;  %v8262_v53 = vld [vmem:[%s12619_s12 + $0x624] sm:$0xf0]  ;;  %v7002_v7 = vld [vmem:[%s12619_s12 + $0x770] sm:$0xf] }
 0x26c   : > { %2786 = vmatpush.bf16.msra.mxu3 %v6667_v9  ;;  %v7051_v9 = vor.u32 %v8316_v34, %v7050_v43  ;;  %v6611_v43 = vor.u32 %v8229_v37, %v6608_v16  ;;  %v6884_v34 = vld [vmem:[%s12619_s12 + $0x688] sm:$0xf0]  ;;  %v8267_v37 = vld [vmem:[%s12619_s12 + $0x654] sm:$0xf]  ;;  %v6860_v16 = vld [vmem:[%s12619_s12 + $0x658] sm:$0xf0] }
 0x26d   : > { %2747 = vmatpush.bf16.msra.mxu0 %v6475_v50  ;;  %v7042_v50 = vld [vmem:[%s12619_s12 + $0x7c0] sm:$0xf] }
 0x26e   : > { %2756 = vmatpush.bf16.msra.mxu2 %v6571_v29  ;;  %2720 = vmatpush.bf16.msrb.mxu1 %v6355_v12  ;;  %v8286_v29 = vld [vmem:[%s12619_s12 + $0x6e4] sm:$0xf0]  ;;  %v6635_v12 = vor.u32 %v8235_v27, %v6632_v36  ;;  %v7043_v18 = vor.u32 %v8314_v41, %v7042_v50  ;;  %v6850_v27 = vld [vmem:[%s12619_s12 + $0x640] sm:$0xf] }
 0x26f   : > { %2787 = vmatmul.bf16.vlgmr.msra.gmra.mxu3 %v10202_v45  ;;  %v8266_v36 = vld [vmem:[%s12619_s12 + $0x644] sm:$0xf0] }
 0x270   : > { %3435 = vmatpush.bf16.msrb.mxu3 %v7083_v60  ;;  %2748 = vmatmul.bf16.vlgmr.msra.gmra.mxu0 %v9990_v10  ;;  %v6931_v60 = vor.u32 %v8286_v29, %v6930_v39  ;;  %v6859_v39 = vor.u32 %v8268_v61, %v6858_v38  ;;  %v8227_v29 = vld [vmem:[%s12619_s12 + $0x514] sm:$0xf] }
 0x271   : > { %2799 = vmatpush.bf16.msrb.mxu0 %v6731_v21  ;;  %v6922_v21 = vld [vmem:[%s12619_s12 + $0x6d0] sm:$0xf] }
 0x272   : > { %2757 = vmatpush.bf16.msra.mxu2 %v6563_v31  ;;  %2721 = vmatpush.bf16.msrb.mxu1 %v6347_v24  ;;  %v6624_v31 = vld [vmem:[%s12619_s12 + $0x548] sm:$0xf0]  ;;  %v6923_v35 = vor.u32 %v8284_v25, %v6922_v21  ;;  %v8282_v24 = vld [vmem:[%s12619_s12 + $0x6c4] sm:$0xf0]  ;;  %v8271_v25 = vld [vmem:[%s12619_s12 + $0x674] sm:$0xf] }
 0x274   : > { %3436 = vmatpush.bf16.msrb.mxu3 %v7075_v46  ;;  %v6627_v46 = vor.u32 %v8233_v5, %v6624_v31  ;;  %v6851_v31 = vor.u32 %v8266_v36, %v6850_v27 }
 0x275   : > { %3409 = vmatpush.bf16.msra.mxu0 %v6955_v8  ;;  %2722 = vmatmul.bf16.vlgmr.msrb.gmra.mxu1 %v9804_v19  ;;  %v6914_v8 = vld [vmem:[%s12619_s12 + $0x6c0] sm:$0xf] }
 0x276   : > { %2758 = vmatpush.bf16.msra.mxu2 %v6555_v47  ;;  %2766 = vmatpush.bf16.msra.mxu1 %v6659_v32  ;;  %v6616_v47 = vld [vmem:[%s12619_s12 + $0x538] sm:$0xf0]  ;;  %v7035_v32 = vor.u32 %v8312_v62, %v7034_v28  ;;  %v6915_v13 = vor.u32 %v8282_v24, %v6914_v8  ;;  %v8264_v28 = vld [vmem:[%s12619_s12 + $0x634] sm:$0xf0]  ;;  %v7010_v62 = vld [vmem:[%s12619_s12 + $0x780] sm:$0xf] }
 0x278   : > { %3437 = vmatpush.bf16.msrb.mxu3 %v7067_v63  ;;  %v6619_v63 = vor.u32 %v8231_v22, %v6616_v47  ;;  %v6868_v22 = vld [vmem:[%s12619_s12 + $0x668] sm:$0xf0]  ;;  %v6843_v47 = vor.u32 %v8264_v28, %v6842_v40  ;;  %v8346_v28 = vld [vmem:[%s12619_s12 + $0x8c4] sm:$0xf0] }
 0x279   : > { %3410 = vmatpush.bf16.msra.mxu0 %v6947_v15  ;;  %v8280_v15 = vld [vmem:[%s12619_s12 + $0x6b4] sm:$0xf0] }
 0x27a   : > { %2759 = vmatpush.bf16.msra.mxu2 %v6547_v1  ;;  %2767 = vmatpush.bf16.msra.mxu1 %v6651_v54  ;;  %v6867_v54 = vor.u32 %v8270_v52, %v6866_v6  ;;  %v6907_v33 = vor.u32 %v8280_v15, %v6906_v49  ;;  %v7194_v6 = vld [vmem:[%s12619_s12 + $0x8f0] sm:$0xf]  ;;  %v8352_v52 = vld [vmem:[%s12619_s12 + $0x8f4] sm:$0xf0] }
 0x27b   : > { %v8304_v49 = vld [vmem:[%s12619_s12 + $0x774] sm:$0xf0] }
 0x27c   : > { %3438 = vmatpush.bf16.msrb.mxu3 %v7059_v57  ;;  %v6895_v57 = vor.u32 %v8275_v48, %v6892_v26  ;;  %v7146_v48 = vld [vmem:[%s12619_s12 + $0x890] sm:$0xf]  ;;  %v8340_v26 = vld [vmem:[%s12619_s12 + $0x894] sm:$0xf0] }
 0x27d   : > { %3411 = vmatpush.bf16.msra.mxu0 %v6939_v14  ;;  %v8273_v14 = vld [vmem:[%s12619_s12 + $0x684] sm:$0xf] }
 0x27e   : > { %2760 = vmatpush.bf16.msra.mxu2 %v6539_v11  ;;  %2768 = vmatpush.bf16.msra.mxu1 %v6643_v0  ;;  %v1913_v1 = vpop.f32.mrf.mxu3  ;;  %v7210_v11 = vld [vmem:[%s12619_s12 + $0x910] sm:$0xf]  ;;  %v8356_v0 = vld [vmem:[%s12619_s12 + $0x914] sm:$0xf0]  ;;  %v6887_v50 = vor.u32 %v8273_v14, %v6884_v34  ;;  %v6994_v14 = vld [vmem:[%s12619_s12 + $0x760] sm:$0xf]  ;;  %v6863_v34 = vor.u32 %v8267_v37, %v6860_v16 }
 0x27f   : > { %v7114_v37 = vld [vmem:[%s12619_s12 + $0x850] sm:$0xf]  ;;  %v8332_v16 = vld [vmem:[%s12619_s12 + $0x854] sm:$0xf0] }
 0x280   : > { %3439 = vmatpush.bf16.msrb.mxu3 %v7051_v9  ;;  %6733 = vmatmul.msk.bf16.vlgmr.msrb.gmra.mxu0 %vm1848_vm1, %v10240_v55  ;;  %v7018_v9 = vld [vmem:[%s12619_s12 + $0x790] sm:$0xf] }
 0x281   : > { %3412 = vmatpush.bf16.msra.mxu0 %v6931_v60  ;;  %2761 = vmatmul.bf16.vlgmr.msra.gmra.mxu2 %v10150_v59  ;;  %v6899_v60 = vor.u32 %v8278_v17, %v6898_v2  ;;  %v8350_v2 = vld [vmem:[%s12619_s12 + $0x8e4] sm:$0xf0]  ;;  %v7147_v17 = vor.u32 %v8340_v26, %v7146_v48  ;;  %v6970_v48 = vld [vmem:[%s12619_s12 + $0x730] sm:$0xf]  ;;  %v8296_v26 = vld [vmem:[%s12619_s12 + $0x734] sm:$0xf0] }
 0x282   : > { %3396 = vmatpush.bf16.msrb.mxu2 %v6891_v42  ;;  %2769 = vmatpush.bf16.msra.mxu1 %v6635_v12  ;;  %v6600_v42 = vld [vmem:[%s12619_s12 + $0x518] sm:$0xf0]  ;;  %v7211_v12 = vor.u32 %v8356_v0, %v7210_v11  ;;  %v7138_v11 = vld [vmem:[%s12619_s12 + $0x880] sm:$0xf]  ;;  %v8338_v0 = vld [vmem:[%s12619_s12 + $0x884] sm:$0xf0] }
 0x283   : > { %v6603_v21 = vor.u32 %v8227_v29, %v6600_v42  ;;  %v8265_v29 = vld [vmem:[%s12619_s12 + $0x644] sm:$0xf]  ;;  %v6852_v42 = vld [vmem:[%s12619_s12 + $0x648] sm:$0xf0] }
 0x284   : > { %3440 = vmatpush.bf16.msrb.mxu3 %v7043_v18  ;;  %v1900_v3 = vpop.f32.mrf.mxu2  ;;  %v7019_v18 = vor.u32 %v8308_v51, %v7018_v9  ;;  %v7178_v9 = vld [vmem:[%s12619_s12 + $0x8d0] sm:$0xf]  ;;  %v8348_v51 = vld [vmem:[%s12619_s12 + $0x8d4] sm:$0xf0] }
 0x285   : > { %3413 = vmatpush.bf16.msra.mxu0 %v6923_v35  ;;  %v1901_v41 = vadd.f32 %v1900_v3, %v10732_v56  ;;  %v7202_v56 = vld [vmem:[%s12619_s12 + $0x900] sm:$0xf] }
 0x286   : > { %3397 = vmatpush.bf16.msrb.mxu2 %v6883_v44  ;;  %2770 = vmatpush.bf16.msra.mxu1 %v6627_v46  ;;  %v6876_v44 = vld [vmem:[%s12619_s12 + $0x678] sm:$0xf0]  ;;  %v1915_v5 = vpop.f32.mrf.mxu3  ;;  %v8306_v46 = vld [vmem:[%s12619_s12 + $0x784] sm:$0xf0]  ;;  %v7203_v24 = vor.u32 %v8354_v58, %v7202_v56 }
 0x287   : > { %v1914_v35 = vadd.f32 %v1913_v1, %v1901_v41  ;;  %v6879_v8 = vor.u32 %v8271_v25, %v6876_v44  ;;  %v8300_v41 = vld [vmem:[%s12619_s12 + $0x754] sm:$0xf0]  ;;  %v7130_v25 = vld [vmem:[%s12619_s12 + $0x870] sm:$0xf]  ;;  %v6844_v56 = vld [vmem:[%s12619_s12 + $0x638] sm:$0xf0] }
 0x288   : > { %3441 = vmatpush.bf16.msrb.mxu3 %v7035_v32  ;;  %v7011_v32 = vor.u32 %v8306_v46, %v7010_v62  ;;  %v8336_v44 = vld [vmem:[%s12619_s12 + $0x874] sm:$0xf0]  ;;  %v6978_v46 = vld [vmem:[%s12619_s12 + $0x740] sm:$0xf] }
 0x289   : > { %3414 = vmatpush.bf16.msra.mxu0 %v6915_v13  ;;  %v6834_v13 = vld [vmem:[%s12619_s12 + $0x620] sm:$0xf]  ;;  %v7131_v62 = vor.u32 %v8336_v44, %v7130_v25  ;;  %v8335_v44 = vld [vmem:[%s12619_s12 + $0x874] sm:$0xf] }
 0x28a   : > { %3398 = vmatpush.bf16.msrb.mxu2 %v6875_v4  ;;  %2771 = vmatpush.bf16.msra.mxu1 %v6619_v63  ;;  %v8269_v4 = vld [vmem:[%s12619_s12 + $0x664] sm:$0xf]  ;;  %v6835_v61 = vor.u32 %v8262_v53, %v6834_v13 }
 0x28b   : > { %v6871_v15 = vor.u32 %v8269_v4, %v6868_v22  ;;  %v7122_v4 = vld [vmem:[%s12619_s12 + $0x860] sm:$0xf]  ;;  %v8334_v22 = vld [vmem:[%s12619_s12 + $0x864] sm:$0xf0] }
 0x28c   : > { %3442 = vmatpush.bf16.msrb.mxu3 %v7027_v30  ;;  %v1902_v63 = vpop.f32.mrf.mxu2 }
 0x28d   : > { %3415 = vmatpush.bf16.msra.mxu0 %v6907_v33  ;;  %v1926_v1 = vpop.f32.mrf.mxu0  ;;  %v7003_v33 = vor.u32 %v8304_v49, %v7002_v7  ;;  %v8344_v7 = vld [vmem:[%s12619_s12 + $0x8b4] sm:$0xf0]  ;;  %v8339_v49 = vld [vmem:[%s12619_s12 + $0x894] sm:$0xf]  ;;  %v7148_v63 = vld [vmem:[%s12619_s12 + $0x898] sm:$0xf0] }
 0x28e   : > { %3399 = vmatpush.bf16.msrb.mxu2 %v6867_v54  ;;  %2772 = vmatpush.bf16.msra.mxu1 %v6611_v43  ;;  %v7195_v54 = vor.u32 %v8352_v52, %v7194_v6  ;;  %v1927_v30 = vadd.f32 %v1926_v1, %v1914_v35  ;;  %v11087_v38 = vpop.f32.mrf.mxu3  ;;  %v8302_v43 = vld [vmem:[%s12619_s12 + $0x764] sm:$0xf0]  ;;  %v7170_v35 = vld [vmem:[%s12619_s12 + $0x8c0] sm:$0xf]  ;;  %v6836_v6 = vld [vmem:[%s12619_s12 + $0x628] sm:$0xf0] }
 0x28f   : > { %3443 = vmatmul.bf16.vlgmr.msrb.gmra.mxu3 %v10150_v59  ;;  %v6995_v36 = vor.u32 %v8302_v43, %v6994_v14  ;;  %v7162_v52 = vld [vmem:[%s12619_s12 + $0x8b0] sm:$0xf]  ;;  %v6971_v43 = vor.u32 %v8296_v26, %v6970_v48  ;;  %v8326_v48 = vld [vmem:[%s12619_s12 + $0x824] sm:$0xf0] }
 0x290   : > { %3487 = vmatpush.bf16.msra.mxu3 %v6895_v57  ;;  %v7186_v57 = vld [vmem:[%s12619_s12 + $0x8e0] sm:$0xf] }
 0x291   : > { %3416 = vmatpush.bf16.msra.mxu0 %v6899_v60  ;;  %v7139_v60 = vor.u32 %v8338_v0, %v7138_v11  ;;  %v8323_v11 = vld [vmem:[%s12619_s12 + $0x814] sm:$0xf]  ;;  %v7084_v0 = vld [vmem:[%s12619_s12 + $0x818] sm:$0xf0] }
 0x292   : > { %3400 = vmatpush.bf16.msrb.mxu2 %v6859_v39  ;;  %2773 = vmatpush.bf16.msra.mxu1 %v6603_v21  ;;  %v7187_v39 = vor.u32 %v8350_v2, %v7186_v57  ;;  %v1939_v27 = vpop.f32.mrf.mxu1  ;;  %v6855_v21 = vor.u32 %v8265_v29, %v6852_v42  ;;  %v7154_v57 = vld [vmem:[%s12619_s12 + $0x8a0] sm:$0xf]  ;;  %v8342_v2 = vld [vmem:[%s12619_s12 + $0x8a4] sm:$0xf0] }
 0x293   : > { %v11119_v3 = vadd.f32 %v1939_v27, %v1927_v30  ;;  %v6962_v29 = vld [vmem:[%s12619_s12 + $0x720] sm:$0xf]  ;;  %v8294_v42 = vld [vmem:[%s12619_s12 + $0x724] sm:$0xf0] }
 0x294   : > { %3488 = vmatpush.bf16.msra.mxu3 %v6887_v50  ;;  %3417 = vmatmul.bf16.vlgmr.msra.gmra.mxu0 %v9979_v20  ;;  %v6986_v50 = vld [vmem:[%s12619_s12 + $0x750] sm:$0xf]  ;;  %v7106_v27 = vld [vmem:[%s12619_s12 + $0x840] sm:$0xf]  ;;  %v6963_v25 = vor.u32 %v8294_v42, %v6962_v29 }
 0x295   : > { %3461 = vmatpush.bf16.msrb.mxu0 %v7211_v12  ;;  %2774 = vmatmul.bf16.vlgmr.msra.gmra.mxu1 %v10136_v23  ;;  %v11127_v12 = vpop.f32.mrf.mxu2  ;;  %v1928_v5 = vpop.f32.mrf.mxu0  ;;  %v6987_v40 = vor.u32 %v8300_v41, %v6986_v50 }
 0x296   : > { %3401 = vmatpush.bf16.msrb.mxu2 %v6851_v31  ;;  %3422 = vmatpush.bf16.msrb.mxu1 %v7019_v18  ;;  %v7179_v31 = vor.u32 %v8348_v51, %v7178_v9  ;;  %v8263_v18 = vld [vmem:[%s12619_s12 + $0x634] sm:$0xf]  ;;  %v1980_v58 = vpop.f32.mrf.mxu3  ;;  %v7218_v9 = vld [vmem:[%s12619_s12 + $0x920] sm:$0xf]  ;;  %v8358_v51 = vld [vmem:[%s12619_s12 + $0x924] sm:$0xf0] }
 0x297   : > { %v7132_v5 = vld [vmem:[%s12619_s12 + $0x878] sm:$0xf0]  ;;  %v7219_v58 = vor.u32 %v8358_v51, %v7218_v9 }
 0x298   : > { %3489 = vmatpush.bf16.msra.mxu3 %v6879_v8  ;;  %v8298_v8 = vld [vmem:[%s12619_s12 + $0x744] sm:$0xf0] }
 0x299   : > { %3462 = vmatpush.bf16.msrb.mxu0 %v7203_v24  ;;  %v6847_v24 = vor.u32 %v8263_v18, %v6844_v56  ;;  %v6979_v53 = vor.u32 %v8298_v8, %v6978_v46  ;;  %v8328_v46 = vld [vmem:[%s12619_s12 + $0x834] sm:$0xf0] }
 0x29a   : > { %3402 = vmatpush.bf16.msrb.mxu2 %v6843_v47  ;;  %3423 = vmatpush.bf16.msrb.mxu1 %v7011_v32  ;;  %v7171_v47 = vor.u32 %v8346_v28, %v7170_v35  ;;  %v8261_v32 = vld [vmem:[%s12619_s12 + $0x624] sm:$0xf]  ;;  %v1941_v13 = vpop.f32.mrf.mxu1  ;;  %v8291_v35 = vld [vmem:[%s12619_s12 + $0x714] sm:$0xf]  ;;  %v6956_v28 = vld [vmem:[%s12619_s12 + $0x718] sm:$0xf0] }
 0x29c   : > { %3490 = vmatpush.bf16.msra.mxu3 %v6871_v15  ;;  %v7123_v15 = vor.u32 %v8334_v22, %v7122_v4  ;;  %v7135_v4 = vor.u32 %v8335_v44, %v7132_v5  ;;  %v8285_v5 = vld [vmem:[%s12619_s12 + $0x6e4] sm:$0xf] }
 0x29d   : > { %3463 = vmatpush.bf16.msrb.mxu0 %v7195_v54  ;;  %v1954_v1 = vpop.f32.mrf.mxu2  ;;  %v6839_v54 = vor.u32 %v8261_v32, %v6836_v6  ;;  %v1991_v30 = vpop.f32.mrf.mxu0  ;;  %v6959_v32 = vor.u32 %v8291_v35, %v6956_v28  ;;  %v8333_v6 = vld [vmem:[%s12619_s12 + $0x864] sm:$0xf]  ;;  %v8327_v28 = vld [vmem:[%s12619_s12 + $0x834] sm:$0xf] }
 0x29e   : > { %3403 = vmatpush.bf16.msrb.mxu2 %v6835_v61  ;;  %3424 = vmatpush.bf16.msrb.mxu1 %v7003_v33  ;;  %v7163_v61 = vor.u32 %v8344_v7, %v7162_v52  ;;  %v7151_v33 = vor.u32 %v8339_v49, %v7148_v63  ;;  %v11199_v14 = vpop.f32.mrf.mxu3  ;;  %v7124_v52 = vld [vmem:[%s12619_s12 + $0x868] sm:$0xf0]  ;;  %v7068_v7 = vld [vmem:[%s12619_s12 + $0x7f8] sm:$0xf0]  ;;  %v8289_v49 = vld [vmem:[%s12619_s12 + $0x704] sm:$0xf] }
 0x29f   : > { %v6948_v63 = vld [vmem:[%s12619_s12 + $0x708] sm:$0xf0]  ;;  %v7127_v1 = vor.u32 %v8333_v6, %v7124_v52 }
 0x2a0   : > { %3491 = vmatpush.bf16.msra.mxu3 %v6863_v34  ;;  %v7140_v34 = vld [vmem:[%s12619_s12 + $0x888] sm:$0xf0] }
 0x2a1   : > { %3464 = vmatpush.bf16.msrb.mxu0 %v7187_v39  ;;  %3404 = vmatmul.bf16.vlgmr.msrb.gmra.mxu2 %v9804_v19  ;;  %v7115_v39 = vor.u32 %v8332_v16, %v7114_v37  ;;  %v7020_v37 = vld [vmem:[%s12619_s12 + $0x798] sm:$0xf0] }
 0x2a2   : > { %3448 = vmatpush.bf16.msra.mxu2 %v7147_v17  ;;  %3425 = vmatpush.bf16.msrb.mxu1 %v6995_v36  ;;  %v8337_v17 = vld [vmem:[%s12619_s12 + $0x884] sm:$0xf]  ;;  %v8330_v36 = vld [vmem:[%s12619_s12 + $0x844] sm:$0xf0]  ;;  %v1965_v41 = vpop.f32.mrf.mxu1 }
 0x2a3   : > { %v7143_v50 = vor.u32 %v8337_v17, %v7140_v34  ;;  %v1966_v18 = vadd.f32 %v1965_v41, %v11127_v12  ;;  %v7107_v56 = vor.u32 %v8330_v36, %v7106_v27  ;;  %v7098_v12 = vld [vmem:[%s12619_s12 + $0x830] sm:$0xf]  ;;  %v8317_v17 = vld [vmem:[%s12619_s12 + $0x7e4] sm:$0xf]  ;;  %v7012_v36 = vld [vmem:[%s12619_s12 + $0x788] sm:$0xf0] }
 0x2a4   : > { %3492 = vmatpush.bf16.msra.mxu3 %v6855_v21  ;;  %v7087_v21 = vor.u32 %v8323_v11, %v7084_v0  ;;  %v8287_v0 = vld [vmem:[%s12619_s12 + $0x6f4] sm:$0xf]  ;;  %v8305_v27 = vld [vmem:[%s12619_s12 + $0x784] sm:$0xf] }
 0x2a5   : > { %3465 = vmatpush.bf16.msrb.mxu0 %v7179_v31  ;;  %v8321_v31 = vld [vmem:[%s12619_s12 + $0x804] sm:$0xf]  ;;  %v1979_v8 = vadd.f32 %v11087_v38, %v1966_v18  ;;  %v8319_v38 = vld [vmem:[%s12619_s12 + $0x7f4] sm:$0xf]  ;;  %v7015_v44 = vor.u32 %v8305_v27, %v7012_v36  ;;  %v6908_v36 = vld [vmem:[%s12619_s12 + $0x6b8] sm:$0xf0] }
 0x2a6   : > { %3449 = vmatpush.bf16.msra.mxu2 %v7139_v60  ;;  %3426 = vmatpush.bf16.msrb.mxu1 %v6987_v40  ;;  %v7155_v60 = vor.u32 %v8342_v2, %v7154_v57  ;;  %v7076_v40 = vld [vmem:[%s12619_s12 + $0x808] sm:$0xf0]  ;;  %v2032_v22 = vpop.f32.mrf.mxu3  ;;  %v7116_v57 = vld [vmem:[%s12619_s12 + $0x858] sm:$0xf0] }
 0x2a7   : > { %v1992_v13 = vadd.f32 %v1991_v30, %v1979_v8  ;;  %v7071_v30 = vor.u32 %v8319_v38, %v7068_v7  ;;  %v8313_v8 = vld [vmem:[%s12619_s12 + $0x7c4] sm:$0xf]  ;;  %v8283_v22 = vld [vmem:[%s12619_s12 + $0x6d4] sm:$0xf] }
 0x2a8   : > { %3493 = vmatpush.bf16.msra.mxu3 %v6847_v24  ;;  %v1993_v24 = vpop.f32.mrf.mxu0  ;;  %v8301_v38 = vld [vmem:[%s12619_s12 + $0x764] sm:$0xf] }
 0x2a9   : > { %3466 = vmatpush.bf16.msrb.mxu0 %v7171_v47  ;;  %v7079_v47 = vor.u32 %v8321_v31, %v7076_v40  ;;  %v6932_v31 = vld [vmem:[%s12619_s12 + $0x6e8] sm:$0xf0] }
 0x2aa   : > { %3450 = vmatpush.bf16.msra.mxu2 %v7131_v62  ;;  %3427 = vmatpush.bf16.msrb.mxu1 %v6979_v53  ;;  %v2004_v62 = vpop.f32.mrf.mxu2  ;;  %v7099_v53 = vor.u32 %v8328_v46, %v7098_v12  ;;  %v1967_v16 = vpop.f32.mrf.mxu1  ;;  %v6935_v46 = vor.u32 %v8285_v5, %v6932_v31  ;;  %v7044_v24 = vld [vmem:[%s12619_s12 + $0x7c8] sm:$0xf0] }
 0x2ab   : > { %v2005_v26 = vadd.f32 %v2004_v62, %v1992_v13  ;;  %v7100_v62 = vld [vmem:[%s12619_s12 + $0x838] sm:$0xf0]  ;;  %v6996_v13 = vld [vmem:[%s12619_s12 + $0x768] sm:$0xf0]  ;;  %v7047_v7 = vor.u32 %v8313_v8, %v7044_v24  ;;  %v8295_v24 = vld [vmem:[%s12619_s12 + $0x734] sm:$0xf] }
 0x2ac   : > { %3494 = vmatpush.bf16.msra.mxu3 %v6839_v54  ;;  %v8307_v54 = vld [vmem:[%s12619_s12 + $0x794] sm:$0xf]  ;;  %v7103_v52 = vor.u32 %v8327_v28, %v7100_v62  ;;  %v6916_v16 = vld [vmem:[%s12619_s12 + $0x6c8] sm:$0xf0]  ;;  %v7374_v28 = vld [vmem:[%s12619_s12 + $0x990] sm:$0xf] }
 0x2ad   : > { %3467 = vmatpush.bf16.msrb.mxu0 %v7163_v61  ;;  %v6951_v61 = vor.u32 %v8289_v49, %v6948_v63  ;;  %v7023_v11 = vor.u32 %v8307_v54, %v7020_v37  ;;  %v8325_v49 = vld [vmem:[%s12619_s12 + $0x824] sm:$0xf]  ;;  %v8311_v63 = vld [vmem:[%s12619_s12 + $0x7b4] sm:$0xf]  ;;  %v6999_v54 = vor.u32 %v8301_v38, %v6996_v13  ;;  %v8372_v62 = vld [vmem:[%s12619_s12 + $0x994] sm:$0xf0] }
 0x2ae   : > { %3451 = vmatpush.bf16.msra.mxu2 %v7123_v15  ;;  %3428 = vmatpush.bf16.msrb.mxu1 %v6971_v43  ;;  %v7090_v15 = vld [vmem:[%s12619_s12 + $0x820] sm:$0xf]  ;;  %v7060_v43 = vld [vmem:[%s12619_s12 + $0x7e8] sm:$0xf0]  ;;  %v11313_v9 = vpop.f32.mrf.mxu3  ;;  %v8281_v37 = vld [vmem:[%s12619_s12 + $0x6c4] sm:$0xf] }
 0x2af   : > { %3495 = vmatmul.bf16.vlgmr.msra.gmra.mxu3 %v9804_v19  ;;  %v7091_v2 = vor.u32 %v8326_v48, %v7090_v15  ;;  %v7063_v51 = vor.u32 %v8317_v17, %v7060_v43  ;;  %v7036_v48 = vld [vmem:[%s12619_s12 + $0x7b8] sm:$0xf0]  ;;  %v8309_v43 = vld [vmem:[%s12619_s12 + $0x7a4] sm:$0xf]  ;;  %v7486_v38 = vld [vmem:[%s12619_s12 + $0xa70] sm:$0xf] }
 0x2b0   : > { %3539 = vmatpush.bf16.msrb.mxu3 %v7151_v33  ;;  %v8331_v33 = vld [vmem:[%s12619_s12 + $0x854] sm:$0xf]  ;;  %v11305_v29 = vpop.f32.mrf.mxu0  ;;  %v7212_v8 = vld [vmem:[%s12619_s12 + $0x918] sm:$0xf0]  ;;  %v8400_v13 = vld [vmem:[%s12619_s12 + $0xa74] sm:$0xf0] }
 0x2b1   : > { %3468 = vmatpush.bf16.msrb.mxu0 %v7155_v60  ;;  %v7119_v42 = vor.u32 %v8331_v33, %v7116_v57  ;;  %v8329_v60 = vld [vmem:[%s12619_s12 + $0x844] sm:$0xf]  ;;  %v6988_v33 = vld [vmem:[%s12619_s12 + $0x758] sm:$0xf0] }
 0x2b2   : > { %3452 = vmatpush.bf16.msra.mxu2 %v7115_v39  ;;  %3429 = vmatpush.bf16.msrb.mxu1 %v6963_v25  ;;  %v2006_v34 = vpop.f32.mrf.mxu2  ;;  %v6940_v39 = vld [vmem:[%s12619_s12 + $0x6f8] sm:$0xf0]  ;;  %v2017_v40 = vpop.f32.mrf.mxu1 }
 0x2b3   : > { %v6943_v41 = vor.u32 %v8287_v0, %v6940_v39  ;;  %v7052_v25 = vld [vmem:[%s12619_s12 + $0x7d8] sm:$0xf0]  ;;  %v2018_v12 = vadd.f32 %v2017_v40, %v2005_v26  ;;  %v7510_v26 = vld [vmem:[%s12619_s12 + $0xaa0] sm:$0xf]  ;;  %v7028_v34 = vld [vmem:[%s12619_s12 + $0x7a8] sm:$0xf0] }
 0x2b4   : > { %3540 = vmatpush.bf16.msrb.mxu3 %v7143_v50  ;;  %3469 = vmatmul.bf16.vlgmr.msrb.gmra.mxu0 %v10202_v45  ;;  %v7108_v50 = vld [vmem:[%s12619_s12 + $0x848] sm:$0xf0]  ;;  %v7502_v0 = vld [vmem:[%s12619_s12 + $0xa90] sm:$0xf]  ;;  %v8404_v39 = vld [vmem:[%s12619_s12 + $0xa94] sm:$0xf0] }
 0x2b5   : > { %3526 = vmatpush.bf16.msra.mxu0 %v7087_v21  ;;  %3430 = vmatmul.bf16.vlgmr.msrb.gmra.mxu1 %v9990_v10  ;;  %v8315_v21 = vld [vmem:[%s12619_s12 + $0x7d4] sm:$0xf]  ;;  %v7111_v18 = vor.u32 %v8329_v60, %v7108_v50  ;;  %v8374_v60 = vld [vmem:[%s12619_s12 + $0x9a4] sm:$0xf0]  ;;  %v8297_v50 = vld [vmem:[%s12619_s12 + $0x744] sm:$0xf] }
 0x2b6   : > { %3453 = vmatpush.bf16.msra.mxu2 %v7107_v56  ;;  %3481 = vmatpush.bf16.msra.mxu1 %v7219_v58  ;;  %v8303_v56 = vld [vmem:[%s12619_s12 + $0x774] sm:$0xf]  ;;  %v7004_v58 = vld [vmem:[%s12619_s12 + $0x778] sm:$0xf0]  ;;  %v7055_v35 = vor.u32 %v8315_v21, %v7052_v25  ;;  %v7031_v21 = vor.u32 %v8309_v43, %v7028_v34  ;;  %v7503_v25 = vor.u32 %v8404_v39, %v7502_v0  ;;  %v6900_v40 = vld [vmem:[%s12619_s12 + $0x6a8] sm:$0xf0] }
 0x2b7   : > { %v8351_v43 = vld [vmem:[%s12619_s12 + $0x8f4] sm:$0xf]  ;;  %v7446_v39 = vld [vmem:[%s12619_s12 + $0xa20] sm:$0xf] }
 0x2b8   : > { %3541 = vmatpush.bf16.msrb.mxu3 %v7135_v4  ;;  %v7007_v4 = vor.u32 %v8303_v56, %v7004_v58  ;;  %v2634_v6 = vpop.f32.mrf.mxu0  ;;  %v8402_v56 = vld [vmem:[%s12619_s12 + $0xa84] sm:$0xf0]  ;;  %v8277_v58 = vld [vmem:[%s12619_s12 + $0x6a4] sm:$0xf] }
 0x2b9   : > { %3527 = vmatpush.bf16.msra.mxu0 %v7079_v47  ;;  %v6924_v47 = vld [vmem:[%s12619_s12 + $0x6d8] sm:$0xf0]  ;;  %v6903_v6 = vor.u32 %v8277_v58, %v6900_v40  ;;  %v8388_v58 = vld [vmem:[%s12619_s12 + $0xa14] sm:$0xf0] }
 0x2ba   : > { %3500 = vmatpush.bf16.msrb.mxu1 %v6959_v32  ;;  %3454 = vmatpush.bf16.msra.mxu2 %v7099_v53  ;;  %v11359_v32 = vadd.f32 %v11199_v14, %v2018_v12  ;;  %v2660_v53 = vpop.f32.mrf.mxu3  ;;  %v7092_v14 = vld [vmem:[%s12619_s12 + $0x828] sm:$0xf0]  ;;  %v6927_v15 = vor.u32 %v8283_v22, %v6924_v47  ;;  %v2019_v57 = vpop.f32.mrf.mxu1  ;;  %v8355_v12 = vld [vmem:[%s12619_s12 + $0x914] sm:$0xf] }
 0x2bb   : > { %v7215_v53 = vor.u32 %v8355_v12, %v7212_v8  ;;  %v7462_v12 = vld [vmem:[%s12619_s12 + $0xa40] sm:$0xf] }
 0x2bc   : > { %3542 = vmatpush.bf16.msrb.mxu3 %v7127_v1  ;;  %v8406_v1 = vld [vmem:[%s12619_s12 + $0xaa4] sm:$0xf0] }
 0x2bd   : > { %3528 = vmatpush.bf16.msra.mxu0 %v7071_v30  ;;  %v7095_v30 = vor.u32 %v8325_v49, %v7092_v14  ;;  %v7511_v17 = vor.u32 %v8406_v1, %v7510_v26  ;;  %v8370_v49 = vld [vmem:[%s12619_s12 + $0x984] sm:$0xf0]  ;;  %v8353_v14 = vld [vmem:[%s12619_s12 + $0x904] sm:$0xf]  ;;  %v6964_v26 = vld [vmem:[%s12619_s12 + $0x728] sm:$0xf0]  ;;  %v7487_v1 = vor.u32 %v8400_v13, %v7486_v38 }
 0x2be   : > { %3501 = vmatpush.bf16.msrb.mxu1 %v6951_v61  ;;  %3455 = vmatpush.bf16.msra.mxu2 %v7091_v2  ;;  %v8299_v61 = vld [vmem:[%s12619_s12 + $0x754] sm:$0xf]  ;;  %v7039_v2 = vor.u32 %v8311_v63, %v7036_v48  ;;  %v8293_v48 = vld [vmem:[%s12619_s12 + $0x724] sm:$0xf]  ;;  %v7430_v38 = vld [vmem:[%s12619_s12 + $0xa00] sm:$0xf] }
 0x2bf   : > { %v6991_v27 = vor.u32 %v8299_v61, %v6988_v33  ;;  %v8398_v61 = vld [vmem:[%s12619_s12 + $0xa64] sm:$0xf0]  ;;  %v6967_v57 = vor.u32 %v8293_v48, %v6964_v26 }
 0x2c0   : > { %3543 = vmatpush.bf16.msrb.mxu3 %v7119_v42  ;;  %v8279_v42 = vld [vmem:[%s12619_s12 + $0x6b4] sm:$0xf]  ;;  %v8386_v13 = vld [vmem:[%s12619_s12 + $0xa04] sm:$0xf0] }
 0x2c1   : > { %3529 = vmatpush.bf16.msra.mxu0 %v7063_v51  ;;  %3456 = vmatmul.bf16.vlgmr.msra.gmra.mxu2 %v10136_v23  ;;  %v7382_v51 = vld [vmem:[%s12619_s12 + $0x9a0] sm:$0xf]  ;;  %v6911_v31 = vor.u32 %v8279_v42, %v6908_v36  ;;  %v8390_v42 = vld [vmem:[%s12619_s12 + $0xa24] sm:$0xf0] }
 0x2c2   : > { %3513 = vmatpush.bf16.msrb.mxu2 %v7023_v11  ;;  %3502 = vmatpush.bf16.msrb.mxu1 %v6943_v41  ;;  %v6919_v11 = vor.u32 %v8281_v37, %v6916_v16  ;;  %v6980_v41 = vld [vmem:[%s12619_s12 + $0x748] sm:$0xf0]  ;;  %v11432_v5 = vpop.f32.mrf.mxu3  ;;  %v8362_v48 = vld [vmem:[%s12619_s12 + $0x944] sm:$0xf0] }
 0x2c4   : > { %3544 = vmatpush.bf16.msrb.mxu3 %v7111_v18  ;;  %v7383_v18 = vor.u32 %v8374_v60, %v7382_v51  ;;  %v7470_v60 = vld [vmem:[%s12619_s12 + $0xa50] sm:$0xf] }
 0x2c5   : > { %3530 = vmatpush.bf16.msra.mxu0 %v7055_v35  ;;  %7224 = vmatmul.msk.bf16.vlgmr.msra.gmra.mxu1 %vm1848_vm1, %v10240_v55  ;;  %v6983_v35 = vor.u32 %v8297_v50, %v6980_v41  ;;  %v8396_v50 = vld [vmem:[%s12619_s12 + $0xa54] sm:$0xf0] }
 0x2c6   : > { %3514 = vmatpush.bf16.msrb.mxu2 %v7015_v44  ;;  %3503 = vmatpush.bf16.msrb.mxu1 %v6935_v46  ;;  %v7494_v44 = vld [vmem:[%s12619_s12 + $0xa80] sm:$0xf]  ;;  %v2645_v46 = vpop.f32.mrf.mxu2  ;;  %v7471_v40 = vor.u32 %v8396_v50, %v7470_v60  ;;  %v8438_v50 = vld [vmem:[%s12619_s12 + $0xba4] sm:$0xf0] }
 0x2c7   : > { %v2646_v22 = vadd.f32 %v2645_v46, %v11305_v29  ;;  %v7495_v47 = vor.u32 %v8402_v56, %v7494_v44  ;;  %v7366_v29 = vld [vmem:[%s12619_s12 + $0x980] sm:$0xf]  ;;  %v8366_v44 = vld [vmem:[%s12619_s12 + $0x964] sm:$0xf0]  ;;  %v7438_v56 = vld [vmem:[%s12619_s12 + $0xa10] sm:$0xf] }
 0x2c8   : > { %3545 = vmatpush.bf16.msrb.mxu3 %v7103_v52  ;;  %v7375_v52 = vor.u32 %v8372_v62, %v7374_v28  ;;  %v7367_v16 = vor.u32 %v8370_v49, %v7366_v29  ;;  %v8394_v46 = vld [vmem:[%s12619_s12 + $0xa44] sm:$0xf0]  ;;  %v7454_v29 = vld [vmem:[%s12619_s12 + $0xa30] sm:$0xf]  ;;  %v7638_v60 = vld [vmem:[%s12619_s12 + $0xba0] sm:$0xf] }
 0x2c9   : > { %3531 = vmatpush.bf16.msra.mxu0 %v7047_v7  ;;  %v2659_v63 = vadd.f32 %v11313_v9, %v2646_v22  ;;  %v8357_v9 = vld [vmem:[%s12619_s12 + $0x924] sm:$0xf]  ;;  %v7342_v22 = vld [vmem:[%s12619_s12 + $0x950] sm:$0xf] }
 0x2ca   : > { %3515 = vmatpush.bf16.msrb.mxu2 %v7007_v4  ;;  %3504 = vmatpush.bf16.msrb.mxu1 %v6927_v15  ;;  %v6972_v4 = vld [vmem:[%s12619_s12 + $0x738] sm:$0xf0]  ;;  %v7204_v15 = vld [vmem:[%s12619_s12 + $0x908] sm:$0xf0]  ;;  %v2712_v37 = vpop.f32.mrf.mxu3 }
 0x2cb   : > { %v6975_v7 = vor.u32 %v8295_v24, %v6972_v4  ;;  %v7207_v33 = vor.u32 %v8353_v14, %v7204_v15  ;;  %v7439_v4 = vor.u32 %v8388_v58, %v7438_v56  ;;  %v7334_v15 = vld [vmem:[%s12619_s12 + $0x940] sm:$0xf]  ;;  %v8456_v37 = vld [vmem:[%s12619_s12 + $0xc34] sm:$0xf0]  ;;  %v7639_v58 = vor.u32 %v8438_v50, %v7638_v60  ;;  %v8381_v60 = vld [vmem:[%s12619_s12 + $0x9e4] sm:$0xf] }
 0x2cc   : > { %3546 = vmatpush.bf16.msrb.mxu3 %v7095_v30  ;;  %v7478_v30 = vld [vmem:[%s12619_s12 + $0xa60] sm:$0xf]  ;;  %v7416_v50 = vld [vmem:[%s12619_s12 + $0x9e8] sm:$0xf0] }
 0x2cd   : > { %3532 = vmatpush.bf16.msra.mxu0 %v7039_v2  ;;  %v7358_v2 = vld [vmem:[%s12619_s12 + $0x970] sm:$0xf]  ;;  %v7479_v36 = vor.u32 %v8398_v61, %v7478_v30  ;;  %v8384_v61 = vld [vmem:[%s12619_s12 + $0x9f4] sm:$0xf0] }
 0x2ce   : > { %3516 = vmatpush.bf16.msrb.mxu2 %v6999_v54  ;;  %3505 = vmatpush.bf16.msrb.mxu1 %v6919_v11  ;;  %v7220_v54 = vld [vmem:[%s12619_s12 + $0x928] sm:$0xf0]  ;;  %v2647_v34 = vpop.f32.mrf.mxu2  ;;  %v7196_v11 = vld [vmem:[%s12619_s12 + $0x8f8] sm:$0xf0]  ;;  %v7422_v30 = vld [vmem:[%s12619_s12 + $0x9f0] sm:$0xf] }
 0x2cf   : > { %3547 = vmatmul.bf16.vlgmr.msrb.gmra.mxu3 %v10136_v23  ;;  %v7223_v0 = vor.u32 %v8357_v9, %v7220_v54  ;;  %v7199_v41 = vor.u32 %v8351_v43, %v7196_v11  ;;  %v8345_v9 = vld [vmem:[%s12619_s12 + $0x8c4] sm:$0xf]  ;;  %v7710_v54 = vld [vmem:[%s12619_s12 + $0xc30] sm:$0xf]  ;;  %v7448_v11 = vld [vmem:[%s12619_s12 + $0xa28] sm:$0xf0] }
 0x2d0   : > { %4195 = vmatpush.bf16.msra.mxu3 %v7511_v17  ;;  %v8368_v17 = vld [vmem:[%s12619_s12 + $0x974] sm:$0xf0]  ;;  %v7711_v43 = vor.u32 %v8456_v37, %v7710_v54  ;;  %v8389_v34 = vld [vmem:[%s12619_s12 + $0xa24] sm:$0xf]  ;;  %v8383_v54 = vld [vmem:[%s12619_s12 + $0x9f4] sm:$0xf] }
 0x2d1   : > { %3533 = vmatpush.bf16.msra.mxu0 %v7031_v21  ;;  %v7359_v51 = vor.u32 %v8368_v17, %v7358_v2  ;;  %v7447_v21 = vor.u32 %v8390_v42, %v7446_v39  ;;  %v7335_v17 = vor.u32 %v8362_v48, %v7334_v15  ;;  %v7423_v39 = vor.u32 %v8384_v61, %v7422_v30  ;;  %v7326_v42 = vld [vmem:[%s12619_s12 + $0x930] sm:$0xf]  ;;  %v8434_v15 = vld [vmem:[%s12619_s12 + $0xb84] sm:$0xf0]  ;;  %v7398_v48 = vld [vmem:[%s12619_s12 + $0x9c0] sm:$0xf] }
 0x2d2   : > { %3517 = vmatpush.bf16.msrb.mxu2 %v6991_v27  ;;  %3506 = vmatpush.bf16.msrb.mxu1 %v6911_v31  ;;  %v2684_v27 = vpop.f32.mrf.mxu0  ;;  %v8349_v31 = vld [vmem:[%s12619_s12 + $0x8e4] sm:$0xf]  ;;  %v11544_v28 = vpop.f32.mrf.mxu3  ;;  %v7424_v37 = vld [vmem:[%s12619_s12 + $0x9f8] sm:$0xf0] }
 0x2d4   : > { %4196 = vmatpush.bf16.msra.mxu3 %v7503_v25  ;;  %3534 = vmatmul.bf16.vlgmr.msra.gmra.mxu0 %v10150_v59  ;;  %v7350_v25 = vld [vmem:[%s12619_s12 + $0x960] sm:$0xf] }
 0x2d5   : > { %4169 = vmatpush.bf16.msrb.mxu0 %v7383_v18  ;;  %v7188_v18 = vld [vmem:[%s12619_s12 + $0x8e8] sm:$0xf0]  ;;  %v7351_v62 = vor.u32 %v8366_v44, %v7350_v25  ;;  %v8382_v25 = vld [vmem:[%s12619_s12 + $0x9e4] sm:$0xf0] }
 0x2d6   : > { %3518 = vmatpush.bf16.msrb.mxu2 %v6983_v35  ;;  %3507 = vmatpush.bf16.msrb.mxu1 %v6903_v6  ;;  %v2671_v35 = vpop.f32.mrf.mxu1  ;;  %v7191_v24 = vor.u32 %v8349_v31, %v7188_v18  ;;  %v8347_v6 = vld [vmem:[%s12619_s12 + $0x8d4] sm:$0xf]  ;;  %v7440_v18 = vld [vmem:[%s12619_s12 + $0xa18] sm:$0xf0] }
 0x2d7   : > { %v2672_v8 = vadd.f32 %v2671_v35, %v2659_v63  ;;  %v8392_v63 = vld [vmem:[%s12619_s12 + $0xa34] sm:$0xf0]  ;;  %v8387_v31 = vld [vmem:[%s12619_s12 + $0xa14] sm:$0xf]  ;;  %v7156_v35 = vld [vmem:[%s12619_s12 + $0x8a8] sm:$0xf0] }
 0x2d8   : > { %4197 = vmatpush.bf16.msra.mxu3 %v7495_v47  ;;  %v8364_v47 = vld [vmem:[%s12619_s12 + $0x954] sm:$0xf0] }
 0x2d9   : > { %4170 = vmatpush.bf16.msrb.mxu0 %v7375_v52  ;;  %3508 = vmatmul.bf16.vlgmr.msrb.gmra.mxu1 %v9979_v20  ;;  %v7180_v52 = vld [vmem:[%s12619_s12 + $0x8d8] sm:$0xf0]  ;;  %v2685_v49 = vadd.f32 %v2684_v27, %v2672_v8  ;;  %v7343_v14 = vor.u32 %v8364_v47, %v7342_v22  ;;  %v8360_v27 = vld [vmem:[%s12619_s12 + $0x934] sm:$0xf0]  ;;  %v7406_v8 = vld [vmem:[%s12619_s12 + $0x9d0] sm:$0xf] }
 0x2da   : > { %3552 = vmatpush.bf16.msra.mxu1 %v7215_v53  ;;  %3519 = vmatpush.bf16.msrb.mxu2 %v6975_v7  ;;  %v2686_v53 = vpop.f32.mrf.mxu0  ;;  %v7463_v7 = vor.u32 %v8394_v46, %v7462_v12  ;;  %v7183_v26 = vor.u32 %v8347_v6, %v7180_v52  ;;  %v2738_v2 = vpop.f32.mrf.mxu3  ;;  %v7327_v44 = vor.u32 %v8360_v27, %v7326_v42  ;;  %v7630_v12 = vld [vmem:[%s12619_s12 + $0xb90] sm:$0xf]  ;;  %v8436_v46 = vld [vmem:[%s12619_s12 + $0xb94] sm:$0xf0]  ;;  %v7574_v47 = vld [vmem:[%s12619_s12 + $0xb20] sm:$0xf] }
 0x2db   : > { %v8380_v22 = vld [vmem:[%s12619_s12 + $0x9d4] sm:$0xf0]  ;;  %v8422_v6 = vld [vmem:[%s12619_s12 + $0xb24] sm:$0xf0]  ;;  %v7702_v27 = vld [vmem:[%s12619_s12 + $0xc20] sm:$0xf] }
 0x2dc   : > { %4198 = vmatpush.bf16.msra.mxu3 %v7487_v1  ;;  %v7431_v1 = vor.u32 %v8386_v13, %v7430_v38  ;;  %v8385_v38 = vld [vmem:[%s12619_s12 + $0xa04] sm:$0xf]  ;;  %v7432_v13 = vld [vmem:[%s12619_s12 + $0xa08] sm:$0xf0]  ;;  %v8432_v2 = vld [vmem:[%s12619_s12 + $0xb74] sm:$0xf0] }
 0x2dd   : > { %4171 = vmatpush.bf16.msrb.mxu0 %v7367_v16  ;;  %v7172_v16 = vld [vmem:[%s12619_s12 + $0x8c8] sm:$0xf0] }
 0x2de   : > { %3553 = vmatpush.bf16.msra.mxu1 %v7207_v33  ;;  %3520 = vmatpush.bf16.msrb.mxu2 %v6967_v57  ;;  %v7455_v33 = vor.u32 %v8392_v63, %v7454_v29  ;;  %v2673_v57 = vpop.f32.mrf.mxu1  ;;  %v7622_v63 = vld [vmem:[%s12619_s12 + $0xb80] sm:$0xf] }
 0x2df   : > { %v7623_v30 = vor.u32 %v8434_v15, %v7622_v63  ;;  %v7614_v57 = vld [vmem:[%s12619_s12 + $0xb70] sm:$0xf]  ;;  %v8377_v15 = vld [vmem:[%s12619_s12 + $0x9c4] sm:$0xf] }
 0x2e0   : > { %4199 = vmatpush.bf16.msra.mxu3 %v7479_v36  ;;  %v8343_v36 = vld [vmem:[%s12619_s12 + $0x8b4] sm:$0xf] }
 0x2e1   : > { %4172 = vmatpush.bf16.msrb.mxu0 %v7359_v51  ;;  %3521 = vmatmul.bf16.vlgmr.msrb.gmra.mxu2 %v9990_v10  ;;  %v7164_v51 = vld [vmem:[%s12619_s12 + $0x8b8] sm:$0xf0] }
 0x2e2   : > { %3572 = vmatpush.bf16.msra.mxu2 %v7223_v0  ;;  %3554 = vmatpush.bf16.msra.mxu1 %v7199_v41  ;;  %v7175_v0 = vor.u32 %v8345_v9, %v7172_v16  ;;  %v7451_v41 = vor.u32 %v8389_v34, %v7448_v11  ;;  %v7167_v56 = vor.u32 %v8343_v36, %v7164_v51  ;;  %v8420_v9 = vld [vmem:[%s12619_s12 + $0xb14] sm:$0xf0]  ;;  %v8454_v36 = vld [vmem:[%s12619_s12 + $0xc24] sm:$0xf0] }
 0x2e3   : > { %v7427_v34 = vor.u32 %v8383_v54, %v7424_v37  ;;  %v8376_v11 = vld [vmem:[%s12619_s12 + $0x9b4] sm:$0xf0]  ;;  %v7615_v51 = vor.u32 %v8432_v2, %v7614_v57  ;;  %v7534_v54 = vld [vmem:[%s12619_s12 + $0xad0] sm:$0xf]  ;;  %v8375_v57 = vld [vmem:[%s12619_s12 + $0x9b4] sm:$0xf] }
 0x2e4   : > { %4200 = vmatpush.bf16.msra.mxu3 %v7471_v40  ;;  %v8341_v40 = vld [vmem:[%s12619_s12 + $0x8a4] sm:$0xf]  ;;  %v8412_v37 = vld [vmem:[%s12619_s12 + $0xad4] sm:$0xf0] }
 0x2e5   : > { %4173 = vmatpush.bf16.msrb.mxu0 %v7351_v62  ;;  %v7159_v53 = vor.u32 %v8341_v40, %v7156_v35  ;;  %v7694_v40 = vld [vmem:[%s12619_s12 + $0xc10] sm:$0xf]  ;;  %v8452_v35 = vld [vmem:[%s12619_s12 + $0xc14] sm:$0xf0] }
 0x2e6   : > { %4182 = vmatpush.bf16.msrb.mxu2 %v7447_v21  ;;  %3555 = vmatpush.bf16.msra.mxu1 %v7191_v24  ;;  %v7414_v21 = vld [vmem:[%s12619_s12 + $0x9e0] sm:$0xf]  ;;  %v2697_v24 = vpop.f32.mrf.mxu2 }
 0x2e7   : > { %v7415_v62 = vor.u32 %v8382_v25, %v7414_v21  ;;  %v2698_v52 = vadd.f32 %v2697_v24, %v2685_v49  ;;  %v7407_v49 = vor.u32 %v8380_v22, %v7406_v8  ;;  %v7606_v25 = vld [vmem:[%s12619_s12 + $0xb60] sm:$0xf]  ;;  %v8379_v8 = vld [vmem:[%s12619_s12 + $0x9d4] sm:$0xf]  ;;  %v7408_v24 = vld [vmem:[%s12619_s12 + $0x9d8] sm:$0xf0] }
 0x2e8   : > { %4201 = vmatpush.bf16.msra.mxu3 %v7463_v7  ;;  %v7631_v7 = vor.u32 %v8436_v46, %v7630_v12 }
 0x2e9   : > { %4174 = vmatpush.bf16.msrb.mxu0 %v7343_v14  ;;  %v11671_v29 = vadd.f32 %v11432_v5, %v2698_v52  ;;  %v7575_v14 = vor.u32 %v8422_v6, %v7574_v47  ;;  %v7435_v5 = vor.u32 %v8385_v38, %v7432_v13  ;;  %v7598_v47 = vld [vmem:[%s12619_s12 + $0xb50] sm:$0xf]  ;;  %v8428_v6 = vld [vmem:[%s12619_s12 + $0xb54] sm:$0xf0]  ;;  %v7695_v52 = vor.u32 %v8452_v35, %v7694_v40  ;;  %v8414_v38 = vld [vmem:[%s12619_s12 + $0xae4] sm:$0xf0] }
 0x2ea   : > { %4183 = vmatpush.bf16.msrb.mxu2 %v7439_v4  ;;  %3556 = vmatpush.bf16.msra.mxu1 %v7183_v26  ;;  %v7443_v4 = vor.u32 %v8387_v31, %v7440_v18  ;;  %v8378_v26 = vld [vmem:[%s12619_s12 + $0x9c4] sm:$0xf0]  ;;  %v7703_v31 = vor.u32 %v8454_v36, %v7702_v27  ;;  %v7550_v18 = vld [vmem:[%s12619_s12 + $0xaf0] sm:$0xf]  ;;  %v7599_v63 = vor.u32 %v8428_v6, %v7598_v47  ;;  %v8424_v27 = vld [vmem:[%s12619_s12 + $0xb34] sm:$0xf0] }
 0x2eb   : > { %v2805_v16 = vmax.f32 %v11119_v3, %v11671_v29  ;;  %v7399_v61 = vor.u32 %v8378_v26, %v7398_v48  ;;  %v7400_v48 = vld [vmem:[%s12619_s12 + $0x9c8] sm:$0xf0]  ;;  %v7590_v26 = vld [vmem:[%s12619_s12 + $0xb40] sm:$0xf]  ;;  %v7662_v47 = vld [vmem:[%s12619_s12 + $0xbd0] sm:$0xf] }
 0x2ec   : > { %4202 = vmatpush.bf16.msra.mxu3 %v7455_v33  ;;  %v7526_v36 = vld [vmem:[%s12619_s12 + $0xac0] sm:$0xf] }
 0x2ed   : > { %4175 = vmatpush.bf16.msrb.mxu0 %v7335_v17  ;;  %v7390_v17 = vld [vmem:[%s12619_s12 + $0x9b0] sm:$0xf]  ;;  %v2749_v42 = vpop.f32.mrf.mxu0 }
 0x2ee   : > { %4184 = vmatpush.bf16.msrb.mxu2 %v7431_v1  ;;  %3557 = vmatpush.bf16.msra.mxu1 %v7175_v0  ;;  %v7566_v1 = vld [vmem:[%s12619_s12 + $0xb10] sm:$0xf]  ;;  %v7558_v0 = vld [vmem:[%s12619_s12 + $0xb00] sm:$0xf] }
 0x2ef   : > { %4203 = vmatmul.bf16.vlgmr.msra.gmra.mxu3 %v9990_v10  ;;  %v7567_v33 = vor.u32 %v8420_v9, %v7566_v1  ;;  %v8426_v1 = vld [vmem:[%s12619_s12 + $0xb44] sm:$0xf0] }
 0x2f0   : > { %4254 = vmatpush.bf16.msrb.mxu3 %v7711_v43  ;;  %v2699_v43 = vpop.f32.mrf.mxu2 }
 0x2f1   : > { %4176 = vmatpush.bf16.msrb.mxu0 %v7327_v44  ;;  %7225 = vmatmul.msk.bf16.vlgmr.msra.gmra.mxu2 %vm1848_vm1, %v10240_v55  ;;  %v8430_v44 = vld [vmem:[%s12619_s12 + $0xb64] sm:$0xf0]  ;;  %v7591_v43 = vor.u32 %v8426_v1, %v7590_v26  ;;  %v7496_v26 = vld [vmem:[%s12619_s12 + $0xa88] sm:$0xf0]  ;;  %v7654_v1 = vld [vmem:[%s12619_s12 + $0xbc0] sm:$0xf] }
 0x2f2   : > { %4185 = vmatpush.bf16.msrb.mxu2 %v7423_v39  ;;  %3558 = vmatpush.bf16.msra.mxu1 %v7167_v56  ;;  %v8418_v39 = vld [vmem:[%s12619_s12 + $0xb04] sm:$0xf0]  ;;  %v8416_v56 = vld [vmem:[%s12619_s12 + $0xaf4] sm:$0xf0]  ;;  %v2723_v12 = vpop.f32.mrf.mxu1  ;;  %v7607_v46 = vor.u32 %v8430_v44, %v7606_v25  ;;  %v7670_v44 = vld [vmem:[%s12619_s12 + $0xbe0] sm:$0xf] }
 0x2f3   : > { %v7559_v21 = vor.u32 %v8418_v39, %v7558_v0  ;;  %v7551_v22 = vor.u32 %v8416_v56, %v7550_v18  ;;  %v7704_v0 = vld [vmem:[%s12619_s12 + $0xc28] sm:$0xf0]  ;;  %v7535_v39 = vor.u32 %v8412_v37, %v7534_v54  ;;  %v8371_v54 = vld [vmem:[%s12619_s12 + $0x994] sm:$0xf]  ;;  %v7376_v37 = vld [vmem:[%s12619_s12 + $0x998] sm:$0xf0] }
 0x2f4   : > { %4273 = vmatpush.bf16.msra.mxu3 %v7451_v41  ;;  %4177 = vmatmul.bf16.vlgmr.msrb.gmra.mxu0 %v9804_v19  ;;  %v7391_v41 = vor.u32 %v8376_v11, %v7390_v17  ;;  %v8453_v11 = vld [vmem:[%s12619_s12 + $0xc24] sm:$0xf] }
 0x2f5   : > { %4221 = vmatpush.bf16.msra.mxu0 %v7639_v58  ;;  %v7419_v58 = vor.u32 %v8381_v60, %v7416_v50  ;;  %v2751_v13 = vpop.f32.mrf.mxu0  ;;  %v8410_v60 = vld [vmem:[%s12619_s12 + $0xac4] sm:$0xf0]  ;;  %v8405_v50 = vld [vmem:[%s12619_s12 + $0xaa4] sm:$0xf]  ;;  %v7707_v18 = vor.u32 %v8453_v11, %v7704_v0  ;;  %v7646_v11 = vld [vmem:[%s12619_s12 + $0xbb0] sm:$0xf] }
 0x2f6   : > { %4186 = vmatpush.bf16.msrb.mxu2 %v7415_v62  ;;  %3559 = vmatpush.bf16.msra.mxu1 %v7159_v53  ;;  %v11749_v62 = vpop.f32.mrf.mxu3  ;;  %v7411_v53 = vor.u32 %v8379_v8, %v7408_v24  ;;  %v7527_v40 = vor.u32 %v8410_v60, %v7526_v36  ;;  %v8408_v8 = vld [vmem:[%s12619_s12 + $0xab4] sm:$0xf0]  ;;  %v7576_v60 = vld [vmem:[%s12619_s12 + $0xb28] sm:$0xf0] }
 0x2f8   : > { %4274 = vmatpush.bf16.msra.mxu3 %v7443_v4  ;;  %v2737_v4 = vadd.f32 %v11544_v28, %v2723_v12  ;;  %v7542_v28 = vld [vmem:[%s12619_s12 + $0xae0] sm:$0xf]  ;;  %v7696_v12 = vld [vmem:[%s12619_s12 + $0xc18] sm:$0xf0] }
 0x2f9   : > { %4222 = vmatpush.bf16.msra.mxu0 %v7631_v7  ;;  %3560 = vmatmul.bf16.vlgmr.msra.gmra.mxu1 %v10202_v45  ;;  %v7686_v7 = vld [vmem:[%s12619_s12 + $0xc00] sm:$0xf] }
 0x2fa   : > { %4187 = vmatpush.bf16.msrb.mxu2 %v7407_v49  ;;  %4208 = vmatpush.bf16.msrb.mxu1 %v7575_v14  ;;  %v8450_v49 = vld [vmem:[%s12619_s12 + $0xc04] sm:$0xf0]  ;;  %v2750_v14 = vadd.f32 %v2749_v42, %v2737_v4  ;;  %v2725_v17 = vpop.f32.mrf.mxu1  ;;  %v7582_v42 = vld [vmem:[%s12619_s12 + $0xb30] sm:$0xf]  ;;  %v8403_v4 = vld [vmem:[%s12619_s12 + $0xa94] sm:$0xf] }
 0x2fb   : > { %v7687_v9 = vor.u32 %v8450_v49, %v7686_v7  ;;  %v7583_v56 = vor.u32 %v8424_v27, %v7582_v42  ;;  %v7379_v17 = vor.u32 %v8371_v54, %v7376_v37  ;;  %v8369_v42 = vld [vmem:[%s12619_s12 + $0x984] sm:$0xf]  ;;  %v7368_v27 = vld [vmem:[%s12619_s12 + $0x988] sm:$0xf0] }
 0x2fc   : > { %4275 = vmatpush.bf16.msra.mxu3 %v7435_v5  ;;  %v7543_v5 = vor.u32 %v8414_v38, %v7542_v28  ;;  %v8373_v28 = vld [vmem:[%s12619_s12 + $0x9a4] sm:$0xf]  ;;  %v7384_v38 = vld [vmem:[%s12619_s12 + $0x9a8] sm:$0xf0] }
 0x2fd   : > { %4223 = vmatpush.bf16.msra.mxu0 %v7623_v30  ;;  %v7403_v30 = vor.u32 %v8377_v15, %v7400_v48  ;;  %v7688_v15 = vld [vmem:[%s12619_s12 + $0xc08] sm:$0xf0]  ;;  %v8393_v54 = vld [vmem:[%s12619_s12 + $0xa44] sm:$0xf] }
 0x2fe   : > { %4188 = vmatpush.bf16.msrb.mxu2 %v7399_v61  ;;  %4209 = vmatpush.bf16.msrb.mxu1 %v7567_v33  ;;  %v7678_v61 = vld [vmem:[%s12619_s12 + $0xbf0] sm:$0xf]  ;;  %v8448_v33 = vld [vmem:[%s12619_s12 + $0xbf4] sm:$0xf0]  ;;  %v2790_v2 = vpop.f32.mrf.mxu3  ;;  %v7464_v37 = vld [vmem:[%s12619_s12 + $0xa48] sm:$0xf0] }
 0x2ff   : > { %7716 = vmatmul.msk.bf16.vlgmr.msrb.gmra.mxu3 %vm1848_vm1, %v10240_v55 }
 0x300   : > { %4276 = vmatpush.bf16.msra.mxu3 %v7427_v34  ;;  %v7392_v34 = vld [vmem:[%s12619_s12 + $0x9b8] sm:$0xf0] }
 0x301   : > { %4224 = vmatpush.bf16.msra.mxu0 %v7615_v51  ;;  %v7679_v51 = vor.u32 %v8448_v33, %v7678_v61  ;;  %v7395_v25 = vor.u32 %v8375_v57, %v7392_v34  ;;  %v8447_v33 = vld [vmem:[%s12619_s12 + $0xbf4] sm:$0xf]  ;;  %v7680_v57 = vld [vmem:[%s12619_s12 + $0xbf8] sm:$0xf0] }
 0x302   : > { %4189 = vmatpush.bf16.msrb.mxu2 %v7391_v41  ;;  %4210 = vmatpush.bf16.msrb.mxu1 %v7559_v21  ;;  %v7512_v41 = vld [vmem:[%s12619_s12 + $0xaa8] sm:$0xf0]  ;;  %v11833_v21 = vpop.f32.mrf.mxu0  ;;  %v7488_v34 = vld [vmem:[%s12619_s12 + $0xa78] sm:$0xf0]  ;;  %v7683_v36 = vor.u32 %v8447_v33, %v7680_v57 }
 0x303   : > { %v7515_v35 = vor.u32 %v8405_v50, %v7512_v41  ;;  %v8445_v41 = vld [vmem:[%s12619_s12 + $0xbe4] sm:$0xf] }
 0x304   : > { %4277 = vmatpush.bf16.msra.mxu3 %v7419_v58  ;;  %v8451_v58 = vld [vmem:[%s12619_s12 + $0xc14] sm:$0xf]  ;;  %v2762_v6 = vpop.f32.mrf.mxu2 }
 0x305   : > { %4190 = vmatmul.bf16.vlgmr.msrb.gmra.mxu2 %v9979_v20  ;;  %4225 = vmatpush.bf16.msra.mxu0 %v7607_v46  ;;  %v7518_v46 = vld [vmem:[%s12619_s12 + $0xab0] sm:$0xf]  ;;  %v11871_v13 = vadd.f32 %v2762_v6, %v2750_v14  ;;  %v7387_v14 = vor.u32 %v8373_v28, %v7384_v38  ;;  %v8443_v6 = vld [vmem:[%s12619_s12 + $0xbd4] sm:$0xf] }
 0x306   : > { %4234 = vmatpush.bf16.msra.mxu2 %v7703_v31  ;;  %4211 = vmatpush.bf16.msrb.mxu1 %v7551_v22  ;;  %v8446_v31 = vld [vmem:[%s12619_s12 + $0xbe4] sm:$0xf0]  ;;  %v7504_v22 = vld [vmem:[%s12619_s12 + $0xa98] sm:$0xf0]  ;;  %v7519_v7 = vor.u32 %v8408_v8, %v7518_v46  ;;  %v8419_v8 = vld [vmem:[%s12619_s12 + $0xb14] sm:$0xf] }
 0x307   : > { %v7671_v24 = vor.u32 %v8446_v31, %v7670_v44  ;;  %v7507_v49 = vor.u32 %v8403_v4, %v7504_v22  ;;  %v7371_v31 = vor.u32 %v8369_v42, %v7368_v27  ;;  %v7648_v42 = vld [vmem:[%s12619_s12 + $0xbb8] sm:$0xf0] }
 0x308   : > { %4278 = vmatpush.bf16.msra.mxu3 %v7411_v53  ;;  %v7699_v53 = vor.u32 %v8451_v58, %v7696_v12 }
 0x309   : > { %4226 = vmatpush.bf16.msra.mxu0 %v7599_v63  ;;  %v8449_v63 = vld [vmem:[%s12619_s12 + $0xc04] sm:$0xf] }
 0x30a   : > { %4235 = vmatpush.bf16.msra.mxu2 %v7695_v52  ;;  %4212 = vmatpush.bf16.msrb.mxu1 %v7543_v5  ;;  %v8444_v52 = vld [vmem:[%s12619_s12 + $0xbd4] sm:$0xf0]  ;;  %v8401_v5 = vld [vmem:[%s12619_s12 + $0xa84] sm:$0xf] }
 0x30b   : > { %v7663_v48 = vor.u32 %v8444_v52, %v7662_v47  ;;  %v7499_v61 = vor.u32 %v8401_v5, %v7496_v26  ;;  %v7664_v52 = vld [vmem:[%s12619_s12 + $0xbd8] sm:$0xf0]  ;;  %v7560_v5 = vld [vmem:[%s12619_s12 + $0xb08] sm:$0xf0] }
 0x30c   : > { %4279 = vmatpush.bf16.msra.mxu3 %v7403_v30  ;;  %v7691_v30 = vor.u32 %v8449_v63, %v7688_v15  ;;  %v2764_v0 = vpop.f32.mrf.mxu2  ;;  %v8365_v63 = vld [vmem:[%s12619_s12 + $0x964] sm:$0xf] }
 0x30d   : > { %4227 = vmatpush.bf16.msra.mxu0 %v7591_v43  ;;  %v8399_v43 = vld [vmem:[%s12619_s12 + $0xa74] sm:$0xf]  ;;  %v7467_v0 = vor.u32 %v8393_v54, %v7464_v37  ;;  %v7616_v37 = vld [vmem:[%s12619_s12 + $0xb78] sm:$0xf0] }
 0x30e   : > { %4236 = vmatpush.bf16.msra.mxu2 %v7687_v9  ;;  %4213 = vmatpush.bf16.msrb.mxu1 %v7535_v39  ;;  %v2803_v9 = vpop.f32.mrf.mxu0  ;;  %v8440_v39 = vld [vmem:[%s12619_s12 + $0xbb4] sm:$0xf0]  ;;  %v7491_v50 = vor.u32 %v8399_v43, %v7488_v34  ;;  %v8431_v54 = vld [vmem:[%s12619_s12 + $0xb74] sm:$0xf] }
 0x30f   : > { %v7647_v44 = vor.u32 %v8440_v39, %v7646_v11  ;;  %v8439_v39 = vld [vmem:[%s12619_s12 + $0xbb4] sm:$0xf] }
 0x310   : > { %4280 = vmatpush.bf16.msra.mxu3 %v7395_v25  ;;  %v7672_v25 = vld [vmem:[%s12619_s12 + $0xbe8] sm:$0xf0] }
 0x311   : > { %4228 = vmatpush.bf16.msra.mxu0 %v7583_v56  ;;  %v7480_v56 = vld [vmem:[%s12619_s12 + $0xa68] sm:$0xf0]  ;;  %v7675_v46 = vor.u32 %v8445_v41, %v7672_v25  ;;  %v8455_v25 = vld [vmem:[%s12619_s12 + $0xc34] sm:$0xf] }
 0x312   : > { %4237 = vmatpush.bf16.msra.mxu2 %v7679_v51  ;;  %4214 = vmatpush.bf16.msrb.mxu1 %v7527_v40  ;;  %v8421_v51 = vld [vmem:[%s12619_s12 + $0xb24] sm:$0xf]  ;;  %v8367_v40 = vld [vmem:[%s12619_s12 + $0x974] sm:$0xf]  ;;  %v11956_v4 = vpop.f32.mrf.mxu3  ;;  %v2775_v22 = vpop.f32.mrf.mxu1  ;;  %v7336_v41 = vld [vmem:[%s12619_s12 + $0x948] sm:$0xf0] }
 0x313   : > { %4281 = vmatmul.bf16.vlgmr.msra.gmra.mxu3 %v9979_v20  ;;  %v8442_v20 = vld [vmem:[%s12619_s12 + $0xbc4] sm:$0xf0]  ;;  %v7579_v58 = vor.u32 %v8421_v51, %v7576_v60  ;;  %v2776_v28 = vadd.f32 %v2775_v22, %v11871_v13  ;;  %v7352_v13 = vld [vmem:[%s12619_s12 + $0x968] sm:$0xf0]  ;;  %v7456_v51 = vld [vmem:[%s12619_s12 + $0xa38] sm:$0xf0] }
 0x314   : > { %4325 = vmatpush.bf16.msrb.mxu3 %v7707_v18  ;;  %4229 = vmatmul.bf16.vlgmr.msra.gmra.mxu0 %v10136_v23  ;;  %v7655_v2 = vor.u32 %v8442_v20, %v7654_v1  ;;  %v8397_v18 = vld [vmem:[%s12619_s12 + $0xa64] sm:$0xf]  ;;  %v7355_v20 = vor.u32 %v8365_v63, %v7352_v13  ;;  %v8411_v22 = vld [vmem:[%s12619_s12 + $0xad4] sm:$0xf]  ;;  %v7528_v13 = vld [vmem:[%s12619_s12 + $0xac8] sm:$0xf0] }
 0x315   : > { %4286 = vmatpush.bf16.msrb.mxu0 %v7515_v35  ;;  %v7360_v35 = vld [vmem:[%s12619_s12 + $0x978] sm:$0xf0]  ;;  %v7483_v47 = vor.u32 %v8397_v18, %v7480_v56  ;;  %v2789_v15 = vadd.f32 %v11749_v62, %v2776_v28  ;;  %v8441_v1 = vld [vmem:[%s12619_s12 + $0xbc4] sm:$0xf]  ;;  %v7656_v62 = vld [vmem:[%s12619_s12 + $0xbc8] sm:$0xf0] }
 0x316   : > { %4238 = vmatpush.bf16.msra.mxu2 %v7671_v24  ;;  %4215 = vmatpush.bf16.msrb.mxu1 %v7519_v7  ;;  %v11948_v12 = vpop.f32.mrf.mxu0  ;;  %v7568_v24 = vld [vmem:[%s12619_s12 + $0xb18] sm:$0xf0]  ;;  %v7363_v38 = vor.u32 %v8367_v40, %v7360_v35  ;;  %v7659_v57 = vor.u32 %v8441_v1, %v7656_v62  ;;  %v8361_v60 = vld [vmem:[%s12619_s12 + $0x944] sm:$0xf]  ;;  %v7544_v56 = vld [vmem:[%s12619_s12 + $0xae8] sm:$0xf0] }
 0x317   : > { %v7472_v7 = vld [vmem:[%s12619_s12 + $0xa58] sm:$0xf0]  ;;  %v11992_v9 = vadd.f32 %v11833_v21, %v2789_v15  ;;  %v8413_v18 = vld [vmem:[%s12619_s12 + $0xae4] sm:$0xf]  ;;  %v7339_v40 = vor.u32 %v8361_v60, %v7336_v41  ;;  %v7640_v28 = vld [vmem:[%s12619_s12 + $0xba8] sm:$0xf0] }
 0x318   : > { %4326 = vmatpush.bf16.msrb.mxu3 %v7699_v53  ;;  %v8395_v53 = vld [vmem:[%s12619_s12 + $0xa54] sm:$0xf]  ;;  %v7344_v21 = vld [vmem:[%s12619_s12 + $0x958] sm:$0xf0]  ;;  %v8409_v63 = vld [vmem:[%s12619_s12 + $0xac4] sm:$0xf] }
 0x319   : > { %4287 = vmatpush.bf16.msrb.mxu0 %v7507_v49  ;;  %4216 = vmatmul.bf16.vlgmr.msrb.gmra.mxu1 %v10150_v59  ;;  %v7571_v49 = vor.u32 %v8419_v8, %v7568_v24  ;;  %v7475_v26 = vor.u32 %v8395_v53, %v7472_v7  ;;  %v2806_v43 = vmax.f32 %v11359_v32, %v11992_v9  ;;  %v8359_v8 = vld [vmem:[%s12619_s12 + $0x934] sm:$0xf]  ;;  %v7328_v24 = vld [vmem:[%s12619_s12 + $0x938] sm:$0xf0]  ;;  %v7624_v1 = vld [vmem:[%s12619_s12 + $0xb88] sm:$0xf0] }
 0x31a   : > { %4239 = vmatpush.bf16.msra.mxu2 %v7663_v48  ;;  %4260 = vmatpush.bf16.msra.mxu1 %v7387_v14  ;;  %v7667_v48 = vor.u32 %v8443_v6, %v7664_v52  ;;  %v8417_v14 = vld [vmem:[%s12619_s12 + $0xb04] sm:$0xf]  ;;  %v3446_v34 = vpop.f32.mrf.mxu3  ;;  %v2777_v11 = vpop.f32.mrf.mxu1  ;;  %v7536_v6 = vld [vmem:[%s12619_s12 + $0xad8] sm:$0xf0]  ;;  %v7331_v53 = vor.u32 %v8359_v8, %v7328_v24  ;;  %v7531_v15 = vor.u32 %v8409_v63, %v7528_v13 }
 0x31b   : > { %v8437_v52 = vld [vmem:[%s12619_s12 + $0xba4] sm:$0xf]  ;;  %v7539_v7 = vor.u32 %v8411_v22, %v7536_v6  ;;  %v8427_v11 = vld [vmem:[%s12619_s12 + $0xb54] sm:$0xf]  ;;  %v7584_v60 = vld [vmem:[%s12619_s12 + $0xb38] sm:$0xf0] }
 0x31c   : > { %4327 = vmatpush.bf16.msrb.mxu3 %v7691_v30  ;;  %v7563_v30 = vor.u32 %v8417_v14, %v7560_v5  ;;  %v7520_v5 = vld [vmem:[%s12619_s12 + $0xab8] sm:$0xf0] }
 0x31d   : > { %4288 = vmatpush.bf16.msrb.mxu0 %v7499_v61  ;;  %v8363_v61 = vld [vmem:[%s12619_s12 + $0x954] sm:$0xf] }
 0x31e   : > { %4240 = vmatpush.bf16.msra.mxu2 %v7655_v2  ;;  %4261 = vmatpush.bf16.msra.mxu1 %v7379_v17  ;;  %v3420_v33 = vpop.f32.mrf.mxu0  ;;  %v8415_v2 = vld [vmem:[%s12619_s12 + $0xaf4] sm:$0xf]  ;;  %v7552_v17 = vld [vmem:[%s12619_s12 + $0xaf8] sm:$0xf0]  ;;  %v7347_v27 = vor.u32 %v8363_v61, %v7344_v21 }
 0x320   : > { %4328 = vmatpush.bf16.msrb.mxu3 %v7683_v36  ;;  %v8391_v36 = vld [vmem:[%s12619_s12 + $0xa34] sm:$0xf] }
 0x321   : > { %4289 = vmatpush.bf16.msrb.mxu0 %v7491_v50  ;;  %v7555_v50 = vor.u32 %v8415_v2, %v7552_v17  ;;  %v7608_v2 = vld [vmem:[%s12619_s12 + $0xb68] sm:$0xf0] }
 0x322   : > { %4241 = vmatpush.bf16.msra.mxu2 %v7647_v44  ;;  %4262 = vmatpush.bf16.msra.mxu1 %v7371_v31  ;;  %v7712_v44 = vld [vmem:[%s12619_s12 + $0xc38] sm:$0xf0]  ;;  %v7651_v31 = vor.u32 %v8439_v39, %v7648_v42 }
 0x323   : > { %v7715_v35 = vor.u32 %v8455_v25, %v7712_v44 }
 0x324   : > { %4329 = vmatpush.bf16.msrb.mxu3 %v7675_v46  ;;  %v7547_v46 = vor.u32 %v8413_v18, %v7544_v56 }
 0x325   : > { %4242 = vmatmul.bf16.vlgmr.msra.gmra.mxu2 %v10202_v45  ;;  %4290 = vmatpush.bf16.msrb.mxu0 %v7483_v47  ;;  %v3405_v47 = vpop.f32.mrf.mxu2 }
 0x326   : > { %4299 = vmatpush.bf16.msrb.mxu2 %v7579_v58  ;;  %4263 = vmatpush.bf16.msra.mxu1 %v7363_v38  ;;  %v7459_v58 = vor.u32 %v8391_v36, %v7456_v51  ;;  %v3419_v38 = vadd.f32 %v11948_v12, %v3405_v47  ;;  %v8435_v12 = vld [vmem:[%s12619_s12 + $0xb94] sm:$0xf] }
 0x327   : > { %v8423_v51 = vld [vmem:[%s12619_s12 + $0xb34] sm:$0xf] }
 0x328   : > { %4330 = vmatpush.bf16.msrb.mxu3 %v7667_v48  ;;  %v7587_v44 = vor.u32 %v8423_v51, %v7584_v60 }
 0x329   : > { %4291 = vmatpush.bf16.msrb.mxu0 %v7475_v26  ;;  %v8433_v26 = vld [vmem:[%s12619_s12 + $0xb84] sm:$0xf] }
 0x32a   : > { %4300 = vmatpush.bf16.msrb.mxu2 %v7571_v49  ;;  %4264 = vmatpush.bf16.msra.mxu1 %v7355_v20  ;;  %v7643_v49 = vor.u32 %v8437_v52, %v7640_v28  ;;  %v7627_v20 = vor.u32 %v8433_v26, %v7624_v1 }
 0x32c   : > { %4331 = vmatpush.bf16.msrb.mxu3 %v7659_v57  ;;  %v7619_v57 = vor.u32 %v8431_v54, %v7616_v37 }
 0x32d   : > { %4292 = vmatpush.bf16.msrb.mxu0 %v7467_v0  ;;  %v3407_v14 = vpop.f32.mrf.mxu2  ;;  %v7600_v0 = vld [vmem:[%s12619_s12 + $0xb58] sm:$0xf0] }
 0x32e   : > { %4301 = vmatpush.bf16.msrb.mxu2 %v7563_v30  ;;  %4265 = vmatpush.bf16.msra.mxu1 %v7347_v27 }
 0x330   : > { %4332 = vmatpush.bf16.msrb.mxu3 %v7651_v31 }
 0x331   : > { %4293 = vmatpush.bf16.msrb.mxu0 %v7459_v58  ;;  %v3470_v30 = vpop.f32.mrf.mxu0 }
 0x332   : > { %4302 = vmatpush.bf16.msrb.mxu2 %v7555_v50  ;;  %4266 = vmatpush.bf16.msra.mxu1 %v7339_v40  ;;  %v3496_v61 = vpop.f32.mrf.mxu3  ;;  %v3431_v21 = vpop.f32.mrf.mxu1 }
 0x333   : > { %4333 = vmatmul.bf16.vlgmr.msrb.gmra.mxu3 %v10202_v45  ;;  %v7632_v45 = vld [vmem:[%s12619_s12 + $0xb98] sm:$0xf0]  ;;  %v3432_v33 = vadd.f32 %v3431_v21, %v3419_v38 }
 0x334   : > { %4294 = vmatmul.bf16.vlgmr.msrb.gmra.mxu0 %v9990_v10  ;;  %v7635_v48 = vor.u32 %v8435_v12, %v7632_v45  ;;  %v8407_v10 = vld [vmem:[%s12619_s12 + $0xab4] sm:$0xf] }
 0x335   : > { %4345 = vmatpush.bf16.msra.mxu0 %v7715_v35  ;;  %v7523_v62 = vor.u32 %v8407_v10, %v7520_v5  ;;  %v3445_v17 = vadd.f32 %v11956_v4, %v3432_v33  ;;  %v7603_v4 = vor.u32 %v8427_v11, %v7600_v0 }
 0x336   : > { %4303 = vmatpush.bf16.msrb.mxu2 %v7547_v46  ;;  %4267 = vmatpush.bf16.msra.mxu1 %v7331_v53 }
 0x339   : > { %4268 = vmatmul.bf16.vlgmr.msra.gmra.mxu1 %v9804_v19  ;;  %v8429_v19 = vld [vmem:[%s12619_s12 + $0xb64] sm:$0xf]  ;;  %v3472_v39 = vpop.f32.mrf.mxu0 }
 0x33a   : > { %4304 = vmatpush.bf16.msrb.mxu2 %v7539_v7  ;;  %4312 = vmatpush.bf16.msrb.mxu1 %v7643_v49  ;;  %v7611_v34 = vor.u32 %v8429_v19, %v7608_v2  ;;  %v3498_v42 = vpop.f32.mrf.mxu3  ;;  %v3433_v27 = vpop.f32.mrf.mxu1 }
 0x33e   : > { %4305 = vmatpush.bf16.msrb.mxu2 %v7531_v15  ;;  %4313 = vmatpush.bf16.msrb.mxu1 %v7635_v48  ;;  %v4366_v15 = vld [vmem:[%s12613_s6] sm:$0xf] }
 0x33f   : > { %v4377_v10 = vperm.slane %v4366_v15, 3 }
 0x341   : > { %v4381_v5 = vperm.slane %v4377_v10, 1 }
 0x342   : > { %4306 = vmatpush.bf16.msrb.mxu2 %v7523_v62  ;;  %4314 = vmatpush.bf16.msrb.mxu1 %v7627_v20  ;;  %v3483_v25 = vpop.f32.mrf.mxu1  ;;  %v4368_v62 = vperm.slane %v4366_v15, 0 }
 0x343   : > { %4425 = vrot.lane.b32.xlu0 %v4381_v5, %s8903_s24 }
 0x344   : > { %7717 = vmatmul.msk.bf16.vlgmr.msra.gmra.mxu0 %vm1848_vm1, %v10240_v55  ;;  %v7592_v55 = vld [vmem:[%s12619_s12 + $0xb48] sm:$0xf0]  ;;  %v3457_v50 = vpop.f32.mrf.mxu2  ;;  %v12135_v20 = vperm.slane %v4368_v62, 0 }
 0x345   : > { %4307 = vmatmul.bf16.vlgmr.msrb.gmra.mxu2 %v10150_v59  ;;  %v8425_v59 = vld [vmem:[%s12619_s12 + $0xb44] sm:$0xf]  ;;  %v3458_v41 = vadd.f32 %v3457_v50, %v3445_v17 }
 0x346   : > { %4315 = vmatpush.bf16.msrb.mxu1 %v7619_v57  ;;  %v7595_v36 = vor.u32 %v8425_v59, %v7592_v55  ;;  %4414 = vrot.lane.b32.xlu1 %v12135_v20, %s8901_s18  ;;  %v4369_v57 = vperm.slane %v4366_v15, 2 }
 0x347   : > { %v3471_v31 = vadd.f32 %v3470_v30, %v3458_v41 }
 0x348   : > { %v12140_v19 = vperm.slane %v4369_v57, 0 }
 0x349   : > { %v3484_v18 = vadd.f32 %v3483_v25, %v3471_v31 }
 0x34a   : > { %4316 = vmatpush.bf16.msrb.mxu1 %v7611_v34  ;;  %v3485_v40 = vpop.f32.mrf.mxu1 }
 0x34b   : > { %v3578_v56 = vmax.f32 %v2805_v16, %v3484_v18 }
 0x34c   : > { %v3459_v58 = vpop.f32.mrf.mxu2 }
 0x34e   : > { %4317 = vmatpush.bf16.msrb.mxu1 %v7603_v4 }
 0x351   : > { %v3535_v35 = vpop.f32.mrf.mxu0 }
 0x352   : > { %4318 = vmatpush.bf16.msrb.mxu1 %v7595_v36  ;;  %v3548_v46 = vpop.f32.mrf.mxu3 }
 0x356   : > { %4319 = vmatpush.bf16.msrb.mxu1 %v7587_v44  ;;  %v3509_v8 = vpop.f32.mrf.mxu1 }
 0x357   : > { %v3510_v24 = vadd.f32 %v3509_v8, %v3496_v61 }
 0x359   : > { %4320 = vmatmul.bf16.vlgmr.msrb.gmra.mxu1 %v10136_v23  ;;  %v3537_v22 = vpop.f32.mrf.mxu0 }
 0x35a   : > { %v3550_v47 = vpop.f32.mrf.mxu3 }
 0x35e   : > { %v3511_v6 = vpop.f32.mrf.mxu1 }
 0x364   : > { %v3522_v52 = vpop.f32.mrf.mxu2 }
 0x365   : > { %v3523_v28 = vadd.f32 %v3522_v52, %v3510_v24 }
 0x367   : > { %v3536_v38 = vadd.f32 %v3535_v35, %v3523_v28 }
 0x369   : > { %v3549_v53 = vadd.f32 %v3548_v46, %v3536_v38 }
 0x36c   : > { %v3524_v7 = vpop.f32.mrf.mxu2 }
 0x371   : > { %v4178_v49 = vpop.f32.mrf.mxu0 }
 0x372   : > { %v4204_v63 = vpop.f32.mrf.mxu3 }
 0x374   : > { %v3574_v3 = vpop.f32.mrf.mxu2 }
 0x376   : > { %v3561_v29 = vpop.f32.mrf.mxu1 }
 0x377   : > { %v3562_v16 = vadd.f32 %v3561_v29, %v3549_v53 }
 0x379   : > { %v3575_v13 = vadd.f32 %v3574_v3, %v3562_v16  ;;  %v4180_v23 = vpop.f32.mrf.mxu0 }
 0x37a   : > { %v4206_v12 = vpop.f32.mrf.mxu3 }
 0x37b   : > { %v3579_v45 = vmax.f32 %v2806_v43, %v3575_v13  ;;  %v4376_v43 = vperm.slane %v4366_v15, 1 }
 0x37c   : > { %v3576_v48 = vpop.f32.mrf.mxu2 }
 0x37d   : > { %v4380_v37 = vperm.slane %v4376_v43, 1 }
 0x37e   : > { %v3563_v14 = vpop.f32.mrf.mxu1 }
 0x37f   : > { %4423 = vrot.lane.b32.xlu2 %v4380_v37, %s8903_s24  ;;  %s8916_s24 = smov 15  }
 0x382   : > { %v4256_v26 = vpop.f32.mrf.mxu3 }
 0x387   : > { %4416 = vrot.lane.b32.xlu2 %v12140_v19, %s8901_s18  ;;  %s12645_s18 = smov 99  }
 0x388   : > { %v4191_v1 = vpop.f32.mrf.mxu2 }
 0x389   : > { %v4192_v33 = vadd.f32 %v4191_v1, %v4178_v49 }
 0x38a   : > { %v4258_v54 = vpop.f32.mrf.mxu3 }
 0x38b   : > { %v4205_v2 = vadd.f32 %v4204_v63, %v4192_v33 }
 0x38f   : > { %4384 = vrot.lane.b32.xlu2 %v4380_v37, %s12641_s25 }
 0x390   : > { %v4193_v32 = vpop.f32.mrf.mxu2 }
 0x391   : > { %v4230_v9 = vpop.f32.mrf.mxu0 }
 0x396   : > { %v4282_v30 = vpop.f32.mrf.mxu3  ;;  %v4217_v61 = vpop.f32.mrf.mxu1 }
 0x397   : > { %v4218_v11 = vadd.f32 %v4217_v61, %v4205_v2  ;;  %4397 = vrot.lane.b32.xlu2 %v12140_v19, %s12640_s26 }
 0x399   : > { %v4232_v21 = vpop.f32.mrf.mxu0  ;;  %v4231_v0 = vadd.f32 %v4230_v9, %v4218_v11 }
 0x39e   : > { %v4284_v17 = vpop.f32.mrf.mxu3  ;;  %v4219_v34 = vpop.f32.mrf.mxu1 }
 0x39f   : > { %v4517_v34 = vld [vmem:[%s12612_s5] sm:$0xff] }
 0x3a8   : > { %v4243_v39 = vpop.f32.mrf.mxu2 }
 0x3a9   : > { %v4244_v42 = vadd.f32 %v4243_v39, %v4231_v0  ;;  %v4520_v0 = vld [vmem:[%s12612_s5 + $0x18] sm:$0xff] }
 0x3ab   : > { %v4257_v27 = vadd.f32 %v4256_v26, %v4244_v42 }
 0x3ad   : > { %v4351_v4 = vmax.f32 %v3578_v56, %v4257_v27 }
 0x3af   : > { %4355 = vrot.lane.b32.xlu0 %v4351_v4, %s8916_s24 }
 0x3b0   : > { %v4245_v59 = vpop.f32.mrf.mxu2 }
 0x3b1   : > { %v4295_v55 = vpop.f32.mrf.mxu0 }
 0x3b5   : > { %v4426_v6 = vpop.permute.xlu0 %4425 }
 0x3b6   : > { %v4334_v36 = vpop.f32.mrf.mxu3  ;;  %v4269_v51 = vpop.f32.mrf.mxu1 }
 0x3b7   : > { %4405 = vrot.lane.b32.xlu0 %v4380_v37, %s8918_s27  ;;  %v4283_v18 = vadd.f32 %v4282_v30, %v4269_v51 }
 0x3b8   : > { %v4415_v38 = vpop.permute.xlu1 %4414 }
 0x3b9   : > { %v4297_v60 = vpop.f32.mrf.mxu0  ;;  %v4296_v58 = vadd.f32 %v4295_v55, %v4283_v18 }
 0x3be   : > { %v4336_v50 = vpop.f32.mrf.mxu3  ;;  %v4271_v41 = vpop.f32.mrf.mxu1 }
 0x3bf   : > { %4386 = vrot.lane.b32.xlu0 %v4381_v5, %s12641_s25 }
 0x3c1   : > { %v4347_v25 = vpop.f32.mrf.mxu0 }
 0x3c8   : > { %v4308_v44 = vpop.f32.mrf.mxu2 }
 0x3c9   : > { %v4349_v31 = vpop.f32.mrf.mxu0  ;;  %v4309_v40 = vadd.f32 %v4308_v44, %v4296_v58 }
 0x3d0   : > { %v4310_v56 = vpop.f32.mrf.mxu2 }
 0x3d6   : > { %v4321_v35 = vpop.f32.mrf.mxu1 }
 0x3d7   : > { %v4322_v46 = vadd.f32 %v4321_v35, %v4309_v40 }
 0x3d9   : > { %v4335_v8 = vadd.f32 %v4334_v36, %v4322_v46  ;;  %v4424_v52 = vpop.permute.xlu2 %4423 }
 0x3da   : > { %v4427_v16 = vsel %vm12642_vm9, %v4424_v52, %v4426_v6 }
 0x3db   : > { %v4348_v24 = vadd.f32 %v4347_v25, %v4335_v8 }
 0x3dd   : > { %v4352_v22 = vmax.f32 %v3579_v45, %v4348_v24 }
 0x3de   : > { %v4323_v47 = vpop.f32.mrf.mxu1 }
 0x3df   : > { %4357 = vrot.lane.b32.xlu1 %v4352_v22, %s8916_s24  ;;  %s8922_s24 = smov 7  }
 0x3e1   : > { %v4417_v53 = vpop.permute.xlu2 %4416 }
 0x3e2   : > { %v4418_v13 = vsel %vm12643_vm12, %v4415_v38, %v4417_v53 }
 0x3e7   : > { %4407 = vrot.lane.b32.xlu1 %v4381_v5, %s8918_s27 }
 0x3e9   : > { %v4385_v45 = vpop.permute.xlu2 %4384 }
 0x3ef   : > { %4395 = vrot.lane.b32.xlu1 %v12135_v20, %s12640_s26 }
 0x3f1   : > { %v4398_v21 = vpop.permute.xlu2 %4397 }
 0x421   : > { %v4356_v28 = vpop.permute.xlu0 %4355 }
 0x422   : > { %v12152_v49 = vsel %vm4359_vm2, 0.0, %v4356_v28 }
 0x423   : > { %v4421_v23 = vmul.f32 %v4415_v38, %v12152_v49  ;;  %v4430_v48 = vmul.f32 %v4424_v52, %v12152_v49  ;;  %v4391_v32 = vmul.f32 %v4385_v45, %v12152_v49 }
 0x429   : > { %v4406_v7 = vpop.permute.xlu0 %4405 }
 0x42a   : > { %v4412_v43 = vmul.f32 %v4406_v7, %v12152_v49 }
 0x431   : > { %v4387_v29 = vpop.permute.xlu0 %4386 }
 0x432   : > { %v4388_v5 = vsel %vm12644_vm14, %v4385_v45, %v4387_v29 }
 0x451   : > { %v4358_v63 = vpop.permute.xlu1 %4357 }
 0x452   : > { %v4360_v3 = vsel %vm4359_vm2, %v4356_v28, %v4358_v63  ;;  %v4519_v63 = vld [vmem:[%s12612_s5 + $0x10] sm:$0xff]  ;;  %vm5777_vm2 = vcmask 1024  }
 0x453   : > { %v12157_v12 = vsel %vm4364_vm4, %v4360_v3, 0.0 }
 0x454   : > { %v8678_v15 = vpack.i.bf16 %v12157_v12, %v12152_v49  ;;  %v4431_v10 = vmul.f32 %v4427_v16, %v12157_v12  ;;  %v4422_v14 = vmul.f32 %v4418_v13, %v12157_v12  ;;  %v4392_v62 = vmul.f32 %v4388_v5, %v12157_v12 }
 0x456   : > { %8679 = vrot.lane.b32.xlu2 %v8678_v15, %s12645_s18  ;;  %v8683_v26 = vpack.i.bf16 %v4431_v10, %v4430_v48  ;;  %v8693_v1 = vpack.i.bf16 %v4422_v14, %v4421_v23  ;;  %v8703_v30 = vpack.i.bf16 %v4392_v62, %v4391_v32  ;;  %s8924_s18 = smov 9  }
 0x458   : > { %8684 = vrot.lane.b32.xlu0 %v8683_v26, %s12646_s16  ;;  %8694 = vrot.lane.b32.xlu1 %v8693_v1, %s12647_s15  ;;  %v4375_v1 = vmul.f32 %v12140_v19, %v12157_v12  ;;  %v8458_v19 = vld [vmem:[%s12611_s4 + $0x8] sm:$0xff]  ;;  %s8925_s16 = smov 121   ;;  %s12651_s15 = smov 113  }
 0x459   : > { %v4408_v54 = vpop.permute.xlu1 %4407 }
 0x45a   : > { %v4409_v9 = vsel %vm1848_vm1, %v4406_v7, %v4408_v54  ;;  %vm4474_vm1 = vcmask 916480   ;;  %v4518_v7 = vld [vmem:[%s12612_s5 + $0x8] sm:$0xff]  ;;  %v4374_v54 = vmul.f32 %v12135_v20, %v12152_v49  ;;  %v8466_v20 = vld [vmem:[%s12620_s13 + $0x38] sm:$0xff] }
 0x45b   : > { %v4413_v37 = vmul.f32 %v4409_v9, %v12157_v12  ;;  %4763 = vmatpush.bf16.msra.mxu1 %v8466_v20 }
 0x45d   : > { %v8698_v61 = vpack.i.bf16 %v4413_v37, %v4412_v43  ;;  %v8457_v43 = vld [vmem:[%s12611_s4] sm:$0xff] }
 0x45e   : > { %8704 = vrot.lane.b32.xlu2 %v8703_v30, %s12648_s20  ;;  %v7804_v37 = vld [vmem:[%s12620_s13 + $0xc4] sm:$0x3] }
 0x460   : > { %8689 = vrot.lane.b32.xlu0 %v8678_v15, %s12638_s22  ;;  %8699 = vrot.lane.b32.xlu1 %v8698_v61, %s12634_s23  ;;  %v4876_v61 = vunpack.c.l.b16 %v7804_v37 }
 0x461   : > { %v4396_v33 = vpop.permute.xlu1 %4395 }
 0x462   : > { %v4400_v57 = vsel %vm4399_vm0, %v4396_v33, %v4398_v21  ;;  %v4403_v2 = vmul.f32 %v4396_v33, %v12152_v49  ;;  %v8478_v49 = vld [vmem:[%s12620_s13 + $0x9c] sm:$0xff]  ;;  %v8465_v21 = vld [vmem:[%s12620_s13 + $0x30] sm:$0xff] }
 0x463   : > { %v4404_v17 = vmul.f32 %v4400_v57, %v12157_v12  ;;  %v4677_v12 = vld [vmem:[%s12620_s13 + $0x60] sm:$0x3]  ;;  %v8477_v33 = vld [vmem:[%s12620_s13 + $0x94] sm:$0xff]  ;;  %4764 = vmatpush.bf16.msra.mxu1 %v8465_v21 }
 0x464   : > { %v4727_v30 = vunpack.c.l.b16 %v4677_v12  ;;  %v7879_v12 = vld [vmem:[%s12620_s13 + $0x128] sm:$0x3] }
 0x465   : > { %v8708_v11 = vpack.i.bf16 %v4404_v17, %v4403_v2  ;;  %v4889_v2 = vpack.c.b16 %v4876_v61, %v4876_v61  ;;  %v8506_v61 = vld [vmem:[%s12620_s13 + $0x184] sm:$0xff]  ;;  %v5022_v21 = vunpack.c.l.b16 %v7879_v12 }
 0x466   : > { %4523 = vperm.xlu2 %8677, %v4517_v34   ;;  %v4740_v57 = vpack.c.b16 %v4727_v30, %v4727_v30  ;;  %v8486_v30 = vld [vmem:[%s12620_s13 + $0xe0] sm:$0xff] }
 0x467   : > { %v4903_v34 = vsel %vm1031_vm10, %v4889_v2, 0 }
 0x468   : > { %8709 = vrot.lane.b32.xlu0 %v8708_v11, %s12636_s17  ;;  %8714 = vrot.lane.b32.xlu1 %v8678_v15, %s12649_s21  ;;  %v4761_v17 = vsel %vm1031_vm10, %v4740_v57, 0  ;;  %v8464_v11 = vld [vmem:[%s12620_s13 + $0x28] sm:$0xff] }
 0x469   : > { %4785 = vmatpush.bf16.msra.mxu3 %v4761_v17  ;;  %4765 = vmatpush.bf16.msra.mxu1 %v8464_v11 }
 0x46e   : > { %4538 = vperm.xlu2 %8677, %v4520_v0   ;;  %v8476_v0 = vld [vmem:[%s12620_s13 + $0x8c] sm:$0xff] }
 0x470   : > { %4528 = vperm.xlu0 %8718, %v4518_v7   ;;  %4533 = vperm.xlu1 %8719, %v4519_v63  }
 0x4b0   : > { %v8680_v39 = vpop.permute.xlu2 %8679 }
 0x4b1   : > { %v8682_v51 = vunpack.i.h.bf16 %v8680_v39  ;;  %v8681_v60 = vunpack.i.l.bf16 %v8680_v39  ;;  %v8470_v39 = vld [vmem:[%s12620_s13 + $0x58] sm:$0xff] }
 0x4b2   : > { %4786 = vmatpush.bf16.msra.mxu3 %v8470_v39 }
 0x4b3   : > { %v4491_v56 = vsel %vm855_vm13, %v8681_v60, %v8682_v51  ;;  %v8468_v60 = vld [vmem:[%s12620_s13 + $0x48] sm:$0xff]  ;;  %vm5571_vm13 = vcmask 261120  }
 0x4b8   : > { %v8705_v38 = vpop.permute.xlu2 %8704 }
 0x4b9   : > { %v8707_v3 = vunpack.i.h.bf16 %v8705_v38  ;;  %v8706_v29 = vunpack.i.l.bf16 %v8705_v38 }
 0x4bb   : > { %v4447_v14 = vsel %vm778_vm8, %v8706_v29, %v8707_v3  ;;  %v8502_v29 = vld [vmem:[%s12620_s13 + $0x164] sm:$0xff]  ;;  %vm5255_vm8 = vcmask 64512  }
 0x4ca   : > { %v8695_v42 = vpop.permute.xlu1 %8694  ;;  %v8685_v27 = vpop.permute.xlu0 %8684 }
 0x4cb   : > { %v8697_v4 = vunpack.i.h.bf16 %v8695_v42  ;;  %v8696_v59 = vunpack.i.l.bf16 %v8695_v42  ;;  %v8687_v55 = vunpack.i.h.bf16 %v8685_v27  ;;  %v8686_v36 = vunpack.i.l.bf16 %v8685_v27  ;;  %v8482_v42 = vld [vmem:[%s12620_s13 + $0xbc] sm:$0xff] }
 0x4cc   : > { %v8463_v27 = vld [vmem:[%s12620_s13 + $0x20] sm:$0xff] }
 0x4cd   : > { %v4512_v50 = vpack.c.bf16 %v8687_v55, %v8687_v55  ;;  %v4500_v41 = vsel %vm897_vm3, %v8686_v36, %v8687_v55  ;;  %v4484_v31 = vsel %vm820_vm11, %v8696_v59, %v8697_v4  ;;  %v4510_v58 = vpack.c.bf16 %v8682_v51, %v8697_v4  ;;  %v8475_v4 = vld [vmem:[%s12620_s13 + $0x84] sm:$0xff]  ;;  %v8469_v59 = vld [vmem:[%s12620_s13 + $0x50] sm:$0xff]  ;;  %4766 = vmatpush.bf16.msra.mxu1 %v8463_v27  ;;  %v8462_v36 = vld [vmem:[%s12620_s13 + $0x18] sm:$0xff] }
 0x4ce   : > { %v4511_v25 = vpack.c.bf16 %v4500_v41, %v4500_v41  ;;  %v4509_v46 = vpack.c.bf16 %v4491_v56, %v4484_v31  ;;  %vm4456_vm11 = vcmask 932864   ;;  %v8481_v55 = vld [vmem:[%s12620_s13 + $0xb4] sm:$0xff]  ;;  %4787 = vmatpush.bf16.msra.mxu3 %v8469_v59  ;;  %v8474_v51 = vld [vmem:[%s12620_s13 + $0x7c] sm:$0xff]  ;;  %v8479_v56 = vld [vmem:[%s12620_s13 + $0xa4] sm:$0xff]  ;;  %vm5757_vm3 = vcmask 523264  }
 0x4cf   : > { %v4561_v44 = vsel %vm1047_vm5, %v4512_v50, 0  ;;  %v8480_v50 = vld [vmem:[%s12620_s13 + $0xac] sm:$0xff]  ;;  %v8485_v59 = vld [vmem:[%s12620_s13 + $0xd8] sm:$0xff] }
 0x4d0   : > { %4585 = vmatpush.bf16.msrb.mxu0 %v4561_v44  ;;  %v4558_v18 = vsel %vm1047_vm5, %v4511_v25, 0  ;;  %v8461_v41 = vld [vmem:[%s12620_s13 + $0x10] sm:$0xff]  ;;  %v4524_v44 = vpop.permute.xlu2 %4523  ;;  %vm5775_vm5 = vcmask 7168  }
 0x4d1   : > { %4566 = vmatpush.bf16.msra.mxu2 %v4558_v18  ;;  %4767 = vmatpush.bf16.msra.mxu1 %v8462_v36  ;;  %v8473_v25 = vld [vmem:[%s12620_s13 + $0x74] sm:$0xff]  ;;  %v8467_v18 = vld [vmem:[%s12620_s13 + $0x40] sm:$0xff] }
 0x4d2   : > { %v8700_v40 = vpop.permute.xlu1 %8699  ;;  %v8690_v35 = vpop.permute.xlu0 %8689  ;;  %4788 = vmatpush.bf16.msra.mxu3 %v8468_v60 }
 0x4d3   : > { %v8702_v8 = vunpack.i.h.bf16 %v8700_v40  ;;  %v8701_v24 = vunpack.i.l.bf16 %v8700_v40  ;;  %v8692_v22 = vunpack.i.h.bf16 %v8690_v35  ;;  %v8691_v47 = vunpack.i.l.bf16 %v8690_v35  ;;  %v8460_v35 = vld [vmem:[%s12620_s13 + $0x8] sm:$0xff] }
 0x4d4   : > { %4586 = vmatpush.bf16.msrb.mxu0 %v4510_v58 }
 0x4d5   : > { %v4508_v6 = vpack.c.bf16 %v8702_v8, %v8692_v22  ;;  %4567 = vmatpush.bf16.msra.mxu2 %v4509_v46  ;;  %v4465_v52 = vsel %vm4464_vm6, %v8691_v47, %v8692_v22  ;;  %v4475_v28 = vsel %vm4474_vm1, %v8701_v24, %v8702_v8  ;;  %4768 = vmatpush.bf16.msra.mxu1 %v8461_v41  ;;  %v8472_v46 = vld [vmem:[%s12620_s13 + $0x6c] sm:$0xff]  ;;  %v8490_v8 = vld [vmem:[%s12620_s13 + $0x100] sm:$0xff] }
 0x4d6   : > { %v4507_v53 = vpack.c.bf16 %v4475_v28, %v4465_v52  ;;  %4789 = vmatpush.bf16.msra.mxu3 %v8467_v18  ;;  %v8471_v52 = vld [vmem:[%s12620_s13 + $0x64] sm:$0xff]  ;;  %v8504_v18 = vld [vmem:[%s12620_s13 + $0x174] sm:$0xff] }
 0x4d7   : > { %v8498_v41 = vld [vmem:[%s12620_s13 + $0x144] sm:$0xff] }
 0x4d8   : > { %4587 = vmatpush.bf16.msrb.mxu0 %v4508_v6  ;;  %v8459_v6 = vld [vmem:[%s12620_s13] sm:$0xff]  ;;  %v4539_v39 = vpop.permute.xlu2 %4538 }
 0x4d9   : > { %4568 = vmatpush.bf16.msra.mxu2 %v4507_v53  ;;  %4769 = vmatpush.bf16.msra.mxu1 %v8460_v35  ;;  %v8489_v53 = vld [vmem:[%s12620_s13 + $0xf8] sm:$0xff] }
 0x4da   : > { %v8715_v16 = vpop.permute.xlu1 %8714  ;;  %v8710_v13 = vpop.permute.xlu0 %8709  ;;  %5051 = vmatpush.bf16.msrb.mxu3 %v8490_v8  ;;  %v8493_v8 = vld [vmem:[%s12620_s13 + $0x118] sm:$0xff] }
 0x4db   : > { %v8717_v23 = vunpack.i.h.bf16 %v8715_v16  ;;  %v8716_v45 = vunpack.i.l.bf16 %v8715_v16  ;;  %v8712_v15 = vunpack.i.h.bf16 %v8710_v13  ;;  %v8711_v48 = vunpack.i.l.bf16 %v8710_v13  ;;  %v8488_v13 = vld [vmem:[%s12620_s13 + $0xf0] sm:$0xff] }
 0x4dd   : > { %v4506_v10 = vpack.c.bf16 %v8712_v15, %v8707_v3  ;;  %v4457_v5 = vsel %vm4456_vm11, %v8711_v48, %v8712_v15  ;;  %v4438_v62 = vsel %vm736_vm7, %v8716_v45, %v8717_v23  ;;  %v4504_v32 = vpack.c.bf16 %v8717_v23, %v4375_v1  ;;  %4770 = vmatpush.bf16.msra.mxu1 %v8459_v6  ;;  %v7954_v23 = vld [vmem:[%s12620_s13 + $0x18c] sm:$0x3] }
 0x4de   : > { %v4505_v26 = vpack.c.bf16 %v4457_v5, %v4447_v14  ;;  %v4503_v9 = vpack.c.bf16 %v4438_v62, %v4374_v54  ;;  %5052 = vmatpush.bf16.msrb.mxu3 %v8489_v53  ;;  %v5168_v15 = vunpack.c.l.b16 %v7954_v23  ;;  %v8501_v5 = vld [vmem:[%s12620_s13 + $0x15c] sm:$0xff]  ;;  %v8487_v54 = vld [vmem:[%s12620_s13 + $0xe8] sm:$0xff]  ;;  %vm4753_vm7 = vcmask 556032  }
 0x4df   : > { %4588 = vmatpush.bf16.msrb.mxu0 %v4506_v10  ;;  %v8503_v6 = vld [vmem:[%s12620_s13 + $0x16c] sm:$0xff] }
 0x4e0   : > { %4569 = vmatpush.bf16.msra.mxu2 %v4505_v26  ;;  %v5181_v26 = vpack.c.b16 %v5168_v15, %v5168_v15 }
 0x4e2   : > { %v4529_v22 = vpop.permute.xlu0 %4528  ;;  %v4534_v10 = vpop.permute.xlu1 %4533  ;;  %5053 = vmatpush.bf16.msrb.mxu3 %v8488_v13 }
 0x4e3   : > { %4589 = vmatpush.bf16.msrb.mxu0 %v4504_v32 }
 0x4e4   : > { %4570 = vmatpush.bf16.msra.mxu2 %v4503_v9 }
 0x4e6   : > { %7728 = vmatmul.msk.bf16.vlgmr.msrb.gmra.mxu0 %vm939_vm15, %v8457_v43  ;;  %5054 = vmatpush.bf16.msrb.mxu3 %v8487_v54 }
 0x4e7   : > { %7726 = vmatmul.msk.bf16.vlgmr.msra.gmra.mxu2 %vm939_vm15, %v8457_v43  ;;  %4927 = vmatpush.bf16.msra.mxu0 %v4903_v34  ;;  %v5195_v43 = vsel %vm1031_vm10, %v5181_v26, 0  ;;  %v5035_v34 = vpack.c.b16 %v5022_v21, %v5022_v21 }
 0x4e8   : > { %4905 = vmatpush.bf16.msrb.mxu2 %v8478_v49  ;;  %v8500_v49 = vld [vmem:[%s12620_s13 + $0x154] sm:$0xff] }
 0x4ea   : > { %5055 = vmatpush.bf16.msrb.mxu3 %v8486_v30 }
 0x4eb   : > { %4928 = vmatpush.bf16.msra.mxu0 %v8482_v42 }
 0x4ec   : > { %4906 = vmatpush.bf16.msrb.mxu2 %v8477_v33 }
 0x4ee   : > { %5056 = vmatpush.bf16.msrb.mxu3 %v8485_v59 }
 0x4ef   : > { %4929 = vmatpush.bf16.msra.mxu0 %v8481_v55  ;;  %v8505_v55 = vld [vmem:[%s12620_s13 + $0x17c] sm:$0xff] }
 0x4f0   : > { %4907 = vmatpush.bf16.msrb.mxu2 %v8476_v0  ;;  %v8499_v0 = vld [vmem:[%s12620_s13 + $0x14c] sm:$0xff] }
 0x4f3   : > { %4930 = vmatpush.bf16.msra.mxu0 %v8480_v50  ;;  %v8494_v50 = vld [vmem:[%s12620_s13 + $0x120] sm:$0xff] }
 0x4f4   : > { %4908 = vmatpush.bf16.msrb.mxu2 %v8475_v4  ;;  %v5049_v4 = vsel %vm1031_vm10, %v5035_v34, 0  ;;  %vm5260_vm10 = vcmask 465920  }
 0x4f5   : > { %5073 = vmatpush.bf16.msrb.mxu1 %v5049_v4 }
 0x4f6   : > { %7729 = vmatmul.msk.bf16.gmra.mxu0 %vm939_vm15, %v8458_v19 }
 0x4f7   : > { %7727 = vmatmul.msk.bf16.gmra.mxu2 %vm939_vm15, %v8458_v19  ;;  %4931 = vmatpush.bf16.msra.mxu0 %v8479_v56  ;;  %vm5719_vm15 = vcmask 400384  }
 0x4f8   : > { %4909 = vmatpush.bf16.msrb.mxu2 %v8474_v51 }
 0x4f9   : > { %5074 = vmatpush.bf16.msrb.mxu1 %v8494_v50 }
 0x4fb   : > { %5219 = vmatpush.bf16.msrb.mxu0 %v5195_v43 }
 0x4fc   : > { %4910 = vmatpush.bf16.msrb.mxu2 %v8473_v25  ;;  %v8484_v25 = vld [vmem:[%s12620_s13 + $0xd0] sm:$0xff] }
 0x4fd   : > { %5057 = vmatpush.bf16.msrb.mxu3 %v8484_v25  ;;  %5075 = vmatpush.bf16.msrb.mxu1 %v8493_v8 }
 0x4ff   : > { %5220 = vmatpush.bf16.msrb.mxu0 %v8506_v61 }
 0x500   : > { %4911 = vmatpush.bf16.msrb.mxu2 %v8472_v46 }
 0x503   : > { %5221 = vmatpush.bf16.msrb.mxu0 %v8505_v55 }
 0x504   : > { %4912 = vmatpush.bf16.msrb.mxu2 %v8471_v52 }
 0x507   : > { %5222 = vmatpush.bf16.msrb.mxu0 %v8504_v18 }
 0x508   : > { %5197 = vmatpush.bf16.msra.mxu2 %v8502_v29 }
 0x50b   : > { %5223 = vmatpush.bf16.msrb.mxu0 %v8503_v6 }
 0x50c   : > { %5198 = vmatpush.bf16.msra.mxu2 %v8501_v5 }
 0x510   : > { %5199 = vmatpush.bf16.msra.mxu2 %v8500_v49 }
 0x514   : > { %5200 = vmatpush.bf16.msra.mxu2 %v8499_v0 }
 0x518   : > { %5201 = vmatpush.bf16.msra.mxu2 %v8498_v41 }
 0x563   : > { %v4591_v31 = vpop.f32.mrf.mxu0 }
 0x564   : > { %v12281_v58 = vadd.f32 %v4591_v31, %v4524_v44 }
 0x566   : > { %v4602_v40 = vsub.f32 0.0, %v12281_v58 }
 0x568   : > { %v4611_v24 = vmul.f32 1.442695, %v4602_v40 }
 0x56a   : > { %v4572_v47 = vpop.f32.mrf.mxu2  ;;  %8828 = vpow2.f32 %v4611_v24  ;;  %v8497_v24 = vld [vmem:[%s12620_s13 + $0x13c] sm:$0xff] }
 0x56b   : > { %v12299_v28 = vadd.f32 %v4572_v47, %v4524_v44  ;;  %v4593_v38 = vpop.f32.mrf.mxu0  ;;  %v8483_v47 = vld [vmem:[%s12620_s13 + $0xc8] sm:$0xff]  ;;  %5202 = vmatpush.bf16.msra.mxu2 %v8497_v24 }
 0x56c   : > { %v12304_v7 = vadd.f32 %v4593_v38, %v4529_v22  ;;  %5058 = vmatpush.bf16.msrb.mxu3 %v8483_v47 }
 0x56d   : > { %v4601_v63 = vsub.f32 0.0, %v12299_v28 }
 0x56e   : > { %v4604_v3 = vsub.f32 0.0, %v12304_v7 }
 0x56f   : > { %v4609_v16 = vmul.f32 1.442695, %v4601_v63 }
 0x570   : > { %v4615_v45 = vmul.f32 1.442695, %v4604_v3  ;;  %v8829_v48 = vpop.eup %8828 }
 0x571   : > { %v4626_v32 = vadd.f32 1.0, %v8829_v48 }
 0x572   : > { %8830 = vpow2.f32 %v4615_v45  ;;  %v4574_v14 = vpop.f32.mrf.mxu2 }
 0x573   : > { %8832 = vpow2.f32 %v4609_v16  ;;  %v12320_v1 = vadd.f32 %v4574_v14, %v4529_v22  ;;  %v4596_v62 = vpop.f32.mrf.mxu0  ;;  %v8495_v14 = vld [vmem:[%s12620_s13 + $0x12c] sm:$0xff] }
 0x574   : > { %v12325_v9 = vadd.f32 %v4596_v62, %v4534_v10  ;;  %8834 = vrcp.f32 %v4626_v32 }
 0x575   : > { %v4603_v19 = vsub.f32 0.0, %v12320_v1 }
 0x576   : > { %v4606_v20 = vsub.f32 0.0, %v12325_v9 }
 0x577   : > { %v4613_v37 = vmul.f32 1.442695, %v4603_v19 }
 0x578   : > { %v8831_v33 = vpop.eup %8830  ;;  %v4619_v17 = vmul.f32 1.442695, %v4606_v20 }
 0x579   : > { %v8833_v57 = vpop.eup %8832  ;;  %v4628_v2 = vadd.f32 1.0, %v8831_v33  ;;  %8836 = vpow2.f32 %v4613_v37 }
 0x57a   : > { %v4577_v11 = vpop.f32.mrf.mxu2  ;;  %v4625_v36 = vadd.f32 1.0, %v8833_v57  ;;  %v8835_v44 = vpop.eup %8834 }
 0x57b   : > { %8838 = vrcp.f32 %v4628_v2  ;;  %v12345_v42 = vadd.f32 %v4577_v11, %v4534_v10  ;;  %v4598_v27 = vpop.f32.mrf.mxu0  ;;  %v4642_v52 = vmul.f32 %v8835_v44, %v12281_v58  ;;  %v8492_v58 = vld [vmem:[%s12620_s13 + $0x110] sm:$0xff]  ;;  %v8491_v10 = vld [vmem:[%s12620_s13 + $0x108] sm:$0xff]  ;;  %v5265_v2 = vld [vmem:[%s12616_s9] sm:$0x3] }
 0x57c   : > { %v12354_v51 = vadd.f32 %v4598_v27, %v4539_v39  ;;  %8840 = vpow2.f32 %v4619_v17  ;;  %5076 = vmatpush.bf16.msrb.mxu1 %v8492_v58  ;;  %v12412_v17 = vperm.slane %v5265_v2, 0 }
 0x57d   : > { %v4605_v60 = vsub.f32 0.0, %v12345_v42  ;;  %8842 = vrcp.f32 %v4625_v36 }
 0x57e   : > { %v4608_v31 = vsub.f32 0.0, %v12354_v51  ;;  %5281 = vrot.lane.b32.xlu0 %v12412_v17, %s8922_s24 }
 0x57f   : > { %v8837_v56 = vpop.eup %8836  ;;  %v4617_v40 = vmul.f32 1.442695, %v4605_v60 }
 0x580   : > { %v4627_v35 = vadd.f32 1.0, %v8837_v56  ;;  %v4623_v46 = vmul.f32 1.442695, %v4608_v31  ;;  %5077 = vmatpush.bf16.msrb.mxu1 %v8491_v10 }
 0x581   : > { %v8839_v22 = vpop.eup %8838  ;;  %8844 = vpow2.f32 %v4617_v40 }
 0x582   : > { %v4644_v38 = vmul.f32 %v8839_v22, %v12304_v7  ;;  %8846 = vrcp.f32 %v4627_v35  ;;  %v4579_v53 = vpop.f32.mrf.mxu2  ;;  %v8841_v63 = vpop.eup %8840  ;;  %v8496_v7 = vld [vmem:[%s12620_s13 + $0x134] sm:$0xff] }
 0x583   : > { %8848 = vpow2.f32 %v4623_v46  ;;  %v4580_v3 = vadd.f32 %v4579_v53, %v4539_v39  ;;  %v8843_v13 = vpop.eup %8842  ;;  %v4630_v23 = vadd.f32 1.0, %v8841_v63  ;;  %5203 = vmatpush.bf16.msra.mxu2 %v8496_v7  ;;  %v12415_v39 = vperm.slane %v5265_v2, 1 }
 0x584   : > { %v4650_v29 = vpack.c.bf16 %v4644_v38, %v4642_v52  ;;  %v4641_v26 = vmul.f32 %v8843_v13, %v12299_v28 }
 0x585   : > { %v4607_v16 = vsub.f32 0.0, %v4580_v3 }
 0x586   : > { %7778 = vmatmul.msk.bf16.vlgmr.msra.gmra.mxu3 %vm4753_vm7, %v4650_v29  ;;  %7853 = vmatmul.msk.bf16.vlgmr.msra.gmra.mxu0 %vm4753_vm7, %v4650_v29 }
 0x587   : > { %v8845_v45 = vpop.eup %8844  ;;  %v4621_v15 = vmul.f32 1.442695, %v4607_v16  ;;  %5204 = vmatpush.bf16.msra.mxu2 %v8495_v14  ;;  %5273 = vrot.lane.b32.xlu0 %v12415_v39, %s12641_s25  ;;  %s8923_s25 = smov 8  }
 0x588   : > { %v8847_v48 = vpop.eup %8846  ;;  %v4629_v43 = vadd.f32 1.0, %v8845_v45 }
 0x589   : > { %v8849_v5 = vpop.eup %8848  ;;  %v4643_v62 = vmul.f32 %v8847_v48, %v12320_v1  ;;  %8850 = vpow2.f32 %v4621_v15 }
 0x58a   : > { %8852 = vrcp.f32 %v4630_v23  ;;  %v4632_v54 = vadd.f32 1.0, %v8849_v5 }
 0x58b   : > { %v4649_v32 = vpack.c.bf16 %v4643_v62, %v4641_v26 }
 0x58c   : > { %8854 = vrcp.f32 %v4632_v54 }
 0x58d   : > { %4771 = vmatmul.bf16.vlgmr.msra.gmra.mxu1 %v4649_v32  ;;  %4913 = vmatmul.bf16.vlgmr.msrb.gmra.mxu2 %v4649_v32  ;;  %8856 = vrcp.f32 %v4629_v43 }
 0x58f   : > { %v8851_v19 = vpop.eup %8850  ;;  %5302 = vrot.lane.b32.xlu0 %v12415_v39, %s8918_s27  ;;  %s12650_s27 = smov 14  }
 0x590   : > { %v8853_v20 = vpop.eup %8852  ;;  %v4631_v49 = vadd.f32 1.0, %v8851_v19 }
 0x591   : > { %v4646_v28 = vmul.f32 %v8853_v20, %v12325_v9 }
 0x592   : > { %v8855_v12 = vpop.eup %8854  ;;  %8858 = vrcp.f32 %v4631_v49 }
 0x593   : > { %v4648_v1 = vmul.f32 %v8855_v12, %v12354_v51  ;;  %v8857_v30 = vpop.eup %8856 }
 0x594   : > { %v4645_v21 = vmul.f32 %v8857_v30, %v12345_v42 }
 0x595   : > { %v4652_v37 = vpack.c.bf16 %v4648_v1, %v4646_v28 }
 0x597   : > { %7779 = vmatmul.msk.bf16.gmra.mxu3 %vm4753_vm7, %v4652_v37  ;;  %7854 = vmatmul.msk.bf16.gmra.mxu0 %vm4753_vm7, %v4652_v37 }
 0x598   : > { %v8859_v61 = vpop.eup %8858 }
 0x599   : > { %v4647_v33 = vmul.f32 %v8859_v61, %v4580_v3 }
 0x59b   : > { %v4651_v57 = vpack.c.bf16 %v4647_v33, %v4645_v21 }
 0x59d   : > { %4776 = vmatmul.bf16.gmra.mxu1 %v4651_v57  ;;  %4918 = vmatmul.bf16.gmra.mxu2 %v4651_v57 }
 0x5a7   : > { %5059 = vmatmul.bf16.vlgmr.msrb.gmra.mxu3 %v4649_v32  ;;  %8003 = vmatmul.msk.bf16.vlgmr.msrb.gmra.mxu0 %vm4753_vm7, %v4650_v29 }
 0x5ad   : > { %7928 = vmatmul.msk.bf16.vlgmr.msrb.gmra.mxu1 %vm4753_vm7, %v4650_v29  ;;  %5205 = vmatmul.bf16.vlgmr.msra.gmra.mxu2 %v4649_v32 }
 0x5b7   : > { %5064 = vmatmul.bf16.gmra.mxu3 %v4651_v57  ;;  %8004 = vmatmul.msk.bf16.gmra.mxu0 %vm4753_vm7, %v4652_v37 }
 0x5bd   : > { %7929 = vmatmul.msk.bf16.gmra.mxu1 %vm4753_vm7, %v4652_v37  ;;  %5210 = vmatmul.bf16.gmra.mxu2 %v4651_v57 }
 0x603   : > { %v4933_v9 = vpop.f32.mrf.mxu0 }
 0x609   : > { %v4791_v34 = vpop.f32.mrf.mxu3 }
 0x60a   : > { %v4772_v11 = vpop.f32.mrf.mxu1 }
 0x60b   : > { %v4935_v0 = vpop.f32.mrf.mxu0  ;;  %v4792_v15 = vadd.f32 %v4791_v34, %v4772_v11 }
 0x610   : > { %v4914_v42 = vpop.f32.mrf.mxu2 }
 0x611   : > { %v4793_v27 = vpop.f32.mrf.mxu3  ;;  %v4934_v58 = vadd.f32 %v4933_v9, %v4914_v42 }
 0x612   : > { %v4774_v4 = vpop.f32.mrf.mxu1 }
 0x613   : > { %v4943_v5 = vmax.f32 %v4792_v15, %v4934_v58  ;;  %v4794_v1 = vadd.f32 %v4793_v27, %v4774_v4 }
 0x614   : > { %v4938_v59 = vpop.f32.mrf.mxu0 }
 0x618   : > { %v4916_v55 = vpop.f32.mrf.mxu2 }
 0x619   : > { %v4936_v49 = vadd.f32 %v4935_v0, %v4916_v55  ;;  %v5282_v0 = vpop.permute.xlu0 %5281 }
 0x61a   : > { %v4796_v36 = vpop.f32.mrf.mxu3  ;;  %v4777_v51 = vpop.f32.mrf.mxu1 }
 0x61b   : > { %v4797_v52 = vadd.f32 %v4796_v36, %v4777_v51  ;;  %v4944_v30 = vmax.f32 %v4794_v1, %v4936_v49  ;;  %v5470_v49 = vld [vmem:[%s12615_s8 + $0x38] sm:$0xff]  ;;  %v5465_v1 = vld [vmem:[%s12615_s8 + $0x10] sm:$0xff] }
 0x61c   : > { %v4940_v60 = vpop.f32.mrf.mxu0 }
 0x620   : > { %v4919_v50 = vpop.f32.mrf.mxu2 }
 0x621   : > { %v4939_v6 = vadd.f32 %v4938_v59, %v4919_v50 }
 0x622   : > { %v4798_v41 = vpop.f32.mrf.mxu3  ;;  %v4779_v25 = vpop.f32.mrf.mxu1 }
 0x623   : > { %v4945_v63 = vmax.f32 %v4797_v52, %v4939_v6  ;;  %v4799_v48 = vadd.f32 %v4798_v41, %v4779_v25 }
 0x624   : > { %v5225_v31 = vpop.f32.mrf.mxu0 }
 0x628   : > { %v4921_v44 = vpop.f32.mrf.mxu2 }
 0x629   : > { %v4941_v7 = vadd.f32 %v4940_v60, %v4921_v44 }
 0x62a   : > { %v5060_v18 = vpop.f32.mrf.mxu3  ;;  %v5079_v56 = vpop.f32.mrf.mxu1 }
 0x62b   : > { %v5080_v10 = vadd.f32 %v5079_v56, %v5060_v18  ;;  %v4946_v26 = vmax.f32 %v4799_v48, %v4941_v7 }
 0x62c   : > { %v5227_v8 = vpop.f32.mrf.mxu0 }
 0x62d   : > { %v5089_v43 = vmax.f32 %v4943_v5, %v5080_v10 }
 0x630   : > { %v5206_v40 = vpop.f32.mrf.mxu2 }
 0x631   : > { %v5226_v62 = vadd.f32 %v5225_v31, %v5206_v40 }
 0x632   : > { %v5062_v35 = vpop.f32.mrf.mxu3  ;;  %v5081_v46 = vpop.f32.mrf.mxu1 }
 0x633   : > { %v5235_v12 = vmax.f32 %v5089_v43, %v5226_v62  ;;  %v5082_v37 = vadd.f32 %v5081_v46, %v5062_v35 }
 0x634   : > { %v5230_v53 = vpop.f32.mrf.mxu0 }
 0x635   : > { %v5090_v21 = vmax.f32 %v4944_v30, %v5082_v37  ;;  %v5466_v37 = vld [vmem:[%s12615_s8 + $0x18] sm:$0xff]  ;;  %v5468_v30 = vld [vmem:[%s12615_s8 + $0x28] sm:$0xff] }
 0x638   : > { %v5208_v24 = vpop.f32.mrf.mxu2 }
 0x639   : > { %v5228_v61 = vadd.f32 %v5227_v8, %v5208_v24  ;;  %v5274_v24 = vpop.permute.xlu0 %5273 }
 0x63a   : > { %v5065_v22 = vpop.f32.mrf.mxu3  ;;  %v5084_v47 = vpop.f32.mrf.mxu1 }
 0x63b   : > { %v5085_v38 = vadd.f32 %v5084_v47, %v5065_v22  ;;  %v5236_v33 = vmax.f32 %v5090_v21, %v5228_v61  ;;  %v5464_v61 = vld [vmem:[%s12615_s8 + $0x8] sm:$0xff]  ;;  %v5463_v21 = vld [vmem:[%s12615_s8] sm:$0xff] }
 0x63c   : > { %v5232_v54 = vpop.f32.mrf.mxu0 }
 0x63d   : > { %v5091_v29 = vmax.f32 %v4945_v63, %v5085_v38 }
 0x640   : > { %v5211_v3 = vpop.f32.mrf.mxu2 }
 0x641   : > { %v5231_v16 = vadd.f32 %v5230_v53, %v5211_v3  ;;  %v5303_v15 = vpop.permute.xlu0 %5302 }
 0x642   : > { %v5067_v13 = vpop.f32.mrf.mxu3  ;;  %v5086_v23 = vpop.f32.mrf.mxu1 }
 0x643   : > { %v5237_v45 = vmax.f32 %v5091_v29, %v5231_v16  ;;  %v5087_v14 = vadd.f32 %v5086_v23, %v5067_v13 }
 0x645   : > { %5247 = vrot.lane.b32.xlu1 %v5237_v45, %s8923_s25  ;;  %v5092_v19 = vmax.f32 %v4946_v26, %v5087_v14 }
 0x648   : > { %v5213_v32 = vpop.f32.mrf.mxu2 }
 0x649   : > { %v5233_v20 = vadd.f32 %v5232_v54, %v5213_v32 }
 0x64b   : > { %v5238_v28 = vmax.f32 %v5092_v19, %v5233_v20 }
 0x64d   : > { %5243 = vrot.lane.b32.xlu1 %v5235_v12, %s8923_s25  ;;  %5249 = vrot.lane.b32.xlu2 %v5238_v28, %s8923_s25  ;;  %v5467_v12 = vld [vmem:[%s12615_s8 + $0x20] sm:$0xff]  ;;  %v5469_v28 = vld [vmem:[%s12615_s8 + $0x30] sm:$0xff] }
 0x655   : > { %5295 = vrot.lane.b32.xlu1 %v12412_v17, %s12650_s27  ;;  %5245 = vrot.lane.b32.xlu2 %v5236_v33, %s8923_s25 }
 0x65d   : > { %5288 = vrot.lane.b32.xlu2 %v12415_v39, %s8924_s18 }
 0x6a7   : > { %v5250_v57 = vpop.permute.xlu2 %5249 }
 0x6a8   : > { %v5259_v9 = vsel %vm5255_vm8, 0.0, %v5250_v57 }
 0x6a9   : > { %v5264_v2 = vsel %vm5260_vm10, %v5259_v9, 0.0 }
 0x6aa   : > { %v5287_v59 = vmul.f32 %v5282_v0, %v5264_v2  ;;  %v12432_v39 = vmul.f32 %v12412_v17, %v5264_v2  ;;  %v5279_v6 = vmul.f32 %v5274_v24, %v5264_v2  ;;  %v5308_v5 = vmul.f32 %v5303_v15, %v5264_v2 }
 0x6af   : > { %v5246_v42 = vpop.permute.xlu2 %5245 }
 0x6b0   : > { %v5257_v36 = vsel %vm5255_vm8, 0.0, %v5246_v42 }
 0x6b1   : > { %v5262_v50 = vsel %vm5260_vm10, %v5257_v36, 0.0 }
 0x6b2   : > { %v5285_v56 = vmul.f32 %v5282_v0, %v5262_v50  ;;  %v12444_v35 = vmul.f32 %v12412_v17, %v5262_v50  ;;  %v5277_v53 = vmul.f32 %v5274_v24, %v5262_v50  ;;  %v5306_v19 = vmul.f32 %v5303_v15, %v5262_v50 }
 0x6b7   : > { %v5248_v34 = vpop.permute.xlu1 %5247  ;;  %v5289_v7 = vpop.permute.xlu2 %5288 }
 0x6b8   : > { %v5258_v11 = vsel %vm5255_vm8, 0.0, %v5248_v34  ;;  %v5292_v48 = vmul.f32 %v5289_v7, %v5262_v50  ;;  %v5294_v26 = vmul.f32 %v5289_v7, %v5264_v2 }
 0x6b9   : > { %v5263_v27 = vsel %vm5260_vm10, %v5258_v11, 0.0 }
 0x6ba   : > { %v5286_v4 = vmul.f32 %v5282_v0, %v5263_v27  ;;  %v12429_v55 = vmul.f32 %v12412_v17, %v5263_v27  ;;  %v8730_v46 = vpack.i.bf16 %v5264_v2, %v5263_v27  ;;  %v5278_v47 = vmul.f32 %v5274_v24, %v5263_v27 }
 0x6bb   : > { %v5293_v10 = vmul.f32 %v5289_v7, %v5263_v27  ;;  %v5307_v14 = vmul.f32 %v5303_v15, %v5263_v27 }
 0x6bc   : > { %v8725_v51 = vpack.i.bf16 %v5287_v59, %v5286_v4  ;;  %v5430_v60 = vpack.c.bf16 %v12432_v39, %v12429_v55  ;;  %v8750_v38 = vpack.i.bf16 %v5279_v6, %v5278_v47  ;;  %v8015_v55 = vld [vmem:[%s12614_s7 + $0x8] sm:$0xf]  ;;  %v8509_v39 = vld [vmem:[%s12614_s7 + $0x10] sm:$0xf0] }
 0x6bd   : > { %v8790_v54 = vpack.i.bf16 %v5308_v5, %v5307_v14  ;;  %v8775_v32 = vpack.i.bf16 %v5294_v26, %v5293_v10 }
 0x6be   : > { %8726 = vrot.lane.b32.xlu1 %v8725_v51, %s8925_s16 }
 0x6bf   : > { %v5244_v41 = vpop.permute.xlu1 %5243 }
 0x6c0   : > { %v5256_v25 = vsel %vm5255_vm8, 0.0, %v5244_v41 }
 0x6c1   : > { %v5261_v44 = vsel %vm5260_vm10, %v5256_v25, 0.0 }
 0x6c2   : > { %v8740_v31 = vpack.i.bf16 %v5262_v50, %v5261_v44  ;;  %v5284_v18 = vmul.f32 %v5282_v0, %v5261_v44  ;;  %v12441_v40 = vmul.f32 %v12412_v17, %v5261_v44  ;;  %v5276_v52 = vmul.f32 %v5274_v24, %v5261_v44 }
 0x6c3   : > { %v5291_v45 = vmul.f32 %v5289_v7, %v5261_v44  ;;  %v5305_v43 = vmul.f32 %v5303_v15, %v5261_v44 }
 0x6c4   : > { %8741 = vrot.lane.b32.xlu0 %v8740_v31, %s12651_s15  ;;  %v8720_v8 = vpack.i.bf16 %v5285_v56, %v5284_v18  ;;  %v5429_v22 = vpack.c.bf16 %v12444_v35, %v12441_v40  ;;  %v8735_v17 = vpack.i.bf16 %v5277_v53, %v5276_v52  ;;  %v8009_v40 = vld [vmem:[%s12614_s7 + $0xc] sm:$0xf0]  ;;  %v8016_v35 = vor.u32 %v8509_v39, %v8015_v55 }
 0x6c5   : > { %v8765_v62 = vpack.i.bf16 %v5292_v48, %v5291_v45  ;;  %v8785_v20 = vpack.i.bf16 %v5306_v19, %v5305_v43 }
 0x6c6   : > { %8731 = vrot.lane.b32.xlu1 %v8730_v46, %s12651_s15  ;;  %8721 = vrot.lane.b32.xlu2 %v8720_v8, %s8925_s16 }
 0x6c7   : > { %v5296_v63 = vpop.permute.xlu1 %5295 }
 0x6c8   : > { %v5298_v3 = vmul.f32 %v5296_v63, %v5261_v44  ;;  %v5299_v29 = vmul.f32 %v5296_v63, %v5262_v50  ;;  %v5300_v16 = vmul.f32 %v5296_v63, %v5263_v27  ;;  %v5301_v13 = vmul.f32 %v5296_v63, %v5264_v2 }
 0x6ca   : > { %v8760_v23 = vpack.i.bf16 %v5299_v29, %v5298_v3  ;;  %v8770_v58 = vpack.i.bf16 %v5301_v13, %v5300_v16 }
 0x6cc   : > { %8751 = vrot.lane.b32.xlu0 %v8750_v38, %s12648_s20 }
 0x6ce   : > { %8746 = vrot.lane.b32.xlu1 %v8730_v46, %s12649_s21  ;;  %8736 = vrot.lane.b32.xlu2 %v8735_v17, %s12648_s20  ;;  %s8926_s20 = smov 119  }
 0x6d4   : > { %8756 = vrot.lane.b32.xlu0 %v8740_v31, %s12649_s21  ;;  %s12653_s21 = smov 112  }
 0x6d6   : > { %8761 = vrot.lane.b32.xlu1 %v8760_v23, %s12652_s28  ;;  %8771 = vrot.lane.b32.xlu2 %v8770_v58, %s12652_s28 }
 0x6dc   : > { %8766 = vrot.lane.b32.xlu0 %v8765_v62, %s8926_s20 }
 0x6de   : > { %8791 = vrot.lane.b32.xlu1 %v8790_v54, %s12653_s21  ;;  %8776 = vrot.lane.b32.xlu2 %v8775_v32, %s8926_s20 }
 0x6e4   : > { %8786 = vrot.lane.b32.xlu0 %v8785_v20, %s12653_s21  ;;  %s8064_s21 = sshll.u32 %s12655_s30, 4 }
 0x6e5   : > { %s464_s17 = scalar_lea.vmem %s12621_s14, %s8064_s21 }
 0x6e6   : > { %8796 = vrot.lane.b32.xlu1 %v8740_v31, %s8927_s19  ;;  %8781 = vrot.lane.b32.xlu2 %v8730_v46, %s8927_s19 }
 0x6ec   : > { %5508 = vperm.xlu0 %8718, %v5470_v49  }
 0x6ee   : > { %5493 = vperm.xlu1 %8719, %v5467_v12   ;;  %5503 = vperm.xlu2 %8677, %v5469_v28  }
 0x6f4   : > { %5483 = vperm.xlu0 %8718, %v5465_v1  }
 0x6f6   : > { %5488 = vperm.xlu1 %8719, %v5466_v37   ;;  %5498 = vperm.xlu2 %8677, %v5468_v30   ;;  %v8007_v30 = vld [vmem:[%s12614_s7] sm:$0xf] }
 0x6fc   : > { %5478 = vperm.xlu0 %8718, %v5464_v61   ;;  %v8508_v61 = vld [vmem:[%s12614_s7 + $0x8] sm:$0xf0] }
 0x6fe   : > { %5473 = vperm.xlu2 %8677, %v5463_v21  }
 0x720   : > { %v8722_v33 = vpop.permute.xlu2 %8721 }
 0x721   : > { %v8724_v11 = vunpack.i.h.bf16 %v8722_v33  ;;  %v8723_v0 = vunpack.i.l.bf16 %v8722_v33  ;;  %v8008_v33 = vor.u32 %v8508_v61, %v8007_v30 }
 0x723   : > { %v5435_v4 = vpack.c.bf16 %v8724_v11, %v8723_v0 }
 0x728   : > { %v8737_v9 = vpop.permute.xlu2 %8736 }
 0x729   : > { %v8739_v6 = vunpack.i.h.bf16 %v8737_v9  ;;  %v8738_v52 = vunpack.i.l.bf16 %v8737_v9 }
 0x72b   : > { %v5433_v3 = vpack.c.bf16 %v8739_v6, %v8738_v52  ;;  %v8033_v6 = vld [vmem:[%s12614_s7 + $0x3c] sm:$0xf0] }
 0x730   : > { %v8727_v57 = vpop.permute.xlu1 %8726  ;;  %v8772_v50 = vpop.permute.xlu2 %8771 }
 0x731   : > { %v8729_v2 = vunpack.i.h.bf16 %v8727_v57  ;;  %v8728_v34 = vunpack.i.l.bf16 %v8727_v57  ;;  %v8774_v31 = vunpack.i.h.bf16 %v8772_v50  ;;  %v8773_v56 = vunpack.i.l.bf16 %v8772_v50  ;;  %v8512_v50 = vld [vmem:[%s12614_s7 + $0x28] sm:$0xf0] }
 0x733   : > { %v5436_v42 = vpack.c.bf16 %v8729_v2, %v8728_v34  ;;  %v5442_v53 = vpack.c.bf16 %v8774_v31, %v8773_v56  ;;  %v8514_v56 = vld [vmem:[%s12614_s7 + $0x38] sm:$0xf0] }
 0x735   : > { %5584 = vmatpush.bf16.msra.mxu3 %v5436_v42  ;;  %v8507_v42 = vld [vmem:[%s12614_s7 + $0x4] sm:$0xf] }
 0x736   : > { %v8742_v27 = vpop.permute.xlu0 %8741 }
 0x737   : > { %v8744_v41 = vunpack.i.h.bf16 %v8742_v27  ;;  %v8743_v25 = vunpack.i.l.bf16 %v8742_v27  ;;  %v8012_v27 = vor.u32 %v8507_v42, %v8009_v40 }
 0x738   : > { %v8732_v59 = vpop.permute.xlu1 %8731  ;;  %v8777_v29 = vpop.permute.xlu2 %8776 }
 0x739   : > { %v8734_v36 = vunpack.i.h.bf16 %v8732_v59  ;;  %v8733_v51 = vunpack.i.l.bf16 %v8732_v59  ;;  %5585 = vmatpush.bf16.msra.mxu3 %v5435_v4  ;;  %v5443_v46 = vpack.c.bf16 %v8744_v41, %v8743_v25  ;;  %v8779_v48 = vunpack.i.h.bf16 %v8777_v29  ;;  %v8019_v4 = vld [vmem:[%s12614_s7 + $0x18] sm:$0xf]  ;;  %v8511_v59 = vld [vmem:[%s12614_s7 + $0x20] sm:$0xf0]  ;;  %v8510_v41 = vld [vmem:[%s12614_s7 + $0x1c] sm:$0xf] }
 0x73a   : > { %v8778_v10 = vunpack.i.l.bf16 %v8777_v29  ;;  %v8021_v25 = vld [vmem:[%s12614_s7 + $0x24] sm:$0xf0]  ;;  %v8518_v29 = vld [vmem:[%s12614_s7 + $0x58] sm:$0xf0] }
 0x73b   : > { %v5444_v44 = vpack.c.bf16 %v8734_v36, %v8733_v51  ;;  %v8020_v36 = vor.u32 %v8511_v59, %v8019_v4  ;;  %v8027_v51 = vld [vmem:[%s12614_s7 + $0x20] sm:$0xf]  ;;  %v8024_v31 = vor.u32 %v8510_v41, %v8021_v25 }
 0x73c   : > { %v5440_v62 = vpack.c.bf16 %v8779_v48, %v8778_v10 }
 0x73d   : > { %5613 = vmatpush.bf16.msra.mxu1 %v5444_v44  ;;  %v8028_v44 = vor.u32 %v8512_v50, %v8027_v51 }
 0x73e   : > { %v8752_v18 = vpop.permute.xlu0 %8751 }
 0x73f   : > { %v8754_v8 = vunpack.i.h.bf16 %v8752_v18  ;;  %v8753_v24 = vunpack.i.l.bf16 %v8752_v18  ;;  %v8031_v18 = vld [vmem:[%s12614_s7 + $0x30] sm:$0xf] }
 0x740   : > { %v8747_v47 = vpop.permute.xlu1 %8746  ;;  %v8782_v43 = vpop.permute.xlu2 %8781 }
 0x741   : > { %v5434_v38 = vpack.c.bf16 %v8754_v8, %v8753_v24  ;;  %5614 = vmatpush.bf16.msra.mxu1 %v5443_v46  ;;  %v8749_v17 = vunpack.i.h.bf16 %v8747_v47  ;;  %v8748_v63 = vunpack.i.l.bf16 %v8747_v47  ;;  %v8784_v12 = vunpack.i.h.bf16 %v8782_v43  ;;  %v8039_v8 = vld [vmem:[%s12614_s7 + $0x38] sm:$0xf]  ;;  %v8515_v24 = vld [vmem:[%s12614_s7 + $0x40] sm:$0xf0]  ;;  %v8513_v47 = vld [vmem:[%s12614_s7 + $0x34] sm:$0xf] }
 0x742   : > { %v8783_v28 = vunpack.i.l.bf16 %v8782_v43  ;;  %v8032_v46 = vor.u32 %v8514_v56, %v8031_v18  ;;  %v8040_v52 = vor.u32 %v8515_v24, %v8039_v8 }
 0x743   : > { %5586 = vmatpush.bf16.msra.mxu3 %v5434_v38  ;;  %v5432_v13 = vpack.c.bf16 %v8749_v17, %v8748_v63  ;;  %v8036_v38 = vor.u32 %v8513_v47, %v8033_v6  ;;  %v8517_v17 = vld [vmem:[%s12614_s7 + $0x50] sm:$0xf0] }
 0x744   : > { %v5438_v57 = vpack.c.bf16 %v8784_v12, %v8783_v28 }
 0x745   : > { %5615 = vmatpush.bf16.msra.mxu1 %v5442_v53  ;;  %v8043_v53 = vld [vmem:[%s12614_s7 + $0x48] sm:$0xf] }
 0x746   : > { %v8757_v16 = vpop.permute.xlu0 %8756  ;;  %v8044_v63 = vor.u32 %v8517_v17, %v8043_v53 }
 0x747   : > { %5587 = vmatpush.bf16.msra.mxu3 %v5433_v3  ;;  %v8759_v58 = vunpack.i.h.bf16 %v8757_v16  ;;  %v8758_v7 = vunpack.i.l.bf16 %v8757_v16  ;;  %v8051_v3 = vld [vmem:[%s12614_s7 + $0x50] sm:$0xf]  ;;  %v8516_v16 = vld [vmem:[%s12614_s7 + $0x4c] sm:$0xf] }
 0x748   : > { %v8762_v23 = vpop.permute.xlu1 %8761 }
 0x749   : > { %v8764_v45 = vunpack.i.h.bf16 %v8762_v23  ;;  %v8763_v15 = vunpack.i.l.bf16 %v8762_v23  ;;  %v5431_v5 = vpack.c.bf16 %v8759_v58, %v8758_v7  ;;  %v8052_v23 = vor.u32 %v8518_v29, %v8051_v3 }
 0x74b   : > { %v5441_v14 = vpack.c.bf16 %v8764_v45, %v8763_v15  ;;  %5588 = vmatpush.bf16.msra.mxu3 %v5432_v13  ;;  %v8045_v13 = vld [vmem:[%s12614_s7 + $0x54] sm:$0xf0]  ;;  %v5504_v15 = vpop.permute.xlu2 %5503 }
 0x74c   : > { %v8048_v58 = vor.u32 %v8516_v16, %v8045_v13 }
 0x74d   : > { %5616 = vmatpush.bf16.msra.mxu1 %v5441_v14 }
 0x74e   : > { %v8767_v26 = vpop.permute.xlu0 %8766 }
 0x74f   : > { %v8769_v54 = vunpack.i.h.bf16 %v8767_v26  ;;  %v8768_v32 = vunpack.i.l.bf16 %v8767_v26  ;;  %5589 = vmatpush.bf16.msra.mxu3 %v5431_v5 }
 0x750   : > { %v8792_v19 = vpop.permute.xlu1 %8791 }
 0x751   : > { %v8794_v20 = vunpack.i.h.bf16 %v8792_v19  ;;  %v8793_v49 = vunpack.i.l.bf16 %v8792_v19  ;;  %5617 = vmatpush.bf16.msra.mxu1 %v5440_v62  ;;  %v5439_v1 = vpack.c.bf16 %v8769_v54, %v8768_v32 }
 0x753   : > { %v5446_v37 = vpack.c.bf16 %v8794_v20, %v8793_v49  ;;  %5590 = vmatpush.bf16.msra.mxu3 %v5430_v60  ;;  %v5499_v5 = vpop.permute.xlu2 %5498 }
 0x755   : > { %5618 = vmatpush.bf16.msra.mxu1 %v5439_v1  ;;  %5648 = vmatpush.bf16.msrb.mxu2 %v5446_v37 }
 0x756   : > { %v8787_v21 = vpop.permute.xlu0 %8786 }
 0x757   : > { %v8789_v9 = vunpack.i.h.bf16 %v8787_v21  ;;  %v8788_v2 = vunpack.i.l.bf16 %v8787_v21  ;;  %5591 = vmatpush.bf16.msra.mxu3 %v5429_v22 }
 0x758   : > { %v8797_v60 = vpop.permute.xlu1 %8796 }
 0x759   : > { %v5445_v34 = vpack.c.bf16 %v8789_v9, %v8788_v2  ;;  %v8799_v11 = vunpack.i.h.bf16 %v8797_v60  ;;  %v8798_v0 = vunpack.i.l.bf16 %v8797_v60  ;;  %5619 = vmatpush.bf16.msra.mxu1 %v5438_v57 }
 0x75a   : > { %5592 = vmatmul.bf16.vlgmr.msra.gmra.mxu3 %v8008_v33 }
 0x75b   : > { %v5437_v22 = vpack.c.bf16 %v8799_v11, %v8798_v0  ;;  %5649 = vmatpush.bf16.msrb.mxu2 %v5445_v34  ;;  %v5474_v43 = vpop.permute.xlu2 %5473 }
 0x75d   : > { %5620 = vmatpush.bf16.msra.mxu1 %v5437_v22 }
 0x75e   : > { %8053 = vmatmul.msk.bf16.vlgmr.msrb.gmra.mxu2 %vm5571_vm13, %v8016_v35  ;;  %v5509_v20 = vpop.permute.xlu0 %5508 }
 0x760   : > { %5621 = vmatmul.bf16.vlgmr.msra.gmra.mxu1 %v8012_v27  ;;  %v5494_v30 = vpop.permute.xlu1 %5493 }
 0x766   : > { %v5484_v57 = vpop.permute.xlu0 %5483 }
 0x76a   : > { %5597 = vmatmul.bf16.gmra.mxu3 %v8020_v36  ;;  %v5489_v36 = vpop.permute.xlu1 %5488 }
 0x76e   : > { %8054 = vmatmul.msk.bf16.gmra.mxu2 %vm5571_vm13, %v8028_v44  ;;  %v5479_v4 = vpop.permute.xlu0 %5478 }
 0x770   : > { %5626 = vmatmul.bf16.gmra.mxu1 %v8024_v31 }
 0x77a   : > { %5602 = vmatmul.bf16.gmra.mxu3 %v8032_v46 }
 0x77e   : > { %8055 = vmatmul.msk.bf16.gmra.mxu2 %vm5571_vm13, %v8040_v52 }
 0x780   : > { %5631 = vmatmul.bf16.gmra.mxu1 %v8036_v38 }
 0x78a   : > { %5607 = vmatmul.bf16.gmra.mxu3 %v8044_v63 }
 0x78e   : > { %8056 = vmatmul.msk.bf16.gmra.mxu2 %vm5571_vm13, %v8052_v23 }
 0x790   : > { %5636 = vmatmul.bf16.gmra.mxu1 %v8048_v58 }
 0x7dd   : > { %v5593_v7 = vpop.f32.mrf.mxu3  ;;  %v5622_v45 = vpop.f32.mrf.mxu1 }
 0x7de   : > { %v5594_v19 = vadd.f32 %v5593_v7, %v5474_v43 }
 0x7e0   : > { %v5623_v28 = vadd.f32 %v5622_v45, %v5594_v19 }
 0x7e1   : > { %v5651_v48 = vpop.f32.mrf.mxu2 }
 0x7e2   : > { %v12564_v37 = vadd.f32 %v5651_v48, %v5623_v28 }
 0x7e4   : > { %v5671_v9 = vsub.f32 0.0, %v12564_v37 }
 0x7e5   : > { %v5595_v10 = vpop.f32.mrf.mxu3  ;;  %v5624_v14 = vpop.f32.mrf.mxu1 }
 0x7e6   : > { %v5679_v60 = vmul.f32 1.442695, %v5671_v9  ;;  %v5596_v51 = vadd.f32 %v5595_v10, %v5479_v4 }
 0x7e8   : > { %8860 = vpow2.f32 %v5679_v60  ;;  %v5625_v8 = vadd.f32 %v5624_v14, %v5596_v51 }
 0x7e9   : > { %v5653_v26 = vpop.f32.mrf.mxu2 }
 0x7ea   : > { %v12570_v3 = vadd.f32 %v5653_v26, %v5625_v8 }
 0x7ec   : > { %v5672_v45 = vsub.f32 0.0, %v12570_v3 }
 0x7ed   : > { %v5598_v62 = vpop.f32.mrf.mxu3  ;;  %v5627_v54 = vpop.f32.mrf.mxu1 }
 0x7ee   : > { %v5599_v34 = vadd.f32 %v5598_v62, %v5484_v57  ;;  %v8861_v31 = vpop.eup %8860  ;;  %v5681_v43 = vmul.f32 1.442695, %v5672_v45 }
 0x7ef   : > { %v5695_v17 = vadd.f32 1.0, %v8861_v31 }
 0x7f0   : > { %v5628_v22 = vadd.f32 %v5627_v54, %v5599_v34 }
 0x7f1   : > { %v5656_v32 = vpop.f32.mrf.mxu2 }
 0x7f2   : > { %v12567_v41 = vadd.f32 %v5656_v32, %v5628_v22 }
 0x7f4   : > { %v5673_v6 = vsub.f32 0.0, %v12567_v41 }
 0x7f5   : > { %v5600_v49 = vpop.f32.mrf.mxu3  ;;  %v5629_v12 = vpop.f32.mrf.mxu1 }
 0x7f6   : > { %v5601_v25 = vadd.f32 %v5600_v49, %v5489_v36  ;;  %v5683_v16 = vmul.f32 1.442695, %v5673_v6 }
 0x7f8   : > { %v5630_v52 = vadd.f32 %v5629_v12, %v5601_v25 }
 0x7f9   : > { %v5658_v1 = vpop.f32.mrf.mxu2 }
 0x7fa   : > { %v12572_v13 = vadd.f32 %v5658_v1, %v5630_v52 }
 0x7fc   : > { %v5674_v14 = vsub.f32 0.0, %v12572_v13 }
 0x7fd   : > { %v5603_v61 = vpop.f32.mrf.mxu3  ;;  %v5632_v21 = vpop.f32.mrf.mxu1 }
 0x7fe   : > { %v5604_v33 = vadd.f32 %v5603_v61, %v5494_v30  ;;  %v5685_v28 = vmul.f32 1.442695, %v5674_v14 }
 0x800   : > { %v5633_v2 = vadd.f32 %v5632_v21, %v5604_v33 }
 0x801   : > { %v5661_v55 = vpop.f32.mrf.mxu2 }
 0x802   : > { %v5662_v39 = vadd.f32 %v5661_v55, %v5633_v2 }
 0x804   : > { %v5675_v11 = vsub.f32 0.0, %v5662_v39 }
 0x805   : > { %v5605_v0 = vpop.f32.mrf.mxu3  ;;  %v5634_v42 = vpop.f32.mrf.mxu1 }
 0x806   : > { %v5687_v40 = vmul.f32 1.442695, %v5675_v11  ;;  %v5606_v35 = vadd.f32 %v5605_v0, %v5499_v5 }
 0x808   : > { %8862 = vpow2.f32 %v5687_v40  ;;  %v5635_v27 = vadd.f32 %v5634_v42, %v5606_v35 }
 0x809   : > { %v5663_v59 = vpop.f32.mrf.mxu2 }
 0x80a   : > { %v5664_v50 = vadd.f32 %v5663_v59, %v5635_v27 }
 0x80c   : > { %v5676_v44 = vsub.f32 0.0, %v5664_v50 }
 0x80d   : > { %v5608_v18 = vpop.f32.mrf.mxu3  ;;  %v5637_v56 = vpop.f32.mrf.mxu1 }
 0x80e   : > { %v8863_v46 = vpop.eup %8862  ;;  %v5689_v24 = vmul.f32 1.442695, %v5676_v44  ;;  %v5609_v47 = vadd.f32 %v5608_v18, %v5504_v15 }
 0x80f   : > { %v5699_v38 = vadd.f32 1.0, %v8863_v46 }
 0x810   : > { %8864 = vpow2.f32 %v5689_v24  ;;  %v5638_v53 = vadd.f32 %v5637_v56, %v5609_v47 }
 0x811   : > { %8866 = vrcp.f32 %v5699_v38  ;;  %v5666_v63 = vpop.f32.mrf.mxu2 }
 0x812   : > { %v5667_v29 = vadd.f32 %v5666_v63, %v5638_v53  ;;  %8868 = vrcp.f32 %v5695_v17 }
 0x813   : > { %8870 = vpow2.f32 %v5683_v16 }
 0x814   : > { %v5677_v23 = vsub.f32 0.0, %v5667_v29 }
 0x815   : > { %v5610_v58 = vpop.f32.mrf.mxu3  ;;  %v5639_v62 = vpop.f32.mrf.mxu1 }
 0x816   : > { %v8865_v7 = vpop.eup %8864  ;;  %v5691_v15 = vmul.f32 1.442695, %v5677_v23  ;;  %v5611_v48 = vadd.f32 %v5610_v58, %v5509_v20  ;;  %v5750_v58 = vld [vmem:[%s12618_s11] sm:$0xff] }
 0x817   : > { %v8867_v10 = vpop.eup %8866  ;;  %v5700_v5 = vadd.f32 1.0, %v8865_v7 }
 0x818   : > { %8872 = vpow2.f32 %v5691_v15  ;;  %v5640_v26 = vadd.f32 %v5639_v62, %v5611_v48  ;;  %v5715_v54 = vmul.f32 %v8867_v10, %v5662_v39  ;;  %v8869_v12 = vpop.eup %8868  ;;  %v5751_v15 = vld [vmem:[%s12618_s11 + $0x8] sm:$0x3] }
 0x819   : > { %8874 = vrcp.f32 %v5700_v5  ;;  %v5668_v32 = vpop.f32.mrf.mxu2  ;;  %v8871_v1 = vpop.eup %8870  ;;  %v5711_v21 = vmul.f32 %v8869_v12, %v12564_v37 }
 0x81a   : > { %v5669_v19 = vadd.f32 %v5668_v32, %v5640_v26  ;;  %v5732_v49 = vsel %vm5719_vm15, %v5715_v54, -inf  ;;  %8876 = vpow2.f32 %v5681_v43  ;;  %v5697_v2 = vadd.f32 1.0, %v8871_v1 }
 0x81b   : > { %5733 = vmax.xlane.f32.xlu0 %v5732_v49  ;;  %8878 = vpow2.f32 %v5685_v28  ;;  %v5720_v39 = vsel %vm5719_vm15, %v5711_v21, -inf }
 0x81c   : > { %v5678_v20 = vsub.f32 0.0, %v5669_v19 }
 0x81e   : > { %v8873_v30 = vpop.eup %8872  ;;  %v5693_v61 = vmul.f32 1.442695, %v5678_v20 }
 0x81f   : > { %v8875_v33 = vpop.eup %8874  ;;  %v5701_v57 = vadd.f32 1.0, %v8873_v30 }
 0x820   : > { %8880 = vpow2.f32 %v5693_v61  ;;  %v5716_v9 = vmul.f32 %v8875_v33, %v5664_v50  ;;  %v8877_v60 = vpop.eup %8876 }
 0x821   : > { %8882 = vrcp.f32 %v5701_v57  ;;  %v8879_v34 = vpop.eup %8878  ;;  %v5696_v37 = vadd.f32 1.0, %v8877_v60 }
 0x822   : > { %v5735_v55 = vsel %vm5719_vm15, %v5716_v9, -inf  ;;  %8884 = vrcp.f32 %v5697_v2  ;;  %v5698_v35 = vadd.f32 1.0, %v8879_v34 }
 0x823   : > { %5736 = vmax.xlane.f32.xlu2 %v5735_v55  ;;  %5721 = vmax.xlane.f32.xlu0 %v5720_v39 }
 0x826   : > { %v8881_v11 = vpop.eup %8880 }
 0x827   : > { %v8883_v0 = vpop.eup %8882  ;;  %v5702_v42 = vadd.f32 1.0, %v8881_v11 }
 0x828   : > { %v5717_v40 = vmul.f32 %v8883_v0, %v5667_v29  ;;  %v8885_v27 = vpop.eup %8884  ;;  %v8519_v29 = vld [vmem:[%s12617_s10] sm:$0x10] }
 0x829   : > { %8886 = vrcp.f32 %v5702_v42  ;;  %v5713_v4 = vmul.f32 %v8885_v27, %v12567_v41 }
 0x82a   : > { %v5738_v22 = vsel %vm5719_vm15, %v5717_v40, -inf  ;;  %8888 = vrcp.f32 %v5696_v37 }
 0x82b   : > { %5739 = vmax.xlane.f32.xlu1 %v5738_v22  ;;  %8890 = vrcp.f32 %v5698_v35  ;;  %v5726_v25 = vsel %vm5719_vm15, %v5713_v4, -inf }
 0x82f   : > { %v8887_v59 = vpop.eup %8886 }
 0x830   : > { %v5718_v36 = vmul.f32 %v8887_v59, %v5669_v19  ;;  %v8889_v51 = vpop.eup %8888 }
 0x831   : > { %v8891_v44 = vpop.eup %8890  ;;  %v5712_v18 = vmul.f32 %v8889_v51, %v12570_v3  ;;  %v8059_v3 = vld [vmem:[%s12617_s10] sm:$0xf] }
 0x832   : > { %v5741_v50 = vsel %vm5719_vm15, %v5718_v36, -inf  ;;  %v5714_v31 = vmul.f32 %v8891_v44, %v12572_v13  ;;  %v8060_v23 = vor.u32 %v8519_v29, %v8059_v3 }
 0x833   : > { %5742 = vmax.xlane.f32.xlu2 %v5741_v50  ;;  %5727 = vmax.xlane.f32.xlu1 %v5726_v25  ;;  %v5723_v46 = vsel %vm5719_vm15, %v5712_v18, -inf }
 0x834   : > { %v5729_v56 = vsel %vm5719_vm15, %v5714_v31, -inf }
 0x83b   : > { %5730 = vmax.xlane.f32.xlu2 %v5729_v56  ;;  %5724 = vmax.xlane.f32.xlu1 %v5723_v46 }
 0x88e   : > { %v5734_v52 = vpop.xlane.xlu0 %5733 }
 0x896   : > { %v5737_v41 = vpop.xlane.xlu2 %5736  ;;  %v5722_v16 = vpop.xlane.xlu0 %5721 }
 0x897   : > { %v5748_v38 = vpack.c.bf16 %v5737_v41, %v5734_v52 }
 0x89e   : > { %v5740_v8 = vpop.xlane.xlu1 %5739 }
 0x8a6   : > { %v5743_v24 = vpop.xlane.xlu2 %5742  ;;  %v5728_v47 = vpop.xlane.xlu1 %5727 }
 0x8a7   : > { %v5749_v6 = vpack.c.bf16 %v5743_v24, %v5740_v8 }
 0x8a9   : > { %5765 = vmatpush.bf16.msra.mxu0 %v5749_v6 }
 0x8ad   : > { %5766 = vmatpush.bf16.msra.mxu0 %v5748_v38 }
 0x8ae   : > { %v5731_v53 = vpop.xlane.xlu2 %5730  ;;  %v5725_v63 = vpop.xlane.xlu1 %5724 }
 0x8af   : > { %v5747_v17 = vpack.c.bf16 %v5731_v53, %v5728_v47  ;;  %v5746_v13 = vpack.c.bf16 %v5725_v63, %v5722_v16 }
 0x8b1   : > { %5767 = vmatpush.bf16.msra.mxu0 %v5747_v17 }
 0x8b5   : > { %5768 = vmatpush.bf16.msra.mxu0 %v5746_v13 }
 0x8b8   : > { %8061 = vmatmul.msk.bf16.vlgmr.msra.gmra.mxu0 %vm5757_vm3, %v8060_v23 }
 0x935   : > { %v5770_v7 = vpop.f32.mrf.mxu0 }
 0x936   : > { %v5771_v45 = vadd.f32 %v5770_v7, %v5750_v58 }
 0x938   : > { %5776 = vst.msk [vmem:[%s464_s17] sm:$0xff] %vm5775_vm5, %v5771_v45 }
 0x93d   : > { %v5772_v48 = vpop.f32.mrf.mxu0 }
 0x93e   : > { %v5773_v10 = vadd.f32 %v5772_v48, %v5751_v15 }
 0x940   : > { %5778 = vst.msk [vmem:[%s464_s17 + $0x8] sm:$0x3] %vm5777_vm2, %v5773_v10 }
 0x941 PF: > { %s24_s29 = sadd.s32 1, %s8898_s29  }
 0x942   : > { %p21_p4 = scmp.ge.s32.totalorder %s24_s29, 4  }
 0x944   :  { %23 = sbr.rel (!%p21_p4) target bundleno = 1 (0x1), region = 112 }

</bundles_post_ra>
